<compile_context>
chip_gen: v5e
topology: v5e:2x2
jax: 0.10.0
libtpu: 0.0.40
codegen_flags: <defaults>
</compile_context>

<pallas_src>
import functools

import jax
import jax.numpy as jnp
import numpy as np
from jax.experimental import pallas as pl
from jax.experimental.pallas import tpu as pltpu


# ---------------------------------------------------------------------------
# Fused kernel: ffc MLP + flatten(2) + caption gating + predict MLP + log_softmax
# ---------------------------------------------------------------------------
def _encoder_image_kernel(B, N, pc,
                          x_ref, gate_ref,
                          wf1_ref, bf1_ref, wf2_ref, bf2_ref,
                          wp1_ref, bp1_ref, wp2_ref, bp2_ref,
                          wp3_ref, bp3_ref,
                          o_ref,
                          fl_ref, acc_ref):
    BN = B * N
    j = pl.program_id(0)

    @pl.when(j == 0)
    def _init():
        acc_ref[...] = jnp.zeros_like(acc_ref)

    # ---- Stage 1: per-patch ffc MLP for this patch chunk. Rows are ordered
    # (patch, batch*node), so the whole chunk is one big sublane-aligned matmul chain.
    x = x_ref[...]                                                    # (pc*BN, F) f32
    h = jnp.dot(x.astype(jnp.bfloat16), wf1_ref[...],
                preferred_element_type=jnp.float32) + bf1_ref[...]
    h = jnp.maximum(h, 0.0)                                           # (pc*BN, 512) f32
    # TODO(synk): nn.Dropout(0.5) is stochastic in training; inference (identity) here.
    feat64 = jnp.dot(h.astype(jnp.bfloat16), wf2_ref[...],
                     preferred_element_type=jnp.float32) + bf2_ref[...]  # (pc*BN, 64) f32

    # ---- flatten(2), in-kernel: place each patch's 64 features at its lane offset so
    # the predict matmul sees lane-dense (BN, pc*64) rows (no HBM relayout between stages).
    for q in range(pc):                                               # static unroll
        fl_ref[:, q * 64:(q + 1) * 64] = feat64[q * BN:(q + 1) * BN, :]

    # ---- caption gating (f32 on the VPU) + accumulate this chunk of the first predict
    # layer: (BN, pc*64) @ (pc*64, 1024), with w_p1 streamed chunk-by-chunk over the grid.
    gated = fl_ref[...] * gate_ref[...]                               # (BN, pc*64) f32
    acc_ref[...] += jnp.dot(gated.astype(jnp.bfloat16), wp1_ref[...],
                            preferred_element_type=jnp.float32)

    # ---- last chunk: finish the predict MLP + log_softmax over nodes, write output.
    @pl.when(j == pl.num_programs(0) - 1)
    def _finalize():
        h1 = jnp.maximum(acc_ref[...] + bp1_ref[...], 0.0)            # (BN, 1024) f32
        h2 = jnp.dot(h1.astype(jnp.bfloat16), wp2_ref[...],
                     preferred_element_type=jnp.float32) + bp2_ref[...]
        h2 = jnp.maximum(h2, 0.0)                                     # (BN, 512) f32
        # Linear(512, 1) as a VPU multiply + lane reduction (avoids a 1-lane MXU matmul).
        logits = jnp.sum(h2 * wp3_ref[...], axis=-1, keepdims=True) + bp3_ref[...]
        # log_softmax over the node axis; the full node axis lives in this single block,
        # so per-batch-segment max/LSE is exact. Output is only 16 scalars.
        for b in range(B):                                            # static unroll
            seg = logits[b * N:(b + 1) * N, :]                        # (N, 1)
            m = jnp.max(seg, axis=0, keepdims=True)
            lse = m + jnp.log(jnp.sum(jnp.exp(seg - m), axis=0, keepdims=True))
            o_ref[b * N:(b + 1) * N, :] = seg - lse


def _patch_chunk(P, BN, min_chunks=4):
    """Patches per grid step: largest divisor of P giving >= min_chunks steps whose
    block shapes satisfy the TPU (8,128) tiling constraints (chunk*64 must be a
    multiple of 128, chunk*BN a multiple of 8). Falls back to a single full step."""
    best = None
    for d in range(1, P + 1):
        if P % d:
            continue
        if P // d < min_chunks:
            continue
        if (d * BN) % 8 or (d * 64) % 128:
            continue
        best = d
    return best if best is not None else P


@jax.jit
def encoder_image_forward(images, cap_emb, params):
    """images: (B, N, P, F) f32; cap_emb: (B, P*64) f32 -> (B, N, 1) log-softmax scores."""
    B, N, P, F = images.shape
    assert P * 64 == 2304, "predict head hardwires Linear(2304, ...)  =>  P must be 36"
    BN = B * N
    pc = _patch_chunk(P, BN)
    n_chunks = P // pc

    # Layout plumbing in the wrapper (cheap XLA ops; keeps the kernel reshape-free):
    #   x2d rows are (patch, batch*node) so a patch chunk is a contiguous row block;
    #   gate rows are (batch*node) with the caption embedding broadcast over nodes.
    x2d = jnp.transpose(images, (2, 0, 1, 3)).reshape(P * BN, F)
    gate = jnp.broadcast_to(cap_emb[:, None, :], (B, N, P * 64)).reshape(BN, P * 64)

    (wf1, bf1, wf2, bf2, wp1, bp1, wp2, bp2, wp3, bp3) = params

    kernel = functools.partial(_encoder_image_kernel, B, N, pc)
    out = pl.pallas_call(
        kernel,
        out_shape=jax.ShapeDtypeStruct((BN, 1), jnp.float32),
        grid=(n_chunks,),
        in_specs=[
            pl.BlockSpec((pc * BN, F), lambda j: (j, 0)),        # patch-chunk rows (streamed)
            pl.BlockSpec((BN, pc * 64), lambda j: (0, j)),       # caption gate columns (streamed)
            pl.BlockSpec((F, 512), lambda j: (0, 0)),            # W_ffc1 bf16 (VMEM resident)
            pl.BlockSpec((1, 512), lambda j: (0, 0)),            # b_ffc1
            pl.BlockSpec((512, 64), lambda j: (0, 0)),           # W_ffc2 bf16 (resident)
            pl.BlockSpec((1, 64), lambda j: (0, 0)),             # b_ffc2
            pl.BlockSpec((pc * 64, 1024), lambda j: (j, 0)),     # W_p1 chunk bf16 (streamed!)
            pl.BlockSpec((1, 1024), lambda j: (0, 0)),           # b_p1
            pl.BlockSpec((1024, 512), lambda j: (0, 0)),         # W_p2 bf16 (resident)
            pl.BlockSpec((1, 512), lambda j: (0, 0)),            # b_p2
            pl.BlockSpec((1, 512), lambda j: (0, 0)),            # W_p3^T as (1, 512) f32
            pl.BlockSpec((1, 1), lambda j: (0, 0)),              # b_p3
        ],
        out_specs=pl.BlockSpec((BN, 1), lambda j: (0, 0)),       # resident; written at last step
        scratch_shapes=[
            pltpu.VMEM((BN, pc * 64), jnp.float32),              # flattened/gated chunk features
            pltpu.VMEM((BN, 1024), jnp.float32),                 # predict layer-1 f32 accumulator
        ],
        compiler_params=pltpu.CompilerParams(
            # Single REDUCTION axis: "arbitrary" so v7x does not shard it across its two
            # TensorCores (which would duplicate the resident/streamed weight DMA).
            dimension_semantics=("arbitrary",),
            # Actual working set ~5 MB (double-buffered streamed blocks + resident bf16
            # weights + scratch); 16 MiB leaves comfortable headroom on every generation.
            vmem_limit_bytes=16 * 1024 * 1024),
    )(x2d, gate, wf1, bf1, wf2, bf2, wp1, bp1, wp2, bp2, wp3, bp3)

    return out.reshape(B, N, 1)


# ---------------------------------------------------------------------------
# Module wrapper
# ---------------------------------------------------------------------------
def _xavier_uniform(key, fan_in, fan_out):
    limit = float(np.sqrt(6.0 / (fan_in + fan_out)))
    return jax.random.uniform(key, (fan_in, fan_out), jnp.float32, -limit, limit)


class EncoderImagePallas:
    """JAX/Pallas re-implementation of EncoderImage (inference forward pass)."""

    def __init__(self, pano_embed_size, key):
        ks = jax.random.split(key, 5)
        # f32 master weights (init identical to the PyTorch module: xavier_uniform_, bias=0.01).
        self.w_f1 = _xavier_uniform(ks[0], pano_embed_size, 512)
        self.b_f1 = jnp.full((1, 512), 0.01, jnp.float32)
        self.w_f2 = _xavier_uniform(ks[1], 512, 64)
        self.b_f2 = jnp.full((1, 64), 0.01, jnp.float32)
        self.w_p1 = _xavier_uniform(ks[2], 2304, 1024)
        self.b_p1 = jnp.full((1, 1024), 0.01, jnp.float32)
        self.w_p2 = _xavier_uniform(ks[3], 1024, 512)
        self.b_p2 = jnp.full((1, 512), 0.01, jnp.float32)
        self.w_p3 = _xavier_uniform(ks[4], 512, 1)
        self.b_p3 = jnp.full((1, 1), 0.01, jnp.float32)
        # bf16 copies for the MXU / HBM-traffic path (halves the dominant weight DMA);
        # biases and the 512->1 row stay f32 (they feed VPU adds / the lane reduction).
        self._kernel_params = (
            self.w_f1.astype(jnp.bfloat16), self.b_f1,
            self.w_f2.astype(jnp.bfloat16), self.b_f2,
            self.w_p1.astype(jnp.bfloat16), self.b_p1,
            self.w_p2.astype(jnp.bfloat16), self.b_p2,
            jnp.transpose(self.w_p3), self.b_p3,
        )

    def __call__(self, images, cap_emb):
        return encoder_image_forward(images, cap_emb, self._kernel_params)


def _reference_forward(enc, images, cap_emb):
    """Pure-JAX f32 reference of EncoderImage.forward (inference)."""
    h = jnp.maximum(images @ enc.w_f1 + enc.b_f1, 0.0)
    feats = h @ enc.w_f2 + enc.b_f2                      # (B, N, P, 64)
    B, N = images.shape[:2]
    feats = feats.reshape(B, N, -1)                      # (B, N, 2304)
    feats = feats * cap_emb[:, None, :]
    h1 = jnp.maximum(feats @ enc.w_p1 + enc.b_p1, 0.0)
    h2 = jnp.maximum(h1 @ enc.w_p2 + enc.b_p2, 0.0)
    logits = h2 @ enc.w_p3 + enc.b_p3                    # (B, N, 1)
    return jax.nn.log_softmax(logits, axis=1)


if __name__ == "__main__":
    # predict head hardwires the flattened size to 2304 = P * 64  =>  P = 36.
    B, N, P, F = 2, 8, 36, 128

    key = jax.random.PRNGKey(0)
    k_param, k_img, k_cap = jax.random.split(key, 3)

    enc = EncoderImagePallas(F, k_param)

    images = jax.random.normal(k_img, (B, N, P, F), jnp.float32)
    cap_emb = jax.random.normal(k_cap, (B, P * 64), jnp.float32)

    out = jax.block_until_ready(enc(images, cap_emb))
    assert out.shape == (B, N, 1), out.shape

    ref = jax.block_until_ready(_reference_forward(enc, images, cap_emb))
    # bf16 weights (f32 accumulation) vs the f32 reference: tolerance loosened per review.
    np.testing.assert_allclose(np.asarray(out), np.asarray(ref),
                               rtol=2e-2, atol=2e-2)

    print("KERNEL_OK")
</pallas_src>

<mosaic_0001>
module attributes {stable_mosaic.version = 11 : i64} {
  func.func @_encoder_image_kernel(%arg0: i32, %arg1: memref<96x128xf32, #tpu.memory_space<vmem>>, %arg2: memref<16x384xf32, #tpu.memory_space<vmem>>, %arg3: memref<128x512xbf16, #tpu.memory_space<vmem>>, %arg4: memref<1x512xf32, #tpu.memory_space<vmem>>, %arg5: memref<512x64xbf16, #tpu.memory_space<vmem>>, %arg6: memref<1x64xf32, #tpu.memory_space<vmem>>, %arg7: memref<384x1024xbf16, #tpu.memory_space<vmem>>, %arg8: memref<1x1024xf32, #tpu.memory_space<vmem>>, %arg9: memref<1024x512xbf16, #tpu.memory_space<vmem>>, %arg10: memref<1x512xf32, #tpu.memory_space<vmem>>, %arg11: memref<1x512xf32, #tpu.memory_space<vmem>>, %arg12: memref<1x1xf32, #tpu.memory_space<vmem>>, %arg13: memref<16x1xf32, #tpu.memory_space<vmem>>, %arg14: memref<16x384xf32, #tpu.memory_space<vmem>>, %arg15: memref<16x1024xf32, #tpu.memory_space<vmem>>) attributes {dimension_semantics = [#tpu.dimension_semantics<arbitrary>], iteration_bounds = array<i64: 6>, scalar_prefetch = 0 : i64, scratch_operands = 2 : i64, tpu.core_type = #tpu.core_type<tc>, window_params = [{transform_indices = @transform_0, window_bounds = array<i64: 96, 128>}, {transform_indices = @transform_1, window_bounds = array<i64: 16, 384>}, {pipeline_mode = #tpu.pipeline_mode<synchronous>, transform_indices = @transform_2, window_bounds = array<i64: 128, 512>}, {pipeline_mode = #tpu.pipeline_mode<synchronous>, transform_indices = @transform_3, window_bounds = array<i64: 1, 512>}, {pipeline_mode = #tpu.pipeline_mode<synchronous>, transform_indices = @transform_4, window_bounds = array<i64: 512, 64>}, {pipeline_mode = #tpu.pipeline_mode<synchronous>, transform_indices = @transform_5, window_bounds = array<i64: 1, 64>}, {transform_indices = @transform_6, window_bounds = array<i64: 384, 1024>}, {pipeline_mode = #tpu.pipeline_mode<synchronous>, transform_indices = @transform_7, window_bounds = array<i64: 1, 1024>}, {pipeline_mode = #tpu.pipeline_mode<synchronous>, transform_indices = @transform_8, window_bounds = array<i64: 1024, 512>}, {pipeline_mode = #tpu.pipeline_mode<synchronous>, transform_indices = @transform_9, window_bounds = array<i64: 1, 512>}, {pipeline_mode = #tpu.pipeline_mode<synchronous>, transform_indices = @transform_10, window_bounds = array<i64: 1, 512>}, {pipeline_mode = #tpu.pipeline_mode<synchronous>, transform_indices = @transform_11, window_bounds = array<i64: 1, 1>}, {pipeline_mode = #tpu.pipeline_mode<synchronous>, transform_indices = @transform_12, window_bounds = array<i64: 16, 1>}]} {
    %c0_i32 = arith.constant 0 : i32
    %0 = arith.cmpi eq, %arg0, %c0_i32 : i32
    %1 = arith.extui %0 : i1 to i32
    %c0_i32_0 = arith.constant 0 : i32
    %2 = arith.cmpi ne, %1, %c0_i32_0 : i32
    scf.if %2 {
      %cst_31 = arith.constant 0.000000e+00 : f32
      %42 = vector.broadcast %cst_31 : f32 to vector<16x1024xf32>
      %c0_32 = arith.constant 0 : index
      %c0_33 = arith.constant 0 : index
      %43 = vector.load %arg15[%c0_32, %c0_33] : memref<16x1024xf32, #tpu.memory_space<vmem>>, vector<16x1024xf32>
      tpu.vector_store %arg15[%c0_32, %c0_33], %42 {strides = array<i32>} : memref<16x1024xf32, #tpu.memory_space<vmem>>, vector<16x1024xf32>,
    } else {
    }
    %c0 = arith.constant 0 : index
    %c0_1 = arith.constant 0 : index
    %3 = vector.load %arg1[%c0, %c0_1] : memref<96x128xf32, #tpu.memory_space<vmem>>, vector<96x128xf32>
    %4 = arith.truncf %3 : vector<96x128xf32> to vector<96x128xbf16>
    %c0_2 = arith.constant 0 : index
    %c0_3 = arith.constant 0 : index
    %5 = vector.load %arg3[%c0_2, %c0_3] : memref<128x512xbf16, #tpu.memory_space<vmem>>, vector<128x512xbf16>
    %cst = arith.constant dense<0.000000e+00> : vector<96x512xf32>
    %6 = tpu.matmul %4, %5, %cst {dimension_numbers = #tpu.dot_dimension_numbers<[1], [0], [0], [1], [0, 0, 1, 1], [], []>} : vector<96x128xbf16>, vector<128x512xbf16>, vector<96x512xf32> -> vector<96x512xf32>
    %c0_4 = arith.constant 0 : index
    %c0_5 = arith.constant 0 : index
    %7 = vector.load %arg4[%c0_4, %c0_5] : memref<1x512xf32, #tpu.memory_space<vmem>>, vector<1x512xf32>
    %8 = vector.broadcast %7 : vector<1x512xf32> to vector<96x512xf32>
    %9 = arith.addf %6, %8 : vector<96x512xf32>
    %cst_6 = arith.constant 0.000000e+00 : f32
    %10 = vector.broadcast %cst_6 : f32 to vector<96x512xf32>
    %11 = arith.maximumf %9, %10 : vector<96x512xf32>
    %12 = arith.truncf %11 : vector<96x512xf32> to vector<96x512xbf16>
    %c0_7 = arith.constant 0 : index
    %c0_8 = arith.constant 0 : index
    %13 = vector.load %arg5[%c0_7, %c0_8] : memref<512x64xbf16, #tpu.memory_space<vmem>>, vector<512x64xbf16>
    %cst_9 = arith.constant dense<0.000000e+00> : vector<96x64xf32>
    %14 = tpu.matmul %12, %13, %cst_9 {dimension_numbers = #tpu.dot_dimension_numbers<[1], [0], [0], [1], [0, 0, 1, 1], [], []>} : vector<96x512xbf16>, vector<512x64xbf16>, vector<96x64xf32> -> vector<96x64xf32>
    %c0_10 = arith.constant 0 : index
    %c0_11 = arith.constant 0 : index
    %15 = vector.load %arg6[%c0_10, %c0_11] : memref<1x64xf32, #tpu.memory_space<vmem>>, vector<1x64xf32>
    %16 = vector.broadcast %15 : vector<1x64xf32> to vector<96x64xf32>
    %17 = arith.addf %14, %16 : vector<96x64xf32>
    %18 = vector.extract_strided_slice %17 {offsets = [0, 0], sizes = [16, 64], strides = [1, 1]} : vector<96x64xf32> to vector<16x64xf32>
    %c0_12 = arith.constant 0 : index
    %c0_13 = arith.constant 0 : index
    %19 = vector.load %arg14[%c0_12, %c0_13] : memref<16x384xf32, #tpu.memory_space<vmem>>, vector<16x64xf32>
    tpu.vector_store %arg14[%c0_12, %c0_13], %18 {strides = array<i32>} : memref<16x384xf32, #tpu.memory_space<vmem>>, vector<16x64xf32>,
    %20 = vector.extract_strided_slice %17 {offsets = [16, 0], sizes = [16, 64], strides = [1, 1]} : vector<96x64xf32> to vector<16x64xf32>
    %c0_14 = arith.constant 0 : index
    %c64 = arith.constant 64 : index
    %21 = vector.load %arg14[%c0_14, %c64] : memref<16x384xf32, #tpu.memory_space<vmem>>, vector<16x64xf32>
    tpu.vector_store %arg14[%c0_14, %c64], %20 {strides = array<i32>} : memref<16x384xf32, #tpu.memory_space<vmem>>, vector<16x64xf32>,
    %22 = vector.extract_strided_slice %17 {offsets = [32, 0], sizes = [16, 64], strides = [1, 1]} : vector<96x64xf32> to vector<16x64xf32>
    %c0_15 = arith.constant 0 : index
    %c128 = arith.constant 128 : index
    %23 = vector.load %arg14[%c0_15, %c128] : memref<16x384xf32, #tpu.memory_space<vmem>>, vector<16x64xf32>
    tpu.vector_store %arg14[%c0_15, %c128], %22 {strides = array<i32>} : memref<16x384xf32, #tpu.memory_space<vmem>>, vector<16x64xf32>,
    %24 = vector.extract_strided_slice %17 {offsets = [48, 0], sizes = [16, 64], strides = [1, 1]} : vector<96x64xf32> to vector<16x64xf32>
    %c0_16 = arith.constant 0 : index
    %c192 = arith.constant 192 : index
    %25 = vector.load %arg14[%c0_16, %c192] : memref<16x384xf32, #tpu.memory_space<vmem>>, vector<16x64xf32>
    tpu.vector_store %arg14[%c0_16, %c192], %24 {strides = array<i32>} : memref<16x384xf32, #tpu.memory_space<vmem>>, vector<16x64xf32>,
    %26 = vector.extract_strided_slice %17 {offsets = [64, 0], sizes = [16, 64], strides = [1, 1]} : vector<96x64xf32> to vector<16x64xf32>
    %c0_17 = arith.constant 0 : index
    %c256 = arith.constant 256 : index
    %27 = vector.load %arg14[%c0_17, %c256] : memref<16x384xf32, #tpu.memory_space<vmem>>, vector<16x64xf32>
    tpu.vector_store %arg14[%c0_17, %c256], %26 {strides = array<i32>} : memref<16x384xf32, #tpu.memory_space<vmem>>, vector<16x64xf32>,
    %28 = vector.extract_strided_slice %17 {offsets = [80, 0], sizes = [16, 64], strides = [1, 1]} : vector<96x64xf32> to vector<16x64xf32>
    %c0_18 = arith.constant 0 : index
    %c320 = arith.constant 320 : index
    %29 = vector.load %arg14[%c0_18, %c320] : memref<16x384xf32, #tpu.memory_space<vmem>>, vector<16x64xf32>
    tpu.vector_store %arg14[%c0_18, %c320], %28 {strides = array<i32>} : memref<16x384xf32, #tpu.memory_space<vmem>>, vector<16x64xf32>,
    %c0_19 = arith.constant 0 : index
    %c0_20 = arith.constant 0 : index
    %30 = vector.load %arg14[%c0_19, %c0_20] : memref<16x384xf32, #tpu.memory_space<vmem>>, vector<16x384xf32>
    %c0_21 = arith.constant 0 : index
    %c0_22 = arith.constant 0 : index
    %31 = vector.load %arg2[%c0_21, %c0_22] : memref<16x384xf32, #tpu.memory_space<vmem>>, vector<16x384xf32>
    %32 = arith.mulf %30, %31 : vector<16x384xf32>
    %c0_23 = arith.constant 0 : index
    %c0_24 = arith.constant 0 : index
    %33 = vector.load %arg15[%c0_23, %c0_24] : memref<16x1024xf32, #tpu.memory_space<vmem>>, vector<16x1024xf32>
    %34 = arith.truncf %32 : vector<16x384xf32> to vector<16x384xbf16>
    %c0_25 = arith.constant 0 : index
    %c0_26 = arith.constant 0 : index
    %35 = vector.load %arg7[%c0_25, %c0_26] : memref<384x1024xbf16, #tpu.memory_space<vmem>>, vector<384x1024xbf16>
    %cst_27 = arith.constant dense<0.000000e+00> : vector<16x1024xf32>
    %36 = tpu.matmul %34, %35, %cst_27 {dimension_numbers = #tpu.dot_dimension_numbers<[1], [0], [0], [1], [0, 0, 1, 1], [], []>} : vector<16x384xbf16>, vector<384x1024xbf16>, vector<16x1024xf32> -> vector<16x1024xf32>
    %37 = arith.addf %33, %36 : vector<16x1024xf32>
    %c0_28 = arith.constant 0 : index
    %c0_29 = arith.constant 0 : index
    %38 = vector.load %arg15[%c0_28, %c0_29] : memref<16x1024xf32, #tpu.memory_space<vmem>>, vector<16x1024xf32>
    tpu.vector_store %arg15[%c0_28, %c0_29], %37 {strides = array<i32>} : memref<16x1024xf32, #tpu.memory_space<vmem>>, vector<16x1024xf32>,
    %c5_i32 = arith.constant 5 : i32
    %39 = arith.cmpi eq, %arg0, %c5_i32 : i32
    %40 = arith.extui %39 : i1 to i32
    %c0_i32_30 = arith.constant 0 : i32
    %41 = arith.cmpi ne, %40, %c0_i32_30 : i32
    scf.if %41 {
      %c0_31 = arith.constant 0 : index
      %c0_32 = arith.constant 0 : index
      %42 = vector.load %arg15[%c0_31, %c0_32] : memref<16x1024xf32, #tpu.memory_space<vmem>>, vector<16x1024xf32>
      %c0_33 = arith.constant 0 : index
      %c0_34 = arith.constant 0 : index
      %43 = vector.load %arg8[%c0_33, %c0_34] : memref<1x1024xf32, #tpu.memory_space<vmem>>, vector<1x1024xf32>
      %44 = vector.broadcast %43 : vector<1x1024xf32> to vector<16x1024xf32>
      %45 = arith.addf %42, %44 : vector<16x1024xf32>
      %cst_35 = arith.constant 0.000000e+00 : f32
      %46 = vector.broadcast %cst_35 : f32 to vector<16x1024xf32>
      %47 = arith.maximumf %45, %46 : vector<16x1024xf32>
      %48 = arith.truncf %47 : vector<16x1024xf32> to vector<16x1024xbf16>
      %c0_36 = arith.constant 0 : index
      %c0_37 = arith.constant 0 : index
      %49 = vector.load %arg9[%c0_36, %c0_37] : memref<1024x512xbf16, #tpu.memory_space<vmem>>, vector<1024x512xbf16>
      %cst_38 = arith.constant dense<0.000000e+00> : vector<16x512xf32>
      %50 = tpu.matmul %48, %49, %cst_38 {dimension_numbers = #tpu.dot_dimension_numbers<[1], [0], [0], [1], [0, 0, 1, 1], [], []>} : vector<16x1024xbf16>, vector<1024x512xbf16>, vector<16x512xf32> -> vector<16x512xf32>
      %c0_39 = arith.constant 0 : index
      %c0_40 = arith.constant 0 : index
      %51 = vector.load %arg10[%c0_39, %c0_40] : memref<1x512xf32, #tpu.memory_space<vmem>>, vector<1x512xf32>
      %52 = vector.broadcast %51 : vector<1x512xf32> to vector<16x512xf32>
      %53 = arith.addf %50, %52 : vector<16x512xf32>
      %cst_41 = arith.constant 0.000000e+00 : f32
      %54 = vector.broadcast %cst_41 : f32 to vector<16x512xf32>
      %55 = arith.maximumf %53, %54 : vector<16x512xf32>
      %c0_42 = arith.constant 0 : index
      %c0_43 = arith.constant 0 : index
      %56 = vector.load %arg11[%c0_42, %c0_43] : memref<1x512xf32, #tpu.memory_space<vmem>>, vector<1x512xf32>
      %57 = vector.broadcast %56 : vector<1x512xf32> to vector<16x512xf32>
      %58 = arith.mulf %55, %57 : vector<16x512xf32>
      %cst_44 = arith.constant dense<0.000000e+00> : vector<16xf32>
      %59 = vector.multi_reduction <add>, %58, %cst_44 [1] : vector<16x512xf32> to vector<16xf32>
      %60 = vector.shape_cast %59 : vector<16xf32> to vector<16x1xf32>
      %c0_45 = arith.constant 0 : index
      %c0_46 = arith.constant 0 : index
      %61 = vector.load %arg12[%c0_45, %c0_46] : memref<1x1xf32, #tpu.memory_space<vmem>>, vector<1x1xf32>
      %62 = vector.broadcast %61 : vector<1x1xf32> to vector<16x1xf32>
      %63 = arith.addf %60, %62 : vector<16x1xf32>
      %64 = vector.extract_strided_slice %63 {offsets = [0, 0], sizes = [8, 1], strides = [1, 1]} : vector<16x1xf32> to vector<8x1xf32>
      %cst_47 = arith.constant dense<0xFF800000> : vector<1xf32>
      %65 = vector.multi_reduction <maximumf>, %64, %cst_47 [0] : vector<8x1xf32> to vector<1xf32>
      %66 = vector.shape_cast %65 : vector<1xf32> to vector<1x1xf32>
      %67 = vector.broadcast %66 : vector<1x1xf32> to vector<8x1xf32>
      %68 = arith.subf %64, %67 : vector<8x1xf32>
      %69 = math.exp %68 : vector<8x1xf32>
      %cst_48 = arith.constant dense<0.000000e+00> : vector<1xf32>
      %70 = vector.multi_reduction <add>, %69, %cst_48 [0] : vector<8x1xf32> to vector<1xf32>
      %71 = vector.shape_cast %70 : vector<1xf32> to vector<1x1xf32>
      %72 = math.log %71 : vector<1x1xf32>
      %73 = arith.addf %66, %72 : vector<1x1xf32>
      %74 = vector.broadcast %73 : vector<1x1xf32> to vector<8x1xf32>
      %75 = arith.subf %64, %74 : vector<8x1xf32>
      %c0_49 = arith.constant 0 : index
      %c0_50 = arith.constant 0 : index
      %76 = vector.load %arg13[%c0_49, %c0_50] : memref<16x1xf32, #tpu.memory_space<vmem>>, vector<8x1xf32>
      tpu.vector_store %arg13[%c0_49, %c0_50], %75 {strides = array<i32>} : memref<16x1xf32, #tpu.memory_space<vmem>>, vector<8x1xf32>,
      %77 = vector.extract_strided_slice %63 {offsets = [8, 0], sizes = [8, 1], strides = [1, 1]} : vector<16x1xf32> to vector<8x1xf32>
      %cst_51 = arith.constant dense<0xFF800000> : vector<1xf32>
      %78 = vector.multi_reduction <maximumf>, %77, %cst_51 [0] : vector<8x1xf32> to vector<1xf32>
      %79 = vector.shape_cast %78 : vector<1xf32> to vector<1x1xf32>
      %80 = vector.broadcast %79 : vector<1x1xf32> to vector<8x1xf32>
      %81 = arith.subf %77, %80 : vector<8x1xf32>
      %82 = math.exp %81 : vector<8x1xf32>
      %cst_52 = arith.constant dense<0.000000e+00> : vector<1xf32>
      %83 = vector.multi_reduction <add>, %82, %cst_52 [0] : vector<8x1xf32> to vector<1xf32>
      %84 = vector.shape_cast %83 : vector<1xf32> to vector<1x1xf32>
      %85 = math.log %84 : vector<1x1xf32>
      %86 = arith.addf %79, %85 : vector<1x1xf32>
      %87 = vector.broadcast %86 : vector<1x1xf32> to vector<8x1xf32>
      %88 = arith.subf %77, %87 : vector<8x1xf32>
      %c8 = arith.constant 8 : index
      %c0_53 = arith.constant 0 : index
      %89 = vector.load %arg13[%c8, %c0_53] : memref<16x1xf32, #tpu.memory_space<vmem>>, vector<8x1xf32>
      tpu.vector_store %arg13[%c8, %c0_53], %88 {strides = array<i32>} : memref<16x1xf32, #tpu.memory_space<vmem>>, vector<8x1xf32>,
    } else {
    }
    return
  }
  func.func @transform_0(%arg0: i32) -> (i32, i32) {
    %c0_i32 = arith.constant 0 : i32
    %c0_i32_0 = arith.constant 0 : i32
    return %arg0, %c0_i32 : i32, i32
  }
  func.func @transform_1(%arg0: i32) -> (i32, i32) {
    %c0_i32 = arith.constant 0 : i32
    %c0_i32_0 = arith.constant 0 : i32
    return %c0_i32, %arg0 : i32, i32
  }
  func.func @transform_2(%arg0: i32) -> (i32, i32) {
    %c0_i32 = arith.constant 0 : i32
    %c0_i32_0 = arith.constant 0 : i32
    %c0_i32_1 = arith.constant 0 : i32
    return %c0_i32, %c0_i32_0 : i32, i32
  }
  func.func @transform_3(%arg0: i32) -> (i32, i32) {
    %c0_i32 = arith.constant 0 : i32
    %c0_i32_0 = arith.constant 0 : i32
    %c0_i32_1 = arith.constant 0 : i32
    return %c0_i32, %c0_i32_0 : i32, i32
  }
  func.func @transform_4(%arg0: i32) -> (i32, i32) {
    %c0_i32 = arith.constant 0 : i32
    %c0_i32_0 = arith.constant 0 : i32
    %c0_i32_1 = arith.constant 0 : i32
    return %c0_i32, %c0_i32_0 : i32, i32
  }
  func.func @transform_5(%arg0: i32) -> (i32, i32) {
    %c0_i32 = arith.constant 0 : i32
    %c0_i32_0 = arith.constant 0 : i32
    %c0_i32_1 = arith.constant 0 : i32
    return %c0_i32, %c0_i32_0 : i32, i32
  }
  func.func @transform_6(%arg0: i32) -> (i32, i32) {
    %c0_i32 = arith.constant 0 : i32
    %c0_i32_0 = arith.constant 0 : i32
    return %arg0, %c0_i32 : i32, i32
  }
  func.func @transform_7(%arg0: i32) -> (i32, i32) {
    %c0_i32 = arith.constant 0 : i32
    %c0_i32_0 = arith.constant 0 : i32
    %c0_i32_1 = arith.constant 0 : i32
    return %c0_i32, %c0_i32_0 : i32, i32
  }
  func.func @transform_8(%arg0: i32) -> (i32, i32) {
    %c0_i32 = arith.constant 0 : i32
    %c0_i32_0 = arith.constant 0 : i32
    %c0_i32_1 = arith.constant 0 : i32
    return %c0_i32, %c0_i32_0 : i32, i32
  }
  func.func @transform_9(%arg0: i32) -> (i32, i32) {
    %c0_i32 = arith.constant 0 : i32
    %c0_i32_0 = arith.constant 0 : i32
    %c0_i32_1 = arith.constant 0 : i32
    return %c0_i32, %c0_i32_0 : i32, i32
  }
  func.func @transform_10(%arg0: i32) -> (i32, i32) {
    %c0_i32 = arith.constant 0 : i32
    %c0_i32_0 = arith.constant 0 : i32
    %c0_i32_1 = arith.constant 0 : i32
    return %c0_i32, %c0_i32_0 : i32, i32
  }
  func.func @transform_11(%arg0: i32) -> (i32, i32) {
    %c0_i32 = arith.constant 0 : i32
    %c0_i32_0 = arith.constant 0 : i32
    %c0_i32_1 = arith.constant 0 : i32
    return %c0_i32, %c0_i32_0 : i32, i32
  }
  func.func @transform_12(%arg0: i32) -> (i32, i32) {
    %c0_i32 = arith.constant 0 : i32
    %c0_i32_0 = arith.constant 0 : i32
    %c0_i32_1 = arith.constant 0 : i32
    return %c0_i32, %c0_i32_0 : i32, i32
  }
}

</mosaic_0001>

<bundles_post_ra>
// kernel: encoder_image_forward.1
= control target key start
LH: loop header
LB: loop body
LE: loop exit
PB: predicated region body
PF: predicated region fallthrough
CT: control target
= control target key end

     0   :  { %s9365_s0 = inlined_call_operand.vmem [shape: f32[576,128], index: 0, kind: input, shape index: {}]   ;;  %s9366_s1 = inlined_call_operand.vmem [shape: f32[16,2304], index: 1, kind: input, shape index: {}]   ;;  %s9367_s2 = inlined_call_operand.hbm [shape: bf16[128,512], index: 2, kind: input, shape index: {}]   ;;  %s9368_s3 = inlined_call_operand.hbm [shape: f32[1,512], index: 3, kind: input, shape index: {}]   ;;  %s9369_s4 = inlined_call_operand.vmem [shape: bf16[512,64], index: 4, kind: input, shape index: {}]   ;;  %s9370_s5 = inlined_call_operand.hbm [shape: f32[1,64], index: 5, kind: input, shape index: {}]   ;;  %s9371_s6 = inlined_call_operand.hbm [shape: bf16[2304,1024], index: 6, kind: input, shape index: {}]   ;;  %s9372_s7 = inlined_call_operand.hbm [shape: f32[1,1024], index: 7, kind: input, shape index: {}]   ;;  %s9373_s8 = inlined_call_operand.hbm [shape: bf16[1024,512], index: 8, kind: input, shape index: {}]   ;;  %s9374_s9 = inlined_call_operand.hbm [shape: f32[1,512], index: 9, kind: input, shape index: {}]   ;;  %s9375_s10 = inlined_call_operand.hbm [shape: f32[1,512], index: 10, kind: input, shape index: {}]   ;;  %s9376_s11 = inlined_call_operand.<no memory space> [shape: f32[1,1], index: 11, kind: input, shape index: {}]   ;;  %s9377_s12 = inlined_call_operand.vmem [shape: f32[16,1], index: 12, kind: output, shape index: {}]  }
   0x1   :  { %9381 = sst [smem:[#allocation27_spill]] %s9367_s2  ;;  %v17_v0 = vstv %s9376_s11 }
   0x2   :  { %9382 = sst [smem:[#allocation28_spill]] %s9368_s3  ;;  %18 = vst [vmem:[#allocation4] sm:$0x1] %v17_v0 }
   0x3   :  { %9383 = sst [smem:[#allocation29_spill]] %s9373_s8 }
   0x4   :  { %9384 = sst [smem:[#allocation30_spill]] %s9377_s12 }
   0x5   :  { %19 = vsyncpa [#allocation7], 0 }
   0x6   :  { %20 = vsyncpa [#allocation9], 0 }
   0x7   :  { %21 = vsyncpa [#allocation12], 0 }
   0x8   :  { %23 = vsyncpa [#allocation12 + $0x1], 0 }
   0x9   :  { %24 = vsyncpa [#allocation15], 0 }
   0xa   :  { %25 = vsyncpa [#allocation18], 0  ;;  %s8470_s23 = smov 0   ;;  %s8472_s24 = smov 0  }
   0xb   :  { %s8474_s25 = smov 0   ;;  %s8476_s26 = smov 0  }
   0xc LB: > { %s8489_s11 = sadd.s32 4294967295, %s8387_s26   ;;  %s8492_s27 = sadd.s32 1, %s8387_s26   ;;  %s8387_s26 = sphi %s8476_s26, %s9395_s26   ;;  %s8383_s25 = sphi %s8474_s25, %s9399_s25   ;;  %s8379_s24 = sphi %s8472_s24, %s9398_s24   ;;  %s8375_s23 = sphi %s8470_s23, %s9397_s23  }
   0xd   : > { %9385 = sst [smem:[#allocation25_spill]] %s8492_s27  ;;  %s61_s28 = ssub.s32 %s8387_s26, %s8492_s27 }
   0xe   : > { %s64_s29 = sadd.s32 1, %s8383_s25  ;;  %p62_p0 = scmp.eq.s32.totalorder %s61_s28, 0 }
   0xf   : > { %p71_p1 = scmp.ne.s32.totalorder %s8383_s25, %s8379_s24  ;;  %p72_p2 = scmp.eq.s32.totalorder %s8387_s26, 0 }
  0x10   : > { %p187_p3 = scmp.ne.s32.totalorder %s8379_s24, %s8375_s23  ;;  %p188_p5 = scmp.eq.s32.totalorder %s8489_s11, 0 }
  0x11   : > { %s8502_s30 = scalar_select %p62_p0, %s8383_s25, %s64_s29  }
  0x12   : > { %p8504_p4 = por %p72_p2, %p71_p1  ;;  %p5381_p6 = scmp.ge.s32.totalorder %s8387_s26, 1 }
  0x13   : > { %9386 = sst [smem:[#allocation26_spill]] %s8502_s30  ;;  %p324_p7 = scmp.lt.s32.totalorder %s8387_s26, 7 }
  0x14   : > { %p8513_p8 = por %p188_p5, %p187_p3  ;;  %p5382_p9 = scmp.ne.s32.totalorder %s8489_s11, 0 }
  0x15   : > { %p8518_p10 = pnand %p5381_p6, %p324_p7  ;;  %s9390_s3 = sld [smem:[#allocation28_spill]] }
  0x16   : > { %s8389_s19 = smov [#allocation8]   ;;  %s9392_s8 = sld [smem:[#allocation29_spill]] }
  0x17   : > { %p8004_p11 = pneg %p8518_p10  ;;  %s352_s20 = sshll.u32 %s8389_s19, 4  ;;  %s353_s20 = int_to_ptr.vmem [resolvable:$true] %s352_s20 }
  0x18   : > { %s8390_s29 = smov [#allocation14]   ;;  %s9393_s2 = sld [smem:[#allocation27_spill]] }
  0x19   : > { %p8529_p12 = pnand %p8004_p11, %p188_p5  ;;  %s390_s16 = sshll.u32 %s8390_s29, 4  ;;  %s391_s16 = int_to_ptr.vmem [resolvable:$true] %s390_s16 }
  0x1a   : > { %s8391_s30 = smov 256   ;;  %s8392_s27 = smov 16  }
  0x1b   : > { %s350_s18 = sshll.u32 %s9390_s3, 4  ;;  %s8393_s12 = smov [#allocation6]   ;;  %s351_s18 = int_to_ptr.hbm [resolvable:$true] %s350_s18 }
  0x1c   : > { %s388_s28 = sshll.u32 %s9392_s8, 4  ;;  %s365_s8 = sshll.u32 %s9370_s5, 4  ;;  %s389_s28 = int_to_ptr.hbm [resolvable:$true] %s388_s28  ;;  %s366_s8 = int_to_ptr.hbm [resolvable:$true] %s365_s8 }
  0x1d   : > { %8010 = dma.hbm_to_vmem [thread:$0]  (!%p8529_p12), %s351_s18, 64, %s353_s20, [#allocation9]  }
  0x1e   : > { %s335_s3 = sshll.u32 %s9393_s2, 4  ;;  %s337_s18 = sshll.u32 %s8393_s12, 4  ;;  %s336_s3 = int_to_ptr.hbm [resolvable:$true] %s335_s3  ;;  %s338_s18 = int_to_ptr.vmem [resolvable:$true] %s337_s18 }
  0x1f   : > { %8019 = dma.hbm_to_vmem [thread:$0]  (!%p8529_p12), %s389_s28, 32768, %s391_s16, [#allocation15], %s8391_s30, %s8391_s30, %s8392_s27  }
  0x20   : > { %8007 = dma.hbm_to_vmem [thread:$0]  (!%p8529_p12), %s336_s3, 4096, %s338_s18, [#allocation7], %s8391_s30, %s8391_s30, %s8392_s27  }
  0x21   : > { %s8394_s20 = smov [#allocation10]   ;;  %s377_s2 = sshll.u32 %s9372_s7, 4  ;;  %s378_s2 = int_to_ptr.hbm [resolvable:$true] %s377_s2 }
  0x22   : > { %s367_s29 = sshll.u32 %s8394_s20, 4  ;;  %s403_s12 = sshll.u32 %s9374_s9, 4  ;;  %s368_s29 = int_to_ptr.vmem [resolvable:$true] %s367_s29  ;;  %s404_s12 = int_to_ptr.hbm [resolvable:$true] %s403_s12 }
  0x23   : > { %8013 = dma.hbm_to_vmem [thread:$0]  (!%p8529_p12), %s366_s8, 16, %s368_s29, [#allocation9]  }
  0x24   : > { %s8395_s22 = smov [#allocation13]   ;;  %s8396_s3 = smov [#allocation16]  }
  0x25   : > { %s379_s23 = sshll.u32 %s8395_s22, 4  ;;  %s405_s27 = sshll.u32 %s8396_s3, 4  ;;  %s380_s23 = int_to_ptr.vmem [resolvable:$true] %s379_s23  ;;  %s406_s27 = int_to_ptr.vmem [resolvable:$true] %s405_s27 }
  0x26   : > { %8016 = dma.hbm_to_vmem [thread:$0]  (!%p8529_p12), %s378_s2, 128, %s380_s23, [#allocation12]  }
  0x27   : > { %s415_s20 = sshll.u32 %s9375_s10, 4  ;;  %s8397_s8 = smov [#allocation17]   ;;  %s416_s20 = int_to_ptr.hbm [resolvable:$true] %s415_s20 }
  0x28   : > { %8022 = dma.hbm_to_vmem [thread:$0]  (!%p8529_p12), %s404_s12, 64, %s406_s27, [#allocation15]  }
  0x29   : > { %s417_s29 = sshll.u32 %s8397_s8, 4  ;;  %p5389_p13 = scmp.ge.s32.totalorder %s8387_s26, 6  ;;  %s418_s29 = int_to_ptr.vmem [resolvable:$true] %s417_s29 }
  0x2a   : > { %8025 = dma.hbm_to_vmem [thread:$0]  (!%p8529_p12), %s416_s20, 64, %s418_s29, [#allocation18]  }
  0x2b   : > { %427 = sbr.rel (%p5389_p13) target bundleno = 78 (0x4e), region = 52 }
  0x30   : > { %439 = sbr.rel (!%p8504_p4) target bundleno = 59 (0x3b), region = 60  ;;  %s441_s2 = sand.u32 (%p8504_p4), 1, %s8383_s25  }
  0x31   : > { %s7454_s17 = smul.u32 (%p8504_p4), 24, %s8387_s26 }
  0x32   : > { %s7970_s19 = smul.u32 (%p8504_p4), 48, %s441_s2 }
  0x33   : > { %s446_s12 = scalar_lea.vmem (%p8504_p4), %s9366_s1, %s7454_s17 }
  0x34   : > { %v459_v1 = vld [vmem:[%s446_s12] sm:$0xff] (%p8504_p4)  ;;  %v461_v2 = vld [vmem:[%s446_s12 + $0x8] sm:$0xff] (%p8504_p4)  ;;  %v463_v3 = vld [vmem:[%s446_s12 + $0x10] sm:$0xff] (%p8504_p4)  ;;  %s443_s21 = scalar_lea.vmem (%p8504_p4), [#allocation5], %s7970_s19 }
  0x35   : > { %460 = vst [vmem:[%s443_s21] sm:$0xff] %v459_v1  ;;  %v465_v4 = vld [vmem:[%s446_s12 + $0x90] sm:$0xff]  ;;  %v467_v5 = vld [vmem:[%s446_s12 + $0x98] sm:$0xff]  ;;  %v469_v6 = vld [vmem:[%s446_s12 + $0xa0] sm:$0xff] }
  0x36   : > { %462 = vst [vmem:[%s443_s21 + $0x8] sm:$0xff] %v461_v2 }
  0x37   : > { %464 = vst [vmem:[%s443_s21 + $0x10] sm:$0xff] %v463_v3 }
  0x38   : > { %466 = vst [vmem:[%s443_s21 + $0x18] sm:$0xff] %v465_v4 }
  0x39   : > { %468 = vst [vmem:[%s443_s21 + $0x20] sm:$0xff] %v467_v5 }
  0x3a   : > { %470 = vst [vmem:[%s443_s21 + $0x28] sm:$0xff] %v469_v6 }
  0x3b PF: > { %s477_s22 = sand.u32 1, %s8387_s26   ;;  %s479_s23 = sand.u32 1, %s8383_s25  }
  0x3c   : > { %s7971_s3 = smul.u32 1536, %s479_s23  ;;  %s478_s17 = scalar_lea.sflag [#allocation12], %s477_s22 }
  0x3d   : > { %s7969_s27 = smul.u32 1536, %s8387_s26  ;;  %s8311_s26 = scalar_lea.hbm %s9371_s6, 9216 }
  0x3e   : > { %s481_s8 = scalar_lea.vmem [#allocation11], %s7971_s3 }
  0x3f   : > { %s487_s20 = scalar_lea.hbm %s9371_s6, %s7969_s27  ;;  %s490_s29 = sshll.u32 %s481_s8, 4  ;;  %s491_s29 = int_to_ptr.vmem [resolvable:$true] %s490_s29 }
  0x40   : > { %s488_s2 = sshll.u32 %s487_s20, 4  ;;  %s489_s2 = int_to_ptr.hbm [resolvable:$true] %s488_s2 }
  0x41   : > { %s8305_s19 = sshra.s32 %s489_s2, 4  ;;  %s8306_s19 = int_to_ptr.hbm [resolvable:$true] %s8305_s19 }
  0x42   : > { %s8307_s28 = scalar_lea.hbm %s8306_s19, 1536  ;;  %p8312_p3 = scmp.lt.s32.totalorder %s8306_s19, %s9371_s6 }
  0x43   : > { %p8308_p0 = scmp.ne.s32.totalorder %s8306_s19, %s8307_s28  ;;  %p8313_p6 = scmp.lt.s32.totalorder %s8311_s26, %s8307_s28 }
  0x45   : > { %p8309_p1 = pnand %p8308_p0, %p8504_p4  ;;  %p8314_p7 = por %p8313_p6, %p8312_p3 }
  0x47   : > { %p8310_p2 = pneg %p8309_p1 }
  0x49   : > { %p8315_p11 = pnand %p8314_p7, %p8310_p2 }
  0x4b   : > { %8318 = shalt.err (!%p8315_p11)
}
  0x4c   : > { %s8398_s22 = smov 512   ;;  %s8399_s3 = smov 32  }
  0x4d   : > { %7988 = dma.hbm_to_vmem [thread:$0]  (%p8504_p4), %s489_s2, 24576, %s491_s29, %s478_s17, %s8398_s22, %s8398_s22, %s8399_s3  }
  0x4e PF: > { %502 = sbr.rel (%p8518_p10) target bundleno = 1512 (0x5e8), region = 87  ;;  %s505_s27 = sand.u32 (!%p8518_p10), 1, %s8379_s24  }
  0x4f   : > { %s7972_s30 = smul.u32 (!%p8518_p10), 48, %s505_s27 }
  0x51   : > { %s8592_s18 = scalar_lea.vmem (!%p8518_p10), [#allocation5], %s7972_s30 }
  0x53   : > { %8350 = dma.done.wait (%p188_p5), [#allocation7], 4096  }
  0x54   : > { %8352 = vsyncadd (%p188_p5), [#allocation7], 4294963200 }
  0x55   : > { %8354 = dma.done.wait (%p188_p5), [#allocation9], 80  }
  0x56   : > { %8356 = vsyncadd (%p188_p5), [#allocation9], 4294967216  ;;  %s526_s13 = sand.u32 1, %s8489_s11   ;;  %s7973_s15 = smul.u32 1536, %s505_s27 }
  0x57   : > { %s527_s20 = scalar_lea.sflag [#allocation12], %s526_s13 }
  0x58   : > { %s8603_s8 = scalar_lea.vmem [#allocation11], %s7973_s15 }
  0x59   : > { %8358 = dma.done.wait (%p8513_p8), %s527_s20, 24576  }
  0x5a   : > { %8360 = vsyncadd (%p8513_p8), %s527_s20, 4294942720 }
  0x5b   : > { %8362 = dma.done.wait (%p188_p5), [#allocation12], 128  }
  0x5c   : > { %8364 = vsyncadd (%p188_p5), [#allocation12], 4294967168 }
  0x5d   : > { %8366 = dma.done.wait (%p188_p5), [#allocation15], 32832  }
  0x5e   : > { %8368 = vsyncadd (%p188_p5), [#allocation15], 4294934464 }
  0x5f   : > { %8370 = dma.done.wait (%p188_p5), [#allocation18], 64  }
  0x60   : > { %8372 = vsyncadd (%p188_p5), [#allocation18], 4294967232  ;;  %s596_s14 = smul.u32 12, %s8489_s11 }
  0x62   : > { %p597_p4 = scmp.lt.s32.totalorder %s596_s14, 71  ;;  %607 = sbr.rel (%p5382_p9) target bundleno = 120 (0x78), region = 127 }
  0x64   : > { %s9401_s14 = smov (!%p597_p4, %s596_s14), 71 }
  0x65   : > { %s5401_s29 = sshll.u32 %s9401_s14, 3 }
  0x66   : > { %s8625_s19 = scalar_lea.vmem %s9365_s0, %s5401_s29 }
  0x67   : > { %v8400_v7 = vmov 0.0  }
  0x68   : > { %608 = vst [vmem:[#allocation3 + $0x30] sm:$0xff] %v8400_v7 }
  0x69   : > { %609 = vst [vmem:[#allocation3] sm:$0xff] %v8400_v7 }
  0x6a   : > { %610 = vst [vmem:[#allocation3 + $0x58] sm:$0xff] %v8400_v7 }
  0x6b   : > { %611 = vst [vmem:[#allocation3 + $0x18] sm:$0xff] %v8400_v7 }
  0x6c   : > { %612 = vst [vmem:[#allocation3 + $0x50] sm:$0xff] %v8400_v7 }
  0x6d   : > { %613 = vst [vmem:[#allocation3 + $0x68] sm:$0xff] %v8400_v7 }
  0x6e   : > { %614 = vst [vmem:[#allocation3 + $0x8] sm:$0xff] %v8400_v7 }
  0x6f   : > { %615 = vst [vmem:[#allocation3 + $0x48] sm:$0xff] %v8400_v7 }
  0x70   : > { %616 = vst [vmem:[#allocation3 + $0x40] sm:$0xff] %v8400_v7 }
  0x71   : > { %617 = vst [vmem:[#allocation3 + $0x20] sm:$0xff] %v8400_v7 }
  0x72   : > { %618 = vst [vmem:[#allocation3 + $0x10] sm:$0xff] %v8400_v7 }
  0x73   : > { %619 = vst [vmem:[#allocation3 + $0x38] sm:$0xff] %v8400_v7 }
  0x74   : > { %620 = vst [vmem:[#allocation3 + $0x60] sm:$0xff] %v8400_v7 }
  0x75   : > { %621 = vst [vmem:[#allocation3 + $0x70] sm:$0xff] %v8400_v7 }
  0x76   : > { %622 = vst [vmem:[#allocation3 + $0x78] sm:$0xff] %v8400_v7 }
  0x77   : > { %623 = vst [vmem:[#allocation3 + $0x28] sm:$0xff] %v8400_v7 }
  0x78 PF: > { %v5517_v8 = vld [vmem:[#allocation6 + $0xe0] sm:$0xf]  ;;  %v7487_v9 = vld [vmem:[#allocation6 + $0xec] sm:$0xf0]  ;;  %v7485_v10 = vld [vmem:[#allocation6 + $0xe4] sm:$0xf] }
  0x79   : > { %v5518_v11 = vor.u32 %v7487_v9, %v5517_v8  ;;  %v5519_v12 = vld [vmem:[#allocation6 + $0xf0] sm:$0xf0]  ;;  %v5525_v13 = vld [vmem:[#allocation6 + $0xe8] sm:$0xf]  ;;  %v7488_v14 = vld [vmem:[#allocation6 + $0xf4] sm:$0xf0] }
  0x7a   : > { %v5522_v15 = vor.u32 %v7485_v10, %v5519_v12  ;;  %v5526_v16 = vor.u32 %v7488_v14, %v5525_v13  ;;  %v7486_v17 = vld [vmem:[#allocation6 + $0xec] sm:$0xf]  ;;  %v5527_v18 = vld [vmem:[#allocation6 + $0xf8] sm:$0xf0]  ;;  %v5501_v19 = vld [vmem:[#allocation6 + $0xc0] sm:$0xf] }
  0x7b   : > { %844 = vmatpush.bf16.msra.mxu0 %v5518_v11  ;;  %v5530_v20 = vor.u32 %v7486_v17, %v5527_v18  ;;  %v7483_v21 = vld [vmem:[#allocation6 + $0xcc] sm:$0xf0]  ;;  %v7481_v22 = vld [vmem:[#allocation6 + $0xc4] sm:$0xf]  ;;  %v5503_v23 = vld [vmem:[#allocation6 + $0xd0] sm:$0xf0] }
  0x7c   : > { %883 = vmatpush.bf16.msra.mxu1 %v5522_v15  ;;  %922 = vmatpush.bf16.msra.mxu2 %v5526_v16  ;;  %v5502_v24 = vor.u32 %v7483_v21, %v5501_v19  ;;  %v5506_v25 = vor.u32 %v7481_v22, %v5503_v23  ;;  %v5509_v26 = vld [vmem:[#allocation6 + $0xc8] sm:$0xf]  ;;  %v7484_v27 = vld [vmem:[#allocation6 + $0xd4] sm:$0xf0]  ;;  %v7482_v28 = vld [vmem:[#allocation6 + $0xcc] sm:$0xf] }
  0x7d   : > { %961 = vmatpush.bf16.msra.mxu3 %v5530_v20  ;;  %v5510_v29 = vor.u32 %v7484_v27, %v5509_v26  ;;  %v5511_v30 = vld [vmem:[#allocation6 + $0xd8] sm:$0xf0]  ;;  %v5485_v31 = vld [vmem:[#allocation6 + $0xa0] sm:$0xf]  ;;  %v7479_v32 = vld [vmem:[#allocation6 + $0xac] sm:$0xf0] }
  0x7e   : > { %v5514_v33 = vor.u32 %v7482_v28, %v5511_v30  ;;  %v7477_v34 = vld [vmem:[#allocation6 + $0xa4] sm:$0xf]  ;;  %v5487_v35 = vld [vmem:[#allocation6 + $0xb0] sm:$0xf0]  ;;  %v5493_v36 = vld [vmem:[#allocation6 + $0xa8] sm:$0xf]  ;;  %v5486_v37 = vor.u32 %v7479_v32, %v5485_v31 }
  0x7f   : > { %845 = vmatpush.bf16.msra.mxu0 %v5502_v24  ;;  %v7480_v38 = vld [vmem:[#allocation6 + $0xb4] sm:$0xf0]  ;;  %v7478_v39 = vld [vmem:[#allocation6 + $0xac] sm:$0xf]  ;;  %v5495_v40 = vld [vmem:[#allocation6 + $0xb8] sm:$0xf0]  ;;  %v5490_v41 = vor.u32 %v7477_v34, %v5487_v35 }
  0x80   : > { %884 = vmatpush.bf16.msra.mxu1 %v5506_v25  ;;  %923 = vmatpush.bf16.msra.mxu2 %v5510_v29  ;;  %v5494_v42 = vor.u32 %v7480_v38, %v5493_v36  ;;  %v5469_v43 = vld [vmem:[#allocation6 + $0x80] sm:$0xf]  ;;  %v7475_v44 = vld [vmem:[#allocation6 + $0x8c] sm:$0xf0]  ;;  %v7473_v45 = vld [vmem:[#allocation6 + $0x84] sm:$0xf]  ;;  %v5498_v46 = vor.u32 %v7478_v39, %v5495_v40 }
  0x81   : > { %962 = vmatpush.bf16.msra.mxu3 %v5514_v33  ;;  %v5471_v47 = vld [vmem:[#allocation6 + $0x90] sm:$0xf0]  ;;  %v5477_v48 = vld [vmem:[#allocation6 + $0x88] sm:$0xf]  ;;  %v7476_v49 = vld [vmem:[#allocation6 + $0x94] sm:$0xf0]  ;;  %v5470_v52 = vor.u32 %v7475_v44, %v5469_v43 }
  0x82   : > { %v7474_v50 = vld [vmem:[#allocation6 + $0x8c] sm:$0xf]  ;;  %v5479_v51 = vld [vmem:[#allocation6 + $0x98] sm:$0xf0]  ;;  %v5474_v53 = vor.u32 %v7473_v45, %v5471_v47  ;;  %v5478_v54 = vor.u32 %v7476_v49, %v5477_v48  ;;  %v5453_v55 = vld [vmem:[#allocation6 + $0x60] sm:$0xf] }
  0x83   : > { %846 = vmatpush.bf16.msra.mxu0 %v5486_v37  ;;  %v7471_v56 = vld [vmem:[#allocation6 + $0x6c] sm:$0xf0]  ;;  %v7469_v57 = vld [vmem:[#allocation6 + $0x64] sm:$0xf]  ;;  %v5482_v58 = vor.u32 %v7474_v50, %v5479_v51  ;;  %v5455_v59 = vld [vmem:[#allocation6 + $0x70] sm:$0xf0] }
  0x84   : > { %885 = vmatpush.bf16.msra.mxu1 %v5490_v41  ;;  %924 = vmatpush.bf16.msra.mxu2 %v5494_v42  ;;  %v5461_v60 = vld [vmem:[#allocation6 + $0x68] sm:$0xf]  ;;  %v7472_v61 = vld [vmem:[#allocation6 + $0x74] sm:$0xf0]  ;;  %v7470_v62 = vld [vmem:[#allocation6 + $0x6c] sm:$0xf]  ;;  %v5454_v0 = vor.u32 %v7471_v56, %v5453_v55  ;;  %v5458_v1 = vor.u32 %v7469_v57, %v5455_v59 }
  0x85   : > { %963 = vmatpush.bf16.msra.mxu3 %v5498_v46  ;;  %v5463_v63 = vld [vmem:[#allocation6 + $0x78] sm:$0xf0]  ;;  %v5462_v2 = vor.u32 %v7472_v61, %v5461_v60  ;;  %v5437_v3 = vld [vmem:[#allocation6 + $0x40] sm:$0xf]  ;;  %v7467_v4 = vld [vmem:[#allocation6 + $0x4c] sm:$0xf0] }
  0x86   : > { %v7465_v5 = vld [vmem:[#allocation6 + $0x44] sm:$0xf]  ;;  %v5466_v6 = vor.u32 %v7470_v62, %v5463_v63  ;;  %v5439_v7 = vld [vmem:[#allocation6 + $0x50] sm:$0xf0]  ;;  %v5445_v8 = vld [vmem:[#allocation6 + $0x48] sm:$0xf]  ;;  %v5438_v12 = vor.u32 %v7467_v4, %v5437_v3 }
  0x87   : > { %847 = vmatpush.bf16.msra.mxu0 %v5470_v52  ;;  %v7468_v9 = vld [vmem:[#allocation6 + $0x54] sm:$0xf0]  ;;  %v7466_v10 = vld [vmem:[#allocation6 + $0x4c] sm:$0xf]  ;;  %v5447_v11 = vld [vmem:[#allocation6 + $0x58] sm:$0xf0]  ;;  %v5442_v13 = vor.u32 %v7465_v5, %v5439_v7 }
  0x88   : > { %886 = vmatpush.bf16.msra.mxu1 %v5474_v53  ;;  %925 = vmatpush.bf16.msra.mxu2 %v5478_v54  ;;  %v5446_v14 = vor.u32 %v7468_v9, %v5445_v8  ;;  %v5421_v15 = vld [vmem:[#allocation6 + $0x20] sm:$0xf]  ;;  %v7463_v16 = vld [vmem:[#allocation6 + $0x2c] sm:$0xf0]  ;;  %v7461_v17 = vld [vmem:[#allocation6 + $0x24] sm:$0xf]  ;;  %v5450_v18 = vor.u32 %v7466_v10, %v5447_v11 }
  0x89   : > { %964 = vmatpush.bf16.msra.mxu3 %v5482_v58  ;;  %v5423_v19 = vld [vmem:[#allocation6 + $0x30] sm:$0xf0]  ;;  %v5429_v20 = vld [vmem:[#allocation6 + $0x28] sm:$0xf]  ;;  %v7464_v21 = vld [vmem:[#allocation6 + $0x34] sm:$0xf0]  ;;  %v5422_v24 = vor.u32 %v7463_v16, %v5421_v15 }
  0x8a   : > { %v7462_v22 = vld [vmem:[#allocation6 + $0x2c] sm:$0xf]  ;;  %v5431_v23 = vld [vmem:[#allocation6 + $0x38] sm:$0xf0]  ;;  %v5426_v25 = vor.u32 %v7461_v17, %v5423_v19  ;;  %v5430_v26 = vor.u32 %v7464_v21, %v5429_v20  ;;  %v5405_v27 = vld [vmem:[#allocation6] sm:$0xf] }
  0x8b   : > { %848 = vmatpush.bf16.msra.mxu0 %v5454_v0  ;;  %v7459_v28 = vld [vmem:[#allocation6 + $0xc] sm:$0xf0]  ;;  %v7457_v29 = vld [vmem:[#allocation6 + $0x4] sm:$0xf]  ;;  %v5434_v30 = vor.u32 %v7462_v22, %v5431_v23  ;;  %v5407_v31 = vld [vmem:[#allocation6 + $0x10] sm:$0xf0] }
  0x8c   : > { %887 = vmatpush.bf16.msra.mxu1 %v5458_v1  ;;  %926 = vmatpush.bf16.msra.mxu2 %v5462_v2  ;;  %v5413_v32 = vld [vmem:[#allocation6 + $0x8] sm:$0xf]  ;;  %v7460_v33 = vld [vmem:[#allocation6 + $0x14] sm:$0xf0]  ;;  %v7458_v34 = vld [vmem:[#allocation6 + $0xc] sm:$0xf]  ;;  %v5406_v36 = vor.u32 %v7459_v28, %v5405_v27  ;;  %v5410_v39 = vor.u32 %v7457_v29, %v5407_v31 }
  0x8d   : > { %965 = vmatpush.bf16.msra.mxu3 %v5466_v6  ;;  %v5415_v35 = vld [vmem:[#allocation6 + $0x18] sm:$0xf0]  ;;  %v624_v37 = vld [vmem:[%s8625_s19] sm:$0xff]  ;;  %v5414_v40 = vor.u32 %v7460_v33, %v5413_v32  ;;  %v627_v44 = vld [vmem:[%s8625_s19 + $0x18] sm:$0xff]  ;;  %vm1488_vm0 = vcmask 523264   ;;  %s8401_s15 = smov 64  }
  0x8e   : > { %v625_v38 = vld [vmem:[%s8625_s19 + $0x8] sm:$0xff]  ;;  %v5418_v41 = vor.u32 %v7458_v34, %v5415_v35  ;;  %v626_v43 = vld [vmem:[%s8625_s19 + $0x10] sm:$0xff]  ;;  %v628_v46 = vld [vmem:[%s8625_s19 + $0x20] sm:$0xff]  ;;  %vm1499_vm1 = vcmask 1048064   ;;  %p6427_p5 = scmp.ne.s32.totalorder %s8489_s11, 5 }
  0x8f   : > { %849 = vmatpush.bf16.msra.mxu0 %v5438_v12  ;;  %v636_v42 = vpack.c.bf16 %v625_v38, %v624_v37  ;;  %v637_v45 = vpack.c.bf16 %v627_v44, %v626_v43  ;;  %v629_v47 = vld [vmem:[%s8625_s19 + $0x28] sm:$0xff]  ;;  %v630_v49 = vld [vmem:[%s8625_s19 + $0x30] sm:$0xff]  ;;  %v631_v50 = vld [vmem:[%s8625_s19 + $0x38] sm:$0xff] }
  0x90   : > { %888 = vmatpush.bf16.msra.mxu1 %v5442_v13  ;;  %927 = vmatpush.bf16.msra.mxu2 %v5446_v14  ;;  %v638_v48 = vpack.c.bf16 %v629_v47, %v628_v46  ;;  %v639_v51 = vpack.c.bf16 %v631_v50, %v630_v49  ;;  %v7512_v52 = vld [vmem:[%s9369_s4 + $0xb8] sm:$0xff]  ;;  %v7511_v56 = vld [vmem:[%s9369_s4 + $0xb0] sm:$0xff]  ;;  %v632_v60 = vld [vmem:[%s8625_s19 + $0x40] sm:$0xff] }
  0x91   : > { %966 = vmatpush.bf16.msra.mxu3 %v5450_v18  ;;  %v7496_v53 = vld [vmem:[%s9369_s4 + $0x38] sm:$0xff]  ;;  %v7495_v57 = vld [vmem:[%s9369_s4 + $0x30] sm:$0xff]  ;;  %v7510_v61 = vld [vmem:[%s9369_s4 + $0xa8] sm:$0xff] }
  0x92   : > { %v7520_v54 = vld [vmem:[%s9369_s4 + $0xf8] sm:$0xff]  ;;  %v7519_v58 = vld [vmem:[%s9369_s4 + $0xf0] sm:$0xff]  ;;  %v7494_v62 = vld [vmem:[%s9369_s4 + $0x28] sm:$0xff] }
  0x93   : > { %850 = vmatpush.bf16.msra.mxu0 %v5422_v24  ;;  %v7504_v55 = vld [vmem:[%s9369_s4 + $0x78] sm:$0xff]  ;;  %v7503_v59 = vld [vmem:[%s9369_s4 + $0x70] sm:$0xff]  ;;  %v633_v63 = vld [vmem:[%s8625_s19 + $0x48] sm:$0xff] }
  0x94   : > { %889 = vmatpush.bf16.msra.mxu1 %v5426_v25  ;;  %928 = vmatpush.bf16.msra.mxu2 %v5430_v26  ;;  %v7518_v0 = vld [vmem:[%s9369_s4 + $0xe8] sm:$0xff]  ;;  %v640_v2 = vpack.c.bf16 %v633_v63, %v632_v60  ;;  %v7509_v3 = vld [vmem:[%s9369_s4 + $0xa0] sm:$0xff]  ;;  %v634_v6 = vld [vmem:[%s8625_s19 + $0x50] sm:$0xff] }
  0x95   : > { %967 = vmatpush.bf16.msra.mxu3 %v5434_v30  ;;  %v7502_v1 = vld [vmem:[%s9369_s4 + $0x68] sm:$0xff]  ;;  %v7493_v4 = vld [vmem:[%s9369_s4 + $0x20] sm:$0xff]  ;;  %v635_v7 = vld [vmem:[%s8625_s19 + $0x58] sm:$0xff] }
  0x96   : > { %v7501_v5 = vld [vmem:[%s9369_s4 + $0x60] sm:$0xff]  ;;  %v641_v8 = vpack.c.bf16 %v635_v7, %v634_v6  ;;  %v7492_v9 = vld [vmem:[%s9369_s4 + $0x18] sm:$0xff]  ;;  %v7491_v12 = vld [vmem:[%s9369_s4 + $0x10] sm:$0xff] }
  0x97   : > { %851 = vmatpush.bf16.msra.mxu0 %v5406_v36  ;;  %v7500_v10 = vld [vmem:[%s9369_s4 + $0x58] sm:$0xff]  ;;  %v7517_v11 = vld [vmem:[%s9369_s4 + $0xe0] sm:$0xff]  ;;  %v7499_v13 = vld [vmem:[%s9369_s4 + $0x50] sm:$0xff] }
  0x98   : > { %890 = vmatpush.bf16.msra.mxu1 %v5410_v39  ;;  %929 = vmatpush.bf16.msra.mxu2 %v5414_v40  ;;  %v7508_v14 = vld [vmem:[%s9369_s4 + $0x98] sm:$0xff]  ;;  %v7490_v16 = vld [vmem:[%s9369_s4 + $0x8] sm:$0xff]  ;;  %v7507_v18 = vld [vmem:[%s9369_s4 + $0x90] sm:$0xff] }
  0x99   : > { %968 = vmatpush.bf16.msra.mxu3 %v5418_v41  ;;  %v7516_v15 = vld [vmem:[%s9369_s4 + $0xd8] sm:$0xff]  ;;  %v7498_v17 = vld [vmem:[%s9369_s4 + $0x48] sm:$0xff]  ;;  %v7515_v19 = vld [vmem:[%s9369_s4 + $0xd0] sm:$0xff] }
  0x9a   : > { %852 = vmatmul.bf16.vlgmr.msra.gmra.mxu0 %v636_v42  ;;  %v7489_v20 = vld [vmem:[%s9369_s4] sm:$0xff]  ;;  %v7506_v22 = vld [vmem:[%s9369_s4 + $0x88] sm:$0xff]  ;;  %v674_v26 = vld [vmem:[#allocation8] sm:$0xf] }
  0x9b   : > { %891 = vmatmul.bf16.vlgmr.msra.gmra.mxu1 %v636_v42  ;;  %930 = vmatmul.bf16.vlgmr.msra.gmra.mxu2 %v636_v42  ;;  %v7497_v21 = vld [vmem:[%s9369_s4 + $0x40] sm:$0xff]  ;;  %v7514_v23 = vld [vmem:[%s9369_s4 + $0xc8] sm:$0xff]  ;;  %v8737_v28 = vperm.slane %v674_v26, 0  ;;  %v8739_v30 = vperm.slane %v674_v26, 1  ;;  %v8744_v40 = vperm.slane %v674_v26, 2 }
  0x9c   : > { %969 = vmatmul.bf16.vlgmr.msra.gmra.mxu3 %v636_v42  ;;  %1410 = vmatpush.bf16.msrb.mxu2 %v7512_v52  ;;  %v7505_v24 = vld [vmem:[%s9369_s4 + $0x80] sm:$0xff]  ;;  %v8747_v42 = vperm.slane %v674_v26, 3 }
  0x9d   : > { %1332 = vmatpush.bf16.msrb.mxu0 %v7496_v53  ;;  %1449 = vmatpush.bf16.msrb.mxu3 %v7520_v54  ;;  %v7513_v25 = vld [vmem:[%s9369_s4 + $0xc0] sm:$0xff] }
  0x9e   : > { %1371 = vmatpush.bf16.msrb.mxu1 %v7504_v55 }
  0xa0   : > { %1411 = vmatpush.bf16.msrb.mxu2 %v7511_v56 }
  0xa1   : > { %1333 = vmatpush.bf16.msrb.mxu0 %v7495_v57  ;;  %1450 = vmatpush.bf16.msrb.mxu3 %v7519_v58 }
  0xa2   : > { %1372 = vmatpush.bf16.msrb.mxu1 %v7503_v59 }
  0xa4   : > { %1412 = vmatpush.bf16.msrb.mxu2 %v7510_v61 }
  0xa5   : > { %1334 = vmatpush.bf16.msrb.mxu0 %v7494_v62  ;;  %1451 = vmatpush.bf16.msrb.mxu3 %v7518_v0 }
  0xa6   : > { %1373 = vmatpush.bf16.msrb.mxu1 %v7502_v1 }
  0xa8   : > { %1413 = vmatpush.bf16.msrb.mxu2 %v7509_v3 }
  0xa9   : > { %1335 = vmatpush.bf16.msrb.mxu0 %v7493_v4  ;;  %1452 = vmatpush.bf16.msrb.mxu3 %v7517_v11 }
  0xaa   : > { %857 = vmatmul.bf16.gmra.mxu0 %v637_v45  ;;  %1374 = vmatpush.bf16.msrb.mxu1 %v7501_v5 }
  0xab   : > { %896 = vmatmul.bf16.gmra.mxu1 %v637_v45  ;;  %935 = vmatmul.bf16.gmra.mxu2 %v637_v45 }
  0xac   : > { %974 = vmatmul.bf16.gmra.mxu3 %v637_v45  ;;  %1414 = vmatpush.bf16.msrb.mxu2 %v7508_v14 }
  0xad   : > { %1336 = vmatpush.bf16.msrb.mxu0 %v7492_v9  ;;  %1453 = vmatpush.bf16.msrb.mxu3 %v7516_v15 }
  0xae   : > { %1375 = vmatpush.bf16.msrb.mxu1 %v7500_v10 }
  0xb0   : > { %1415 = vmatpush.bf16.msrb.mxu2 %v7507_v18 }
  0xb1   : > { %1337 = vmatpush.bf16.msrb.mxu0 %v7491_v12  ;;  %1454 = vmatpush.bf16.msrb.mxu3 %v7515_v19 }
  0xb2   : > { %1376 = vmatpush.bf16.msrb.mxu1 %v7499_v13 }
  0xb4   : > { %1416 = vmatpush.bf16.msrb.mxu2 %v7506_v22 }
  0xb5   : > { %1338 = vmatpush.bf16.msrb.mxu0 %v7490_v16  ;;  %1455 = vmatpush.bf16.msrb.mxu3 %v7514_v23 }
  0xb6   : > { %1377 = vmatpush.bf16.msrb.mxu1 %v7498_v17 }
  0xb8   : > { %1417 = vmatpush.bf16.msrb.mxu2 %v7505_v24 }
  0xb9   : > { %1339 = vmatpush.bf16.msrb.mxu0 %v7489_v20  ;;  %1456 = vmatpush.bf16.msrb.mxu3 %v7513_v25 }
  0xba   : > { %862 = vmatmul.bf16.gmra.mxu0 %v638_v48  ;;  %1378 = vmatpush.bf16.msrb.mxu1 %v7497_v21 }
  0xbb   : > { %901 = vmatmul.bf16.gmra.mxu1 %v638_v48  ;;  %940 = vmatmul.bf16.gmra.mxu2 %v638_v48 }
  0xbc   : > { %979 = vmatmul.bf16.gmra.mxu3 %v638_v48 }
  0xca   : > { %867 = vmatmul.bf16.gmra.mxu0 %v639_v51 }
  0xcb   : > { %906 = vmatmul.bf16.gmra.mxu1 %v639_v51  ;;  %945 = vmatmul.bf16.gmra.mxu2 %v639_v51 }
  0xcc   : > { %984 = vmatmul.bf16.gmra.mxu3 %v639_v51 }
  0xda   : > { %872 = vmatmul.bf16.gmra.mxu0 %v640_v2 }
  0xdb   : > { %911 = vmatmul.bf16.gmra.mxu1 %v640_v2  ;;  %950 = vmatmul.bf16.gmra.mxu2 %v640_v2 }
  0xdc   : > { %989 = vmatmul.bf16.gmra.mxu3 %v640_v2 }
  0xea   : > { %877 = vmatmul.bf16.gmra.mxu0 %v641_v8 }
  0xeb   : > { %916 = vmatmul.bf16.gmra.mxu1 %v641_v8  ;;  %955 = vmatmul.bf16.gmra.mxu2 %v641_v8 }
  0xec   : > { %994 = vmatmul.bf16.gmra.mxu3 %v641_v8 }
 0x117   : > { %v853_v27 = vpop.f32.mrf.mxu0 }
 0x118   : > { %v892_v29 = vpop.f32.mrf.mxu1  ;;  %v854_v31 = vadd.f32 %v853_v27, %v8737_v28 }
 0x119   : > { %v893_v32 = vadd.f32 %v892_v29, %v8739_v30 }
 0x11a   : > { %v1000_v36 = vmax.f32 %v854_v31, 0.0 }
 0x11b   : > { %v1001_v39 = vmax.f32 %v893_v32, 0.0 }
 0x11e   : > { %v931_v33 = vpop.f32.mrf.mxu2 }
 0x11f   : > { %v970_v34 = vpop.f32.mrf.mxu3  ;;  %v855_v35 = vpop.f32.mrf.mxu0  ;;  %v932_v46 = vadd.f32 %v931_v33, %v8744_v40 }
 0x120   : > { %v856_v37 = vadd.f32 %v855_v35, %v8737_v28  ;;  %v894_v38 = vpop.f32.mrf.mxu1  ;;  %v971_v48 = vadd.f32 %v970_v34, %v8747_v42 }
 0x121   : > { %v895_v41 = vadd.f32 %v894_v38, %v8739_v30  ;;  %v1002_v55 = vmax.f32 %v932_v46, 0.0 }
 0x122   : > { %v1004_v43 = vmax.f32 %v856_v37, 0.0  ;;  %v1003_v57 = vmax.f32 %v971_v48, 0.0 }
 0x123   : > { %v1005_v44 = vmax.f32 %v895_v41, 0.0 }
 0x124   : > { %v1048_v45 = vpack.c.bf16 %v1004_v43, %v1000_v36 }
 0x125   : > { %v1049_v47 = vpack.c.bf16 %v1005_v44, %v1001_v39 }
 0x126   : > { %v933_v49 = vpop.f32.mrf.mxu2  ;;  %1340 = vmatmul.bf16.vlgmr.msrb.gmra.mxu0 %v1048_v45 }
 0x127   : > { %v934_v50 = vadd.f32 %v933_v49, %v8744_v40  ;;  %v972_v51 = vpop.f32.mrf.mxu3  ;;  %1379 = vmatmul.bf16.vlgmr.msrb.gmra.mxu1 %v1049_v47  ;;  %v858_v52 = vpop.f32.mrf.mxu0 }
 0x128   : > { %v973_v53 = vadd.f32 %v972_v51, %v8747_v42  ;;  %v897_v54 = vpop.f32.mrf.mxu1  ;;  %v859_v60 = vadd.f32 %v858_v52, %v8737_v28 }
 0x129   : > { %v1006_v56 = vmax.f32 %v934_v50, 0.0  ;;  %v898_v62 = vadd.f32 %v897_v54, %v8739_v30 }
 0x12a   : > { %v1007_v58 = vmax.f32 %v973_v53, 0.0  ;;  %v1008_v2 = vmax.f32 %v859_v60, 0.0 }
 0x12b   : > { %v1050_v59 = vpack.c.bf16 %v1006_v56, %v1002_v55  ;;  %v1009_v5 = vmax.f32 %v898_v62, 0.0 }
 0x12c   : > { %v1051_v61 = vpack.c.bf16 %v1007_v58, %v1003_v57 }
 0x12d   : > { %1418 = vmatmul.bf16.vlgmr.msrb.gmra.mxu2 %v1050_v59 }
 0x12e   : > { %1457 = vmatmul.bf16.vlgmr.msrb.gmra.mxu3 %v1051_v61  ;;  %v936_v63 = vpop.f32.mrf.mxu2 }
 0x12f   : > { %v975_v0 = vpop.f32.mrf.mxu3  ;;  %v860_v1 = vpop.f32.mrf.mxu0  ;;  %v937_v10 = vadd.f32 %v936_v63, %v8744_v40 }
 0x130   : > { %v861_v3 = vadd.f32 %v860_v1, %v8737_v28  ;;  %v899_v4 = vpop.f32.mrf.mxu1  ;;  %v976_v12 = vadd.f32 %v975_v0, %v8747_v42 }
 0x131   : > { %v900_v6 = vadd.f32 %v899_v4, %v8739_v30  ;;  %v1010_v19 = vmax.f32 %v937_v10, 0.0 }
 0x132   : > { %v1012_v7 = vmax.f32 %v861_v3, 0.0  ;;  %v1011_v21 = vmax.f32 %v976_v12, 0.0 }
 0x133   : > { %v1013_v8 = vmax.f32 %v900_v6, 0.0 }
 0x134   : > { %v1052_v9 = vpack.c.bf16 %v1012_v7, %v1008_v2 }
 0x135   : > { %v1053_v11 = vpack.c.bf16 %v1013_v8, %v1009_v5 }
 0x136   : > { %v938_v13 = vpop.f32.mrf.mxu2  ;;  %1345 = vmatmul.bf16.gmra.mxu0 %v1052_v9 }
 0x137   : > { %v939_v14 = vadd.f32 %v938_v13, %v8744_v40  ;;  %v977_v15 = vpop.f32.mrf.mxu3  ;;  %1384 = vmatmul.bf16.gmra.mxu1 %v1053_v11  ;;  %v863_v16 = vpop.f32.mrf.mxu0 }
 0x138   : > { %v978_v17 = vadd.f32 %v977_v15, %v8747_v42  ;;  %v902_v18 = vpop.f32.mrf.mxu1  ;;  %v864_v24 = vadd.f32 %v863_v16, %v8737_v28 }
 0x139   : > { %v1014_v20 = vmax.f32 %v939_v14, 0.0  ;;  %v903_v26 = vadd.f32 %v902_v18, %v8739_v30 }
 0x13a   : > { %v1015_v22 = vmax.f32 %v978_v17, 0.0  ;;  %v1016_v32 = vmax.f32 %v864_v24, 0.0 }
 0x13b   : > { %v1054_v23 = vpack.c.bf16 %v1014_v20, %v1010_v19  ;;  %v1017_v35 = vmax.f32 %v903_v26, 0.0 }
 0x13c   : > { %v1055_v25 = vpack.c.bf16 %v1015_v22, %v1011_v21 }
 0x13d   : > { %1423 = vmatmul.bf16.gmra.mxu2 %v1054_v23 }
 0x13e   : > { %1462 = vmatmul.bf16.gmra.mxu3 %v1055_v25  ;;  %v941_v27 = vpop.f32.mrf.mxu2 }
 0x13f   : > { %v980_v29 = vpop.f32.mrf.mxu3  ;;  %v865_v31 = vpop.f32.mrf.mxu0  ;;  %v942_v41 = vadd.f32 %v941_v27, %v8744_v40 }
 0x140   : > { %v866_v33 = vadd.f32 %v865_v31, %v8737_v28  ;;  %v904_v34 = vpop.f32.mrf.mxu1  ;;  %v981_v44 = vadd.f32 %v980_v29, %v8747_v42 }
 0x141   : > { %v905_v36 = vadd.f32 %v904_v34, %v8739_v30  ;;  %v1018_v51 = vmax.f32 %v942_v41, 0.0 }
 0x142   : > { %v1020_v37 = vmax.f32 %v866_v33, 0.0  ;;  %v1019_v53 = vmax.f32 %v981_v44, 0.0 }
 0x143   : > { %v1021_v38 = vmax.f32 %v905_v36, 0.0 }
 0x144   : > { %v1056_v39 = vpack.c.bf16 %v1020_v37, %v1016_v32 }
 0x145   : > { %v1057_v43 = vpack.c.bf16 %v1021_v38, %v1017_v35 }
 0x146   : > { %v943_v45 = vpop.f32.mrf.mxu2  ;;  %1350 = vmatmul.bf16.gmra.mxu0 %v1056_v39 }
 0x147   : > { %v944_v46 = vadd.f32 %v943_v45, %v8744_v40  ;;  %v982_v47 = vpop.f32.mrf.mxu3  ;;  %1389 = vmatmul.bf16.gmra.mxu1 %v1057_v43  ;;  %v868_v48 = vpop.f32.mrf.mxu0 }
 0x148   : > { %v983_v49 = vadd.f32 %v982_v47, %v8747_v42  ;;  %v907_v50 = vpop.f32.mrf.mxu1  ;;  %v869_v56 = vadd.f32 %v868_v48, %v8737_v28 }
 0x149   : > { %v1022_v52 = vmax.f32 %v944_v46, 0.0  ;;  %v908_v58 = vadd.f32 %v907_v50, %v8739_v30 }
 0x14a   : > { %v1023_v54 = vmax.f32 %v983_v49, 0.0  ;;  %v1024_v62 = vmax.f32 %v869_v56, 0.0 }
 0x14b   : > { %v1058_v55 = vpack.c.bf16 %v1022_v52, %v1018_v51  ;;  %v1025_v1 = vmax.f32 %v908_v58, 0.0 }
 0x14c   : > { %v1059_v57 = vpack.c.bf16 %v1023_v54, %v1019_v53 }
 0x14d   : > { %1428 = vmatmul.bf16.gmra.mxu2 %v1058_v55 }
 0x14e   : > { %1467 = vmatmul.bf16.gmra.mxu3 %v1059_v57  ;;  %v946_v59 = vpop.f32.mrf.mxu2 }
 0x14f   : > { %v985_v60 = vpop.f32.mrf.mxu3  ;;  %v870_v61 = vpop.f32.mrf.mxu0  ;;  %v947_v6 = vadd.f32 %v946_v59, %v8744_v40 }
 0x150   : > { %v871_v63 = vadd.f32 %v870_v61, %v8737_v28  ;;  %v909_v0 = vpop.f32.mrf.mxu1  ;;  %v986_v8 = vadd.f32 %v985_v60, %v8747_v42 }
 0x151   : > { %v910_v2 = vadd.f32 %v909_v0, %v8739_v30  ;;  %v1026_v15 = vmax.f32 %v947_v6, 0.0 }
 0x152   : > { %v1028_v3 = vmax.f32 %v871_v63, 0.0  ;;  %v1027_v17 = vmax.f32 %v986_v8, 0.0 }
 0x153   : > { %v1029_v4 = vmax.f32 %v910_v2, 0.0 }
 0x154   : > { %v1060_v5 = vpack.c.bf16 %v1028_v3, %v1024_v62 }
 0x155   : > { %v1061_v7 = vpack.c.bf16 %v1029_v4, %v1025_v1 }
 0x156   : > { %v948_v9 = vpop.f32.mrf.mxu2  ;;  %1355 = vmatmul.bf16.gmra.mxu0 %v1060_v5 }
 0x157   : > { %v949_v10 = vadd.f32 %v948_v9, %v8744_v40  ;;  %v987_v11 = vpop.f32.mrf.mxu3  ;;  %1394 = vmatmul.bf16.gmra.mxu1 %v1061_v7  ;;  %v873_v12 = vpop.f32.mrf.mxu0 }
 0x158   : > { %v988_v13 = vadd.f32 %v987_v11, %v8747_v42  ;;  %v912_v14 = vpop.f32.mrf.mxu1  ;;  %v874_v20 = vadd.f32 %v873_v12, %v8737_v28 }
 0x159   : > { %v1030_v16 = vmax.f32 %v949_v10, 0.0  ;;  %v913_v22 = vadd.f32 %v912_v14, %v8739_v30 }
 0x15a   : > { %v1031_v18 = vmax.f32 %v988_v13, 0.0  ;;  %v1032_v26 = vmax.f32 %v874_v20, 0.0 }
 0x15b   : > { %v1062_v19 = vpack.c.bf16 %v1030_v16, %v1026_v15  ;;  %v1033_v31 = vmax.f32 %v913_v22, 0.0  ;;  %v8793_v15 = vld [vmem:[#allocation10] ss:$0 sm:$0xff] }
 0x15c   : > { %v1063_v21 = vpack.c.bf16 %v1031_v18, %v1027_v17 }
 0x15d   : > { %1433 = vmatmul.bf16.gmra.mxu2 %v1062_v19 }
 0x15e   : > { %1472 = vmatmul.bf16.gmra.mxu3 %v1063_v21  ;;  %v951_v23 = vpop.f32.mrf.mxu2 }
 0x15f   : > { %v990_v24 = vpop.f32.mrf.mxu3  ;;  %v875_v25 = vpop.f32.mrf.mxu0  ;;  %v952_v36 = vadd.f32 %v951_v23, %v8744_v40 }
 0x160   : > { %v876_v27 = vadd.f32 %v875_v25, %v8737_v28  ;;  %v914_v29 = vpop.f32.mrf.mxu1  ;;  %v991_v38 = vadd.f32 %v990_v24, %v8747_v42 }
 0x161   : > { %v915_v32 = vadd.f32 %v914_v29, %v8739_v30  ;;  %v1034_v47 = vmax.f32 %v952_v36, 0.0 }
 0x162   : > { %v1036_v33 = vmax.f32 %v876_v27, 0.0  ;;  %v1035_v49 = vmax.f32 %v991_v38, 0.0 }
 0x163   : > { %v1037_v34 = vmax.f32 %v915_v32, 0.0 }
 0x164   : > { %v1064_v35 = vpack.c.bf16 %v1036_v33, %v1032_v26 }
 0x165   : > { %v1065_v37 = vpack.c.bf16 %v1037_v34, %v1033_v31 }
 0x166   : > { %v953_v39 = vpop.f32.mrf.mxu2  ;;  %1360 = vmatmul.bf16.gmra.mxu0 %v1064_v35 }
 0x167   : > { %v954_v41 = vadd.f32 %v953_v39, %v8744_v40  ;;  %v992_v43 = vpop.f32.mrf.mxu3  ;;  %1399 = vmatmul.bf16.gmra.mxu1 %v1065_v37  ;;  %v878_v44 = vpop.f32.mrf.mxu0 }
 0x168   : > { %v993_v45 = vadd.f32 %v992_v43, %v8747_v42  ;;  %v917_v46 = vpop.f32.mrf.mxu1  ;;  %v879_v52 = vadd.f32 %v878_v44, %v8737_v28 }
 0x169   : > { %v1038_v48 = vmax.f32 %v954_v41, 0.0  ;;  %v918_v54 = vadd.f32 %v917_v46, %v8739_v30 }
 0x16a   : > { %v1039_v50 = vmax.f32 %v993_v45, 0.0  ;;  %v1040_v58 = vmax.f32 %v879_v52, 0.0 }
 0x16b   : > { %v1066_v51 = vpack.c.bf16 %v1038_v48, %v1034_v47  ;;  %v1041_v61 = vmax.f32 %v918_v54, 0.0 }
 0x16c   : > { %v1067_v53 = vpack.c.bf16 %v1039_v50, %v1035_v49 }
 0x16d   : > { %1438 = vmatmul.bf16.gmra.mxu2 %v1066_v51 }
 0x16e   : > { %1477 = vmatmul.bf16.gmra.mxu3 %v1067_v53  ;;  %v956_v55 = vpop.f32.mrf.mxu2 }
 0x16f   : > { %v995_v56 = vpop.f32.mrf.mxu3  ;;  %v880_v57 = vpop.f32.mrf.mxu0  ;;  %v957_v2 = vadd.f32 %v956_v55, %v8744_v40 }
 0x170   : > { %v881_v59 = vadd.f32 %v880_v57, %v8737_v28  ;;  %v919_v60 = vpop.f32.mrf.mxu1  ;;  %v996_v4 = vadd.f32 %v995_v56, %v8747_v42 }
 0x171   : > { %v920_v62 = vadd.f32 %v919_v60, %v8739_v30  ;;  %v1042_v8 = vmax.f32 %v957_v2, 0.0 }
 0x172   : > { %v1044_v63 = vmax.f32 %v881_v59, 0.0  ;;  %v1043_v10 = vmax.f32 %v996_v4, 0.0 }
 0x173   : > { %v1045_v0 = vmax.f32 %v920_v62, 0.0 }
 0x174   : > { %v1068_v1 = vpack.c.bf16 %v1044_v63, %v1040_v58 }
 0x175   : > { %v1069_v3 = vpack.c.bf16 %v1045_v0, %v1041_v61 }
 0x176   : > { %v958_v5 = vpop.f32.mrf.mxu2  ;;  %1365 = vmatmul.bf16.gmra.mxu0 %v1068_v1 }
 0x177   : > { %v959_v6 = vadd.f32 %v958_v5, %v8744_v40  ;;  %v997_v7 = vpop.f32.mrf.mxu3  ;;  %1404 = vmatmul.bf16.gmra.mxu1 %v1069_v3 }
 0x178   : > { %v998_v28 = vadd.f32 %v997_v7, %v8747_v42 }
 0x179   : > { %v1046_v9 = vmax.f32 %v959_v6, 0.0 }
 0x17a   : > { %v1047_v30 = vmax.f32 %v998_v28, 0.0 }
 0x17b   : > { %v1070_v11 = vpack.c.bf16 %v1046_v9, %v1042_v8 }
 0x17c   : > { %v1071_v12 = vpack.c.bf16 %v1047_v30, %v1043_v10 }
 0x17d   : > { %1443 = vmatmul.bf16.gmra.mxu2 %v1070_v11 }
 0x17e   : > { %1482 = vmatmul.bf16.gmra.mxu3 %v1071_v12 }
 0x1a3   : > { %v1341_v13 = vpop.f32.mrf.mxu0 }
 0x1a4   : > { %v1380_v14 = vpop.f32.mrf.mxu1  ;;  %v1342_v16 = vadd.f32 %v8793_v15, %v1341_v13 }
 0x1a6   : > { %v1381_v18 = vadd.f32 %v1380_v14, %v1342_v16 }
 0x1ab   : > { %v1343_v17 = vpop.f32.mrf.mxu0 }
 0x1ac   : > { %v1382_v40 = vpop.f32.mrf.mxu1  ;;  %v1344_v21 = vadd.f32 %v8793_v15, %v1343_v17 }
 0x1ae   : > { %v1383_v25 = vadd.f32 %v1382_v40, %v1344_v21  ;;  %v5887_v21 = vld [vmem:[%s8603_s8 + $0x1e0] sm:$0xf0] }
 0x1b0   : > { %v1419_v19 = vpop.f32.mrf.mxu2 }
 0x1b1   : > { %v1420_v20 = vadd.f32 %v1419_v19, %v1381_v18  ;;  %v1458_v42 = vpop.f32.mrf.mxu3  ;;  %v5885_v18 = vld [vmem:[%s8603_s8 + $0x1c0] sm:$0xf] }
 0x1b2   : > { %v7581_v19 = vld [vmem:[%s8603_s8 + $0x1dc] sm:$0xf0] }
 0x1b3   : > { %v1459_v22 = vadd.f32 %v1458_v42, %v1420_v20  ;;  %v1346_v23 = vpop.f32.mrf.mxu0  ;;  %v7577_v20 = vld [vmem:[%s8603_s8 + $0x1c4] sm:$0xf]  ;;  %v5886_v42 = vor.u32 %v7581_v19, %v5885_v18 }
 0x1b4   : > { %v1385_v24 = vpop.f32.mrf.mxu1  ;;  %v1347_v31 = vadd.f32 %v8793_v15, %v1346_v23  ;;  %v7573_v23 = vld [vmem:[%s8603_s8 + $0x19c] sm:$0xf0] }
 0x1b5   : > { %1489 = vst.msk [vmem:[#allocation2] sm:$0xff] %vm1488_vm0, %v1459_v22  ;;  %v5853_v22 = vld [vmem:[%s8603_s8 + $0x180] sm:$0xf]  ;;  %2715 = vmatpush.bf16.msra.mxu0 %v5886_v42 }
 0x1b6   : > { %v1386_v35 = vadd.f32 %v1385_v24, %v1347_v31  ;;  %v5854_v31 = vor.u32 %v7573_v23, %v5853_v22  ;;  %v7525_v22 = vld [vmem:[%s8603_s8 + $0x1c] sm:$0xf0] }
 0x1b8   : > { %v1421_v26 = vpop.f32.mrf.mxu2 }
 0x1b9   : > { %v1422_v27 = vadd.f32 %v1421_v26, %v1383_v25  ;;  %v1460_v29 = vpop.f32.mrf.mxu3  ;;  %v5890_v25 = vor.u32 %v7577_v20, %v5887_v21  ;;  %v7569_v26 = vld [vmem:[%s8603_s8 + $0x184] sm:$0xf]  ;;  %2716 = vmatpush.bf16.msra.mxu0 %v5854_v31  ;;  %v5661_v21 = vld [vmem:[%s8603_s8] sm:$0xf]  ;;  %v6149_v31 = vld [vmem:[%s8603_s8 + $0x3c8] sm:$0xf] }
 0x1bb   : > { %v1461_v32 = vadd.f32 %v1460_v29, %v1422_v27  ;;  %v1348_v33 = vpop.f32.mrf.mxu0  ;;  %v5855_v27 = vld [vmem:[%s8603_s8 + $0x1a0] sm:$0xf0]  ;;  %2757 = vmatpush.bf16.msra.mxu3 %v5890_v25 }
 0x1bc   : > { %v1387_v34 = vpop.f32.mrf.mxu1  ;;  %v1349_v39 = vadd.f32 %v8793_v15, %v1348_v33  ;;  %v5663_v25 = vld [vmem:[%s8603_s8 + $0x20] sm:$0xf0] }
 0x1bd   : > { %1490 = vst.msk [vmem:[#allocation2 + $0x18] sm:$0xff] %vm1488_vm0, %v1461_v32 }
 0x1be   : > { %v1388_v45 = vadd.f32 %v1387_v34, %v1349_v39  ;;  %v5858_v34 = vor.u32 %v7569_v26, %v5855_v27  ;;  %v5823_v39 = vld [vmem:[%s8603_s8 + $0x160] sm:$0xf0] }
 0x1bf   : > { %v7641_v26 = vld [vmem:[%s8603_s8 + $0x3c4] sm:$0xf] }
 0x1c0   : > { %v1424_v36 = vpop.f32.mrf.mxu2  ;;  %2758 = vmatpush.bf16.msra.mxu3 %v5858_v34 }
 0x1c1   : > { %v1425_v37 = vadd.f32 %v1424_v36, %v1386_v35  ;;  %v1463_v38 = vpop.f32.mrf.mxu3  ;;  %v5821_v35 = vld [vmem:[%s8603_s8 + $0x140] sm:$0xf] }
 0x1c2   : > { %v7565_v36 = vld [vmem:[%s8603_s8 + $0x15c] sm:$0xf0] }
 0x1c3   : > { %v1464_v41 = vadd.f32 %v1463_v38, %v1425_v37  ;;  %v1351_v43 = vpop.f32.mrf.mxu0  ;;  %v7561_v38 = vld [vmem:[%s8603_s8 + $0x144] sm:$0xf] }
 0x1c4   : > { %v1390_v44 = vpop.f32.mrf.mxu1  ;;  %v1352_v49 = vadd.f32 %v8793_v15, %v1351_v43 }
 0x1c5   : > { %1493 = vrot.lane.b32.xlu1 %v1464_v41, %s8401_s15 }
 0x1c6   : > { %v1391_v53 = vadd.f32 %v1390_v44, %v1352_v49  ;;  %v5822_v44 = vor.u32 %v7565_v36, %v5821_v35  ;;  %v7553_v49 = vld [vmem:[%s8603_s8 + $0x104] sm:$0xf] }
 0x1c8   : > { %v1426_v46 = vpop.f32.mrf.mxu2  ;;  %2717 = vmatpush.bf16.msra.mxu0 %v5822_v44  ;;  %v7633_v44 = vld [vmem:[%s8603_s8 + $0x384] sm:$0xf] }
 0x1c9   : > { %v1427_v47 = vadd.f32 %v1426_v46, %v1388_v45  ;;  %v1465_v48 = vpop.f32.mrf.mxu3  ;;  %v5826_v45 = vor.u32 %v7561_v38, %v5823_v39  ;;  %v5789_v46 = vld [vmem:[%s8603_s8 + $0x100] sm:$0xf] }
 0x1cb   : > { %v1466_v50 = vadd.f32 %v1465_v48, %v1427_v47  ;;  %v1353_v51 = vpop.f32.mrf.mxu0  ;;  %v7557_v47 = vld [vmem:[%s8603_s8 + $0x11c] sm:$0xf0]  ;;  %2759 = vmatpush.bf16.msra.mxu3 %v5826_v45 }
 0x1cc   : > { %v1392_v52 = vpop.f32.mrf.mxu1  ;;  %v1354_v57 = vadd.f32 %v8793_v15, %v1353_v51 }
 0x1cd   : > { %1495 = vrot.lane.b32.xlu1 %v1466_v50, %s8401_s15  ;;  %v5791_v50 = vld [vmem:[%s8603_s8 + $0x120] sm:$0xf0] }
 0x1ce   : > { %v1393_v61 = vadd.f32 %v1392_v52, %v1354_v57 }
 0x1d0   : > { %v1429_v54 = vpop.f32.mrf.mxu2 }
 0x1d1   : > { %v1430_v55 = vadd.f32 %v1429_v54, %v1391_v53  ;;  %v1468_v56 = vpop.f32.mrf.mxu3  ;;  %v5790_v53 = vor.u32 %v7557_v47, %v5789_v46  ;;  %v6141_v54 = vld [vmem:[%s8603_s8 + $0x3c0] sm:$0xf]  ;;  %v6111_v46 = vld [vmem:[%s8603_s8 + $0x3a0] sm:$0xf0]  ;;  %v6117_v47 = vld [vmem:[%s8603_s8 + $0x388] sm:$0xf] }
 0x1d3   : > { %v1469_v58 = vadd.f32 %v1468_v56, %v1430_v55  ;;  %v1356_v59 = vpop.f32.mrf.mxu0  ;;  %v7645_v55 = vld [vmem:[%s8603_s8 + $0x3dc] sm:$0xf0]  ;;  %2718 = vmatpush.bf16.msra.mxu0 %v5790_v53  ;;  %v7625_v53 = vld [vmem:[%s8603_s8 + $0x344] sm:$0xf] }
 0x1d4   : > { %v1395_v60 = vpop.f32.mrf.mxu1  ;;  %v1357_v1 = vadd.f32 %v8793_v15, %v1356_v59  ;;  %v5757_v59 = vld [vmem:[%s8603_s8 + $0xc0] sm:$0xf] }
 0x1d5   : > { %1502 = vst.msk [vmem:[#allocation2 + $0x8] sm:$0xff] %vm1488_vm0, %v1469_v58  ;;  %v5794_v58 = vor.u32 %v7553_v49, %v5791_v50  ;;  %v6114_v49 = vor.u32 %v7633_v44, %v6111_v46 }
 0x1d6   : > { %v1396_v5 = vadd.f32 %v1395_v60, %v1357_v1  ;;  %v7549_v60 = vld [vmem:[%s8603_s8 + $0xdc] sm:$0xf0] }
 0x1d7   : > { %2760 = vmatpush.bf16.msra.mxu3 %v5794_v58 }
 0x1d8   : > { %v1431_v62 = vpop.f32.mrf.mxu2 }
 0x1d9   : > { %v1432_v63 = vadd.f32 %v1431_v62, %v1393_v61  ;;  %v1470_v0 = vpop.f32.mrf.mxu3  ;;  %v6142_v61 = vor.u32 %v7645_v55, %v6141_v54  ;;  %v7545_v62 = vld [vmem:[%s8603_s8 + $0xc4] sm:$0xf] }
 0x1da   : > { %v6079_v55 = vld [vmem:[%s8603_s8 + $0x360] sm:$0xf0] }
 0x1db   : > { %v1471_v2 = vadd.f32 %v1470_v0, %v1432_v63  ;;  %v1358_v3 = vpop.f32.mrf.mxu0  ;;  %v5759_v63 = vld [vmem:[%s8603_s8 + $0xe0] sm:$0xf0]  ;;  %2729 = vmatpush.bf16.msra.mxu1 %v6142_v61  ;;  %v6082_v58 = vor.u32 %v7625_v53, %v6079_v55  ;;  %v7621_v61 = vld [vmem:[%s8603_s8 + $0x31c] sm:$0xf0] }
 0x1dc   : > { %v1397_v4 = vpop.f32.mrf.mxu1  ;;  %v1359_v8 = vadd.f32 %v8793_v15, %v1358_v3  ;;  %v5758_v3 = vor.u32 %v7549_v60, %v5757_v59  ;;  %v6045_v60 = vld [vmem:[%s8603_s8 + $0x300] sm:$0xf] }
 0x1dd   : > { %1503 = vst.msk [vmem:[#allocation2 + $0x20] sm:$0xff] %vm1488_vm0, %v1471_v2  ;;  %v6333_v53 = vld [vmem:[%s8603_s8 + $0x540] sm:$0xf] }
 0x1de   : > { %v1398_v30 = vadd.f32 %v1397_v4, %v1359_v8  ;;  %v5762_v4 = vor.u32 %v7545_v62, %v5759_v63  ;;  %2719 = vmatpush.bf16.msra.mxu0 %v5758_v3  ;;  %v7617_v62 = vld [vmem:[%s8603_s8 + $0x304] sm:$0xf]  ;;  %v6046_v63 = vor.u32 %v7621_v61, %v6045_v60  ;;  %v7693_v55 = vld [vmem:[%s8603_s8 + $0x55c] sm:$0xf0] }
 0x1df   : > { %v6301_v60 = vld [vmem:[%s8603_s8 + $0x500] sm:$0xf] }
 0x1e0   : > { %v1434_v6 = vpop.f32.mrf.mxu2  ;;  %2761 = vmatpush.bf16.msra.mxu3 %v5762_v4  ;;  %v7685_v61 = vld [vmem:[%s8603_s8 + $0x51c] sm:$0xf0] }
 0x1e1   : > { %v1435_v7 = vadd.f32 %v1434_v6, %v1396_v5  ;;  %v1473_v28 = vpop.f32.mrf.mxu3  ;;  %v5725_v5 = vld [vmem:[%s8603_s8 + $0x80] sm:$0xf] }
 0x1e2   : > { %v7541_v6 = vld [vmem:[%s8603_s8 + $0x9c] sm:$0xf0] }
 0x1e3   : > { %v1474_v9 = vadd.f32 %v1473_v28, %v1435_v7  ;;  %v1361_v10 = vpop.f32.mrf.mxu0  ;;  %v7537_v7 = vld [vmem:[%s8603_s8 + $0x84] sm:$0xf] }
 0x1e4   : > { %v1400_v11 = vpop.f32.mrf.mxu1  ;;  %v1362_v16 = vadd.f32 %v8793_v15, %v1361_v10  ;;  %v5727_v28 = vld [vmem:[%s8603_s8 + $0xa0] sm:$0xf0] }
 0x1e5   : > { %1506 = vrot.lane.b32.xlu2 %v1474_v9, %s8401_s15 }
 0x1e6   : > { %v1401_v24 = vadd.f32 %v1400_v11, %v1362_v16  ;;  %v7533_v16 = vld [vmem:[%s8603_s8 + $0x5c] sm:$0xf0] }
 0x1e8   : > { %v1436_v12 = vpop.f32.mrf.mxu2 }
 0x1e9   : > { %v1437_v13 = vadd.f32 %v1436_v12, %v1398_v30  ;;  %v1475_v14 = vpop.f32.mrf.mxu3  ;;  %v5726_v30 = vor.u32 %v7541_v6, %v5725_v5  ;;  %v6013_v5 = vld [vmem:[%s8603_s8 + $0x2c0] sm:$0xf] }
 0x1ea   : > { %v7613_v6 = vld [vmem:[%s8603_s8 + $0x2dc] sm:$0xf0] }
 0x1eb   : > { %v1476_v17 = vadd.f32 %v1475_v14, %v1437_v13  ;;  %v1363_v40 = vpop.f32.mrf.mxu0  ;;  %v5730_v13 = vor.u32 %v7537_v7, %v5727_v28  ;;  %v5693_v14 = vld [vmem:[%s8603_s8 + $0x40] sm:$0xf]  ;;  %2720 = vmatpush.bf16.msra.mxu0 %v5726_v30  ;;  %v7609_v7 = vld [vmem:[%s8603_s8 + $0x2c4] sm:$0xf]  ;;  %v6014_v28 = vor.u32 %v7613_v6, %v6013_v5 }
 0x1ec   : > { %v1402_v37 = vpop.f32.mrf.mxu1  ;;  %v1364_v41 = vadd.f32 %v8793_v15, %v1363_v40  ;;  %v5695_v40 = vld [vmem:[%s8603_s8 + $0x60] sm:$0xf0]  ;;  %v5694_v20 = vor.u32 %v7533_v16, %v5693_v14  ;;  %v7677_v5 = vld [vmem:[%s8603_s8 + $0x4dc] sm:$0xf0] }
 0x1ed   : > { %1508 = vrot.lane.b32.xlu2 %v1476_v17, %s8401_s15  ;;  %v7529_v17 = vld [vmem:[%s8603_s8 + $0x44] sm:$0xf]  ;;  %2762 = vmatpush.bf16.msra.mxu3 %v5730_v13  ;;  %v7605_v13 = vld [vmem:[%s8603_s8 + $0x29c] sm:$0xf0] }
 0x1ee   : > { %v1403_v51 = vadd.f32 %v1402_v37, %v1364_v41  ;;  %v5698_v42 = vor.u32 %v7529_v17, %v5695_v40  ;;  %v6109_v41 = vld [vmem:[%s8603_s8 + $0x380] sm:$0xf]  ;;  %v7601_v14 = vld [vmem:[%s8603_s8 + $0x284] sm:$0xf]  ;;  %v5989_v40 = vld [vmem:[%s8603_s8 + $0x288] sm:$0xf] }
 0x1ef   : > { %2721 = vmatpush.bf16.msra.mxu0 %v5694_v20  ;;  %v5983_v17 = vld [vmem:[%s8603_s8 + $0x2a0] sm:$0xf0] }
 0x1f0   : > { %v1439_v29 = vpop.f32.mrf.mxu2  ;;  %v7673_v6 = vld [vmem:[%s8603_s8 + $0x4c4] sm:$0xf] }
 0x1f1   : > { %v1440_v32 = vadd.f32 %v1439_v29, %v1401_v24  ;;  %v1478_v33 = vpop.f32.mrf.mxu3  ;;  %v7521_v24 = vld [vmem:[%s8603_s8 + $0x4] sm:$0xf]  ;;  %2763 = vmatpush.bf16.msra.mxu3 %v5698_v42  ;;  %v5949_v42 = vld [vmem:[%s8603_s8 + $0x240] sm:$0xf] }
 0x1f2   : > { %v6143_v29 = vld [vmem:[%s8603_s8 + $0x3e0] sm:$0xf0]  ;;  %v5666_v35 = vor.u32 %v7521_v24, %v5663_v25  ;;  %v5957_v25 = vld [vmem:[%s8603_s8 + $0x248] sm:$0xf] }
 0x1f3   : > { %v1479_v43 = vadd.f32 %v1478_v33, %v1440_v32  ;;  %v1366_v48 = vpop.f32.mrf.mxu0  ;;  %v7646_v32 = vld [vmem:[%s8603_s8 + $0x3e4] sm:$0xf0]  ;;  %v5662_v33 = vor.u32 %v7525_v22, %v5661_v21  ;;  %v6146_v37 = vor.u32 %v7641_v26, %v6143_v29  ;;  %v7597_v21 = vld [vmem:[%s8603_s8 + $0x25c] sm:$0xf0]  ;;  %v7593_v22 = vld [vmem:[%s8603_s8 + $0x244] sm:$0xf] }
 0x1f4   : > { %v1367_v0 = vadd.f32 %v8793_v15, %v1366_v48  ;;  %v1405_v2 = vpop.f32.mrf.mxu1  ;;  %v6150_v38 = vor.u32 %v7646_v32, %v6149_v31  ;;  %v7638_v48 = vld [vmem:[%s8603_s8 + $0x3a4] sm:$0xf0]  ;;  %v5951_v24 = vld [vmem:[%s8603_s8 + $0x260] sm:$0xf0]  ;;  %v5917_v31 = vld [vmem:[%s8603_s8 + $0x200] sm:$0xf] }
 0x1f5   : > { %1514 = vst.msk [vmem:[#allocation2 + $0x10] sm:$0xff] %vm1488_vm0, %v1479_v43  ;;  %2722 = vmatpush.bf16.msra.mxu0 %v5662_v33  ;;  %2764 = vmatpush.bf16.msra.mxu3 %v5666_v35  ;;  %v7637_v43 = vld [vmem:[%s8603_s8 + $0x39c] sm:$0xf0]  ;;  %v6118_v50 = vor.u32 %v7638_v48, %v6117_v47  ;;  %v7598_v26 = vld [vmem:[%s8603_s8 + $0x264] sm:$0xf0] }
 0x1f6   : > { %v1406_v8 = vadd.f32 %v1405_v2, %v1367_v0  ;;  %v6110_v45 = vor.u32 %v7637_v43, %v6109_v41  ;;  %v6047_v0 = vld [vmem:[%s8603_s8 + $0x320] sm:$0xf0]  ;;  %v7622_v2 = vld [vmem:[%s8603_s8 + $0x324] sm:$0xf0]  ;;  %v5958_v29 = vor.u32 %v7598_v26, %v5957_v25  ;;  %v7589_v32 = vld [vmem:[%s8603_s8 + $0x21c] sm:$0xf0] }
 0x1f7   : > { %v6050_v3 = vor.u32 %v7617_v62, %v6047_v0  ;;  %v5918_v33 = vor.u32 %v7589_v32, %v5917_v31  ;;  %v5925_v35 = vld [vmem:[%s8603_s8 + $0x208] sm:$0xf]  ;;  %v7709_v41 = vld [vmem:[%s8603_s8 + $0x5dc] sm:$0xf0]  ;;  %v7705_v43 = vld [vmem:[%s8603_s8 + $0x5c4] sm:$0xf] }
 0x1f8   : > { %v1441_v52 = vpop.f32.mrf.mxu2  ;;  %2730 = vmatpush.bf16.msra.mxu1 %v6110_v45  ;;  %v6399_v45 = vld [vmem:[%s8603_s8 + $0x5e0] sm:$0xf0]  ;;  %v6365_v47 = vld [vmem:[%s8603_s8 + $0x580] sm:$0xf] }
 0x1f9   : > { %v1442_v56 = vadd.f32 %v1441_v52, %v1403_v51  ;;  %v1480_v57 = vpop.f32.mrf.mxu3  ;;  %2771 = vmatpush.bf16.msrb.mxu0 %v6146_v37  ;;  %2813 = vmatpush.bf16.msrb.mxu3 %v6150_v38  ;;  %v6077_v51 = vld [vmem:[%s8603_s8 + $0x340] sm:$0xf]  ;;  %v6402_v46 = vor.u32 %v7705_v43, %v6399_v45  ;;  %v7681_v62 = vld [vmem:[%s8603_s8 + $0x504] sm:$0xf]  ;;  %v5893_v43 = vld [vmem:[%s8603_s8 + $0x1c8] sm:$0xf] }
 0x1fa   : > { %v7629_v52 = vld [vmem:[%s8603_s8 + $0x35c] sm:$0xf0]  ;;  %v6303_v0 = vld [vmem:[%s8603_s8 + $0x520] sm:$0xf0] }
 0x1fb   : > { %v1481_v1 = vadd.f32 %v1480_v57, %v1442_v56  ;;  %v1368_v9 = vpop.f32.mrf.mxu0  ;;  %v6078_v54 = vor.u32 %v7629_v52, %v6077_v51  ;;  %v6085_v56 = vld [vmem:[%s8603_s8 + $0x348] sm:$0xf]  ;;  %v7701_v48 = vld [vmem:[%s8603_s8 + $0x59c] sm:$0xf0]  ;;  %v6367_v51 = vld [vmem:[%s8603_s8 + $0x5a0] sm:$0xf0] }
 0x1fc   : > { %v1369_v18 = vadd.f32 %v8793_v15, %v1368_v9  ;;  %v1407_v23 = vpop.f32.mrf.mxu1  ;;  %v7630_v57 = vld [vmem:[%s8603_s8 + $0x364] sm:$0xf0]  ;;  %v7657_v25 = vld [vmem:[%s8603_s8 + $0x444] sm:$0xf]  ;;  %v6173_v31 = vld [vmem:[%s8603_s8 + $0x400] sm:$0xf] }
 0x1fd   : > { %1515 = vst.msk [vmem:[#allocation2 + $0x28] sm:$0xff] %vm1488_vm0, %v1481_v1  ;;  %2772 = vmatpush.bf16.msrb.mxu0 %v6114_v49  ;;  %2814 = vmatpush.bf16.msrb.mxu3 %v6118_v50  ;;  %v6086_v59 = vor.u32 %v7630_v57, %v6085_v56  ;;  %v6053_v1 = vld [vmem:[%s8603_s8 + $0x308] sm:$0xf]  ;;  %v7697_v49 = vld [vmem:[%s8603_s8 + $0x584] sm:$0xf]  ;;  %v6366_v50 = vor.u32 %v7701_v48, %v6365_v47 }
 0x1fe   : > { %v1408_v27 = vadd.f32 %v1407_v23, %v1369_v18  ;;  %2731 = vmatpush.bf16.msra.mxu1 %v6078_v54  ;;  %v6054_v4 = vor.u32 %v7622_v2, %v6053_v1  ;;  %v6021_v9 = vld [vmem:[%s8603_s8 + $0x2c8] sm:$0xf]  ;;  %v5950_v23 = vor.u32 %v7597_v21, %v5949_v42  ;;  %v6370_v52 = vor.u32 %v7697_v49, %v6367_v51  ;;  %v7689_v56 = vld [vmem:[%s8603_s8 + $0x544] sm:$0xf]  ;;  %v6269_v2 = vld [vmem:[%s8603_s8 + $0x4c0] sm:$0xf] }
 0x1ff   : > { %v7606_v18 = vld [vmem:[%s8603_s8 + $0x2a4] sm:$0xf0]  ;;  %v6335_v57 = vld [vmem:[%s8603_s8 + $0x560] sm:$0xf0]  ;;  %v6306_v1 = vor.u32 %v7681_v62, %v6303_v0  ;;  %v7706_v21 = vld [vmem:[%s8603_s8 + $0x5cc] sm:$0xf] }
 0x200   : > { %v1444_v10 = vpop.f32.mrf.mxu2  ;;  %v5990_v20 = vor.u32 %v7606_v18, %v5989_v40  ;;  %v1535_v18 = vld [vmem:[%s8592_s18 + $0x18] sm:$0xff]  ;;  %v1536_v45 = vld [vmem:[%s8592_s18 + $0x20] sm:$0xff] }
 0x201   : > { %v1445_v11 = vadd.f32 %v1444_v10, %v1406_v8  ;;  %v1483_v12 = vpop.f32.mrf.mxu3  ;;  %2773 = vmatpush.bf16.msrb.mxu0 %v6082_v58  ;;  %2815 = vmatpush.bf16.msrb.mxu3 %v6086_v59  ;;  %v6015_v8 = vld [vmem:[%s8603_s8 + $0x2e0] sm:$0xf0]  ;;  %v7614_v10 = vld [vmem:[%s8603_s8 + $0x2e4] sm:$0xf0]  ;;  %v6334_v58 = vor.u32 %v7693_v55, %v6333_v53  ;;  %v6338_v59 = vor.u32 %v7689_v56, %v6335_v57  ;;  %v7653_v32 = vld [vmem:[%s8603_s8 + $0x41c] sm:$0xf0] }
 0x202   : > { %2732 = vmatpush.bf16.msra.mxu1 %v6046_v63  ;;  %v6018_v30 = vor.u32 %v7609_v7, %v6015_v8  ;;  %v6302_v63 = vor.u32 %v7685_v61, %v6301_v60  ;;  %v6270_v7 = vor.u32 %v7677_v5, %v6269_v2  ;;  %v7710_v42 = vld [vmem:[%s8603_s8 + $0x5e4] sm:$0xf0]  ;;  %v6207_v26 = vld [vmem:[%s8603_s8 + $0x460] sm:$0xf0]  ;;  %v7578_v53 = vld [vmem:[%s8603_s8 + $0x1cc] sm:$0xf] }
 0x203   : > { %v1484_v19 = vadd.f32 %v1483_v12, %v1445_v11  ;;  %v6022_v11 = vor.u32 %v7614_v10, %v6021_v9  ;;  %v5981_v12 = vld [vmem:[%s8603_s8 + $0x280] sm:$0xf]  ;;  %v7649_v47 = vld [vmem:[%s8603_s8 + $0x404] sm:$0xf]  ;;  %v7694_v51 = vld [vmem:[%s8603_s8 + $0x564] sm:$0xf0] }
 0x204   : > { %v5982_v16 = vor.u32 %v7605_v13, %v5981_v12  ;;  %v6237_v9 = vld [vmem:[%s8603_s8 + $0x480] sm:$0xf]  ;;  %v6175_v48 = vld [vmem:[%s8603_s8 + $0x420] sm:$0xf0]  ;;  %v5895_v56 = vld [vmem:[%s8603_s8 + $0x1e8] sm:$0xf0] }
 0x205   : > { %1518 = vrot.lane.b32.xlu0 %v1484_v19, %s8401_s15  ;;  %2774 = vmatpush.bf16.msrb.mxu0 %v6050_v3  ;;  %v5986_v19 = vor.u32 %v7601_v14, %v5983_v17  ;;  %v7669_v10 = vld [vmem:[%s8603_s8 + $0x49c] sm:$0xf0]  ;;  %v5861_v57 = vld [vmem:[%s8603_s8 + $0x188] sm:$0xf]  ;;  %v7690_v60 = vld [vmem:[%s8603_s8 + $0x54c] sm:$0xf]  ;;  %v6178_v62 = vor.u32 %v7649_v47, %v6175_v48  ;;  %v5898_v2 = vor.u32 %v7578_v53, %v5895_v56 }
 0x206   : > { %2816 = vmatpush.bf16.msrb.mxu3 %v6054_v4  ;;  %2733 = vmatpush.bf16.msra.mxu1 %v6014_v28  ;;  %v6271_v28 = vld [vmem:[%s8603_s8 + $0x4e0] sm:$0xf0]  ;;  %v6238_v12 = vor.u32 %v7669_v10, %v6237_v9  ;;  %v1532_v13 = vld [vmem:[%s8592_s18] sm:$0xff] }
 0x207   : > { %v6274_v8 = vor.u32 %v7673_v6, %v6271_v28  ;;  %v7661_v17 = vld [vmem:[%s8603_s8 + $0x45c] sm:$0xf0]  ;;  %v6343_v61 = vld [vmem:[%s8603_s8 + $0x568] sm:$0xf0]  ;;  %v7566_v9 = vld [vmem:[%s8603_s8 + $0x164] sm:$0xf0] }
 0x208   : > { %v1446_v15 = vpop.f32.mrf.mxu2  ;;  %v5863_v28 = vld [vmem:[%s8603_s8 + $0x1a8] sm:$0xf0]  ;;  %v7686_v10 = vld [vmem:[%s8603_s8 + $0x524] sm:$0xf0] }
 0x209   : > { %v1447_v34 = vadd.f32 %v1446_v15, %v1408_v27  ;;  %v1485_v36 = vpop.f32.mrf.mxu3  ;;  %2775 = vmatpush.bf16.msrb.mxu0 %v6018_v30  ;;  %v5954_v27 = vor.u32 %v7593_v22, %v5951_v24  ;;  %v7585_v15 = vld [vmem:[%s8603_s8 + $0x204] sm:$0xf]  ;;  %v6407_v22 = vld [vmem:[%s8603_s8 + $0x5e8] sm:$0xf0]  ;;  %v6181_v53 = vld [vmem:[%s8603_s8 + $0x408] sm:$0xf] }
 0x20a   : > { %2817 = vmatpush.bf16.msrb.mxu3 %v6022_v11  ;;  %2734 = vmatpush.bf16.msra.mxu1 %v5982_v16  ;;  %v7665_v30 = vld [vmem:[%s8603_s8 + $0x484] sm:$0xf]  ;;  %v6205_v16 = vld [vmem:[%s8603_s8 + $0x440] sm:$0xf]  ;;  %v7546_v47 = vld [vmem:[%s8603_s8 + $0xcc] sm:$0xf] }
 0x20b   : > { %v1486_v39 = vadd.f32 %v1485_v36, %v1447_v34  ;;  %v5919_v34 = vld [vmem:[%s8603_s8 + $0x220] sm:$0xf0]  ;;  %v7590_v36 = vld [vmem:[%s8603_s8 + $0x224] sm:$0xf0]  ;;  %v6206_v24 = vor.u32 %v7661_v17, %v6205_v16  ;;  %v5767_v48 = vld [vmem:[%s8603_s8 + $0xe8] sm:$0xf0] }
 0x20c   : > { %v5922_v37 = vor.u32 %v7585_v15, %v5919_v34  ;;  %v5926_v38 = vor.u32 %v7590_v36, %v5925_v35  ;;  %v6239_v11 = vld [vmem:[%s8603_s8 + $0x4a0] sm:$0xf0]  ;;  %v6373_v34 = vld [vmem:[%s8603_s8 + $0x588] sm:$0xf]  ;;  %v7698_v36 = vld [vmem:[%s8603_s8 + $0x58c] sm:$0xf] }
 0x20d   : > { %1520 = vrot.lane.b32.xlu0 %v1486_v39, %s8401_s15  ;;  %2776 = vmatpush.bf16.msrb.mxu0 %v5986_v19  ;;  %v6397_v39 = vld [vmem:[%s8603_s8 + $0x5c0] sm:$0xf]  ;;  %v6242_v14 = vor.u32 %v7665_v30, %v6239_v11  ;;  %v6405_v19 = vld [vmem:[%s8603_s8 + $0x5c8] sm:$0xf]  ;;  %v7682_v30 = vld [vmem:[%s8603_s8 + $0x50c] sm:$0xf] }
 0x20e   : > { %2818 = vmatpush.bf16.msrb.mxu3 %v5990_v20  ;;  %2735 = vmatpush.bf16.msra.mxu1 %v5950_v23  ;;  %v6398_v44 = vor.u32 %v7709_v41, %v6397_v39  ;;  %v6406_v15 = vor.u32 %v7710_v42, %v6405_v19  ;;  %v7702_v35 = vld [vmem:[%s8603_s8 + $0x5a4] sm:$0xf0]  ;;  %v6375_v39 = vld [vmem:[%s8603_s8 + $0x5a8] sm:$0xf0]  ;;  %v6210_v41 = vor.u32 %v7657_v25, %v6207_v26 }
 0x20f   : > { %v6378_v55 = vor.u32 %v7698_v36, %v6375_v39  ;;  %v6311_v11 = vld [vmem:[%s8603_s8 + $0x528] sm:$0xf0]  ;;  %v6277_v17 = vld [vmem:[%s8603_s8 + $0x4c8] sm:$0xf] }
 0x210   : > { %2743 = vmatpush.bf16.msra.mxu2 %v6398_v44  ;;  %v7582_v44 = vld [vmem:[%s8603_s8 + $0x1e4] sm:$0xf0]  ;;  %v6314_v16 = vor.u32 %v7682_v30, %v6311_v11  ;;  %v6279_v19 = vld [vmem:[%s8603_s8 + $0x4e8] sm:$0xf0] }
 0x211   : > { %2777 = vmatpush.bf16.msrb.mxu0 %v5954_v27  ;;  %v5831_v42 = vld [vmem:[%s8603_s8 + $0x168] sm:$0xf0]  ;;  %v6245_v25 = vld [vmem:[%s8603_s8 + $0x488] sm:$0xf] }
 0x212   : > { %2819 = vmatpush.bf16.msrb.mxu3 %v5958_v29  ;;  %2736 = vmatpush.bf16.msra.mxu1 %v5918_v33  ;;  %v6410_v33 = vor.u32 %v7706_v21, %v6407_v22  ;;  %v5797_v21 = vld [vmem:[%s8603_s8 + $0x108] sm:$0xf]  ;;  %v6183_v56 = vld [vmem:[%s8603_s8 + $0x428] sm:$0xf0] }
 0x213   : > { %v7558_v22 = vld [vmem:[%s8603_s8 + $0x124] sm:$0xf0] }
 0x214   : > { %2744 = vmatpush.bf16.msra.mxu2 %v6366_v50  ;;  %v6341_v50 = vld [vmem:[%s8603_s8 + $0x548] sm:$0xf] }
 0x215   : > { %2778 = vmatpush.bf16.msrb.mxu0 %v5922_v37  ;;  %v6342_v6 = vor.u32 %v7694_v51, %v6341_v50  ;;  %v7670_v26 = vld [vmem:[%s8603_s8 + $0x4a4] sm:$0xf0] }
 0x216   : > { %2820 = vmatpush.bf16.msrb.mxu3 %v5926_v38  ;;  %2785 = vmatpush.bf16.msrb.mxu1 %v6402_v46  ;;  %v1533_v38 = vld [vmem:[%s8592_s18 + $0x8] sm:$0xff]  ;;  %v6174_v46 = vor.u32 %v7653_v32, %v6173_v31  ;;  %v5798_v32 = vor.u32 %v7558_v22, %v5797_v21  ;;  %v6246_v36 = vor.u32 %v7670_v26, %v6245_v25 }
 0x217   : > { %v6213_v39 = vld [vmem:[%s8603_s8 + $0x448] sm:$0xf] }
 0x218   : > { %2745 = vmatpush.bf16.msra.mxu2 %v6334_v58  ;;  %v7574_v58 = vld [vmem:[%s8603_s8 + $0x1a4] sm:$0xf0] }
 0x219   : > { %v7542_v50 = vld [vmem:[%s8603_s8 + $0xa4] sm:$0xf0] }
 0x21a   : > { %2786 = vmatpush.bf16.msrb.mxu1 %v6370_v52  ;;  %v5894_v52 = vor.u32 %v7582_v44, %v5893_v43  ;;  %v7658_v43 = vld [vmem:[%s8603_s8 + $0x44c] sm:$0xf] }
 0x21b   : > { %v6215_v44 = vld [vmem:[%s8603_s8 + $0x468] sm:$0xf0] }
 0x21c   : > { %2746 = vmatpush.bf16.msra.mxu2 %v6302_v63 }
 0x21e   : > { %2787 = vmatpush.bf16.msrb.mxu1 %v6338_v59 }
 0x220   : > { %2747 = vmatpush.bf16.msra.mxu2 %v6270_v7  ;;  %v6346_v7 = vor.u32 %v7690_v60, %v6343_v61  ;;  %v7579_v61 = vld [vmem:[%s8603_s8 + $0x1d4] sm:$0xf] }
 0x222   : > { %2788 = vmatpush.bf16.msrb.mxu1 %v6306_v1  ;;  %v6309_v1 = vld [vmem:[%s8603_s8 + $0x508] sm:$0xf] }
 0x224   : > { %2748 = vmatpush.bf16.msra.mxu2 %v6238_v12 }
 0x226   : > { %2789 = vmatpush.bf16.msrb.mxu1 %v6274_v8  ;;  %v5829_v8 = vld [vmem:[%s8603_s8 + $0x148] sm:$0xf] }
 0x228   : > { %2749 = vmatpush.bf16.msra.mxu2 %v6206_v24 }
 0x22a   : > { %2790 = vmatpush.bf16.msrb.mxu1 %v6242_v14  ;;  %v6310_v14 = vor.u32 %v7686_v10, %v6309_v1  ;;  %v5701_v1 = vld [vmem:[%s8603_s8 + $0x48] sm:$0xf]  ;;  %v5871_v10 = vld [vmem:[%s8603_s8 + $0x1b0] sm:$0xf0] }
 0x22c   : > { %2750 = vmatpush.bf16.msra.mxu2 %v6174_v46 }
 0x22e   : > { %2791 = vmatpush.bf16.msrb.mxu1 %v6210_v41  ;;  %v7662_v41 = vld [vmem:[%s8603_s8 + $0x464] sm:$0xf0] }
 0x22f   : > { %v6214_v51 = vor.u32 %v7662_v41, %v6213_v39  ;;  %v5775_v39 = vld [vmem:[%s8603_s8 + $0xf0] sm:$0xf0] }
 0x230   : > { %2799 = vmatpush.bf16.msrb.mxu2 %v5894_v52  ;;  %v6218_v52 = vor.u32 %v7658_v43, %v6215_v44 }
 0x232   : > { %2792 = vmatpush.bf16.msrb.mxu1 %v6178_v62  ;;  %v5903_v62 = vld [vmem:[%s8603_s8 + $0x1f0] sm:$0xf0] }
 0x237   : > { %v1494_v54 = vpop.permute.xlu1 %1493 }
 0x238   : > { %1500 = vst.msk [vmem:[#allocation2] sm:$0xff] %vm1499_vm1, %v1494_v54  ;;  %v6374_v54 = vor.u32 %v7702_v35, %v6373_v34  ;;  %v5765_v34 = vld [vmem:[%s8603_s8 + $0xc8] sm:$0xf] }
 0x239   : > { %v7550_v35 = vld [vmem:[%s8603_s8 + $0xe4] sm:$0xf0] }
 0x23a   : > { %v5766_v46 = vor.u32 %v7550_v35, %v5765_v34  ;;  %v5773_v35 = vld [vmem:[%s8603_s8 + $0xd0] sm:$0xf] }
 0x23f   : > { %v1507_v3 = vpop.permute.xlu2 %1506  ;;  %v1496_v4 = vpop.permute.xlu1 %1495  ;;  %v1526_v40 = vld [vmem:[#allocation2] sm:$0xff] }
 0x240   : > { %1512 = vst.msk [vmem:[#allocation2 + $0x8] sm:$0xff] %vm1499_vm1, %v1507_v3  ;;  %v1538_v27 = vmul.f32 %v1532_v13, %v1526_v40  ;;  %v5862_v3 = vor.u32 %v7574_v58, %v5861_v57  ;;  %v5830_v13 = vor.u32 %v7566_v9, %v5829_v8  ;;  %v7678_v40 = vld [vmem:[%s8603_s8 + $0x4e4] sm:$0xf0]  ;;  %v5901_v57 = vld [vmem:[%s8603_s8 + $0x1d0] sm:$0xf] }
 0x241   : > { %1501 = vst.msk [vmem:[#allocation2 + $0x18] sm:$0xff] %vm1499_vm1, %v1496_v4  ;;  %v7570_v4 = vld [vmem:[%s8603_s8 + $0x18c] sm:$0xf]  ;;  %v7583_v58 = vld [vmem:[%s8603_s8 + $0x1ec] sm:$0xf0] }
 0x242   : > { %2800 = vmatpush.bf16.msrb.mxu2 %v5862_v3  ;;  %v5866_v12 = vor.u32 %v7570_v4, %v5863_v28  ;;  %v5869_v28 = vld [vmem:[%s8603_s8 + $0x190] sm:$0xf]  ;;  %v7571_v9 = vld [vmem:[%s8603_s8 + $0x194] sm:$0xf] }
 0x243   : > { %v7575_v8 = vld [vmem:[%s8603_s8 + $0x1ac] sm:$0xf0] }
 0x246   : > { %2801 = vmatpush.bf16.msrb.mxu2 %v5830_v13  ;;  %v5703_v13 = vld [vmem:[%s8603_s8 + $0x68] sm:$0xf0] }
 0x247   : > { %v1509_v20 = vpop.permute.xlu2 %1508  ;;  %v1527_v49 = vld [vmem:[#allocation2 + $0x8] sm:$0xff] }
 0x248   : > { %v1529_v23 = vld [vmem:[#allocation2 + $0x18] sm:$0xff]  ;;  %1513 = vst.msk [vmem:[#allocation2 + $0x20] sm:$0xff] %vm1499_vm1, %v1509_v20  ;;  %v1539_v63 = vmul.f32 %v1533_v38, %v1527_v49  ;;  %v7562_v20 = vld [vmem:[%s8603_s8 + $0x14c] sm:$0xf] }
 0x249   : > { %v1541_v29 = vmul.f32 %v1535_v18, %v1529_v23  ;;  %v7674_v18 = vld [vmem:[%s8603_s8 + $0x4cc] sm:$0xf]  ;;  %v6278_v23 = vor.u32 %v7678_v40, %v6277_v17  ;;  %v5834_v31 = vor.u32 %v7562_v20, %v5831_v42  ;;  %v5733_v49 = vld [vmem:[%s8603_s8 + $0x88] sm:$0xf]  ;;  %v5870_v17 = vor.u32 %v7575_v8, %v5869_v28  ;;  %v7563_v20 = vld [vmem:[%s8603_s8 + $0x154] sm:$0xf] }
 0x24a   : > { %v6282_v24 = vor.u32 %v7674_v18, %v6279_v19  ;;  %2802 = vmatpush.bf16.msrb.mxu2 %v5798_v32  ;;  %v5734_v60 = vor.u32 %v7542_v50, %v5733_v49  ;;  %v5874_v40 = vor.u32 %v7571_v9, %v5871_v10  ;;  %v5837_v18 = vld [vmem:[%s8603_s8 + $0x150] sm:$0xf]  ;;  %v5839_v42 = vld [vmem:[%s8603_s8 + $0x170] sm:$0xf0] }
 0x24b   : > { %v8942_v37 = vpack.c.bf16 %v1541_v29, %v1538_v27  ;;  %v7666_v27 = vld [vmem:[%s8603_s8 + $0x48c] sm:$0xf]  ;;  %v7567_v19 = vld [vmem:[%s8603_s8 + $0x16c] sm:$0xf0]  ;;  %v5842_v26 = vor.u32 %v7563_v20, %v5839_v42  ;;  %v5807_v32 = vld [vmem:[%s8603_s8 + $0x130] sm:$0xf0] }
 0x24c   : > { %v6247_v29 = vld [vmem:[%s8603_s8 + $0x4a8] sm:$0xf0]  ;;  %v5838_v25 = vor.u32 %v7567_v19, %v5837_v18  ;;  %v7647_v28 = vld [vmem:[%s8603_s8 + $0x3ec] sm:$0xf0]  ;;  %v7643_v8 = vld [vmem:[%s8603_s8 + $0x3d4] sm:$0xf] }
 0x24d   : > { %2723 = vmatmul.bf16.vlgmr.msra.gmra.mxu0 %v8942_v37  ;;  %2765 = vmatmul.bf16.vlgmr.msra.gmra.mxu3 %v8942_v37  ;;  %v6250_v38 = vor.u32 %v7666_v27, %v6247_v29  ;;  %v5805_v27 = vld [vmem:[%s8603_s8 + $0x110] sm:$0xf] }
 0x24e   : > { %2827 = vmatpush.bf16.msra.mxu0 %v6406_v15  ;;  %2869 = vmatpush.bf16.msra.mxu3 %v6410_v33  ;;  %v7554_v15 = vld [vmem:[%s8603_s8 + $0x10c] sm:$0xf]  ;;  %v7559_v29 = vld [vmem:[%s8603_s8 + $0x12c] sm:$0xf0] }
 0x24f   : > { %v1530_v59 = vld [vmem:[#allocation2 + $0x20] sm:$0xff]  ;;  %2803 = vmatpush.bf16.msrb.mxu2 %v5766_v46 }
 0x250   : > { %v1542_v0 = vmul.f32 %v1536_v45, %v1530_v59  ;;  %v5799_v33 = vld [vmem:[%s8603_s8 + $0x128] sm:$0xf0]  ;;  %v5770_v59 = vor.u32 %v7546_v47, %v5767_v48  ;;  %v7543_v46 = vld [vmem:[%s8603_s8 + $0xac] sm:$0xf0]  ;;  %v7539_v47 = vld [vmem:[%s8603_s8 + $0x94] sm:$0xf] }
 0x251   : > { %v5802_v45 = vor.u32 %v7554_v15, %v5799_v33  ;;  %v5806_v33 = vor.u32 %v7559_v29, %v5805_v27  ;;  %v5743_v48 = vld [vmem:[%s8603_s8 + $0xb0] sm:$0xf0]  ;;  %v6125_v20 = vld [vmem:[%s8603_s8 + $0x390] sm:$0xf]  ;;  %v7626_v27 = vld [vmem:[%s8603_s8 + $0x34c] sm:$0xf] }
 0x252   : > { %v8963_v5 = vpack.c.bf16 %v1542_v0, %v1539_v63  ;;  %2828 = vmatpush.bf16.msra.mxu0 %v6374_v54  ;;  %2870 = vmatpush.bf16.msra.mxu3 %v6378_v55  ;;  %v7654_v54 = vld [vmem:[%s8603_s8 + $0x424] sm:$0xf0]  ;;  %v7650_v55 = vld [vmem:[%s8603_s8 + $0x40c] sm:$0xf]  ;;  %v5746_v50 = vor.u32 %v7539_v47, %v5743_v48  ;;  %v7639_v42 = vld [vmem:[%s8603_s8 + $0x3ac] sm:$0xf0] }
 0x253   : > { %v7538_v63 = vld [vmem:[%s8603_s8 + $0x8c] sm:$0xf]  ;;  %v6182_v3 = vor.u32 %v7654_v54, %v6181_v53  ;;  %v6186_v4 = vor.u32 %v7650_v55, %v6183_v56  ;;  %2804 = vmatpush.bf16.msrb.mxu2 %v5734_v60  ;;  %v7531_v53 = vld [vmem:[%s8603_s8 + $0x54] sm:$0xf]  ;;  %v6061_v47 = vld [vmem:[%s8603_s8 + $0x310] sm:$0xf] }
 0x254   : > { %2737 = vmatmul.bf16.vlgmr.msra.gmra.mxu1 %v8963_v5  ;;  %v5735_v0 = vld [vmem:[%s8603_s8 + $0xa8] sm:$0xf0]  ;;  %v5711_v54 = vld [vmem:[%s8603_s8 + $0x70] sm:$0xf0]  ;;  %v7623_v48 = vld [vmem:[%s8603_s8 + $0x32c] sm:$0xf0] }
 0x255   : > { %2841 = vmatpush.bf16.msra.mxu1 %v5898_v2  ;;  %v7534_v2 = vld [vmem:[%s8603_s8 + $0x64] sm:$0xf0]  ;;  %v5738_v30 = vor.u32 %v7538_v63, %v5735_v0  ;;  %v7523_v60 = vld [vmem:[%s8603_s8 + $0x14] sm:$0xf]  ;;  %v6087_v29 = vld [vmem:[%s8603_s8 + $0x368] sm:$0xf0] }
 0x256   : > { %2829 = vmatpush.bf16.msra.mxu0 %v6342_v6  ;;  %2871 = vmatpush.bf16.msra.mxu3 %v6346_v7  ;;  %v5902_v6 = vor.u32 %v7583_v58, %v5901_v57  ;;  %v5906_v7 = vor.u32 %v7579_v61, %v5903_v62  ;;  %v5702_v11 = vor.u32 %v7534_v2, %v5701_v1  ;;  %v5677_v58 = vld [vmem:[%s8603_s8 + $0x10] sm:$0xf]  ;;  %v5679_v61 = vld [vmem:[%s8603_s8 + $0x30] sm:$0xf0] }
 0x257   : > { %v5714_v57 = vor.u32 %v7531_v53, %v5711_v54  ;;  %v5682_v63 = vor.u32 %v7523_v60, %v5679_v61  ;;  %v1534_v1 = vld [vmem:[%s8592_s18 + $0x10] sm:$0xff]  ;;  %v1537_v2 = vld [vmem:[%s8592_s18 + $0x28] sm:$0xff]  ;;  %v6062_v54 = vor.u32 %v7623_v48, %v6061_v47 }
 0x258   : > { %2805 = vmatpush.bf16.msrb.mxu2 %v5702_v11  ;;  %v6165_v11 = vld [vmem:[%s8603_s8 + $0x3d8] sm:$0xf]  ;;  %v7615_v60 = vld [vmem:[%s8603_s8 + $0x2ec] sm:$0xf0]  ;;  %v7611_v61 = vld [vmem:[%s8603_s8 + $0x2d4] sm:$0xf] }
 0x259   : > { %2842 = vmatpush.bf16.msra.mxu1 %v5866_v12  ;;  %v7530_v12 = vld [vmem:[%s8603_s8 + $0x4c] sm:$0xf] }
 0x25a   : > { %2830 = vmatpush.bf16.msra.mxu0 %v6310_v14  ;;  %2872 = vmatpush.bf16.msra.mxu3 %v6314_v16  ;;  %v5669_v14 = vld [vmem:[%s8603_s8 + $0x8] sm:$0xf]  ;;  %v5706_v21 = vor.u32 %v7530_v12, %v5703_v13  ;;  %v7648_v12 = vld [vmem:[%s8603_s8 + $0x3f4] sm:$0xf0] }
 0x25b   : > { %v7526_v16 = vld [vmem:[%s8603_s8 + $0x24] sm:$0xf0]  ;;  %v6166_v19 = vor.u32 %v7648_v12, %v6165_v11  ;;  %v7608_v11 = vld [vmem:[%s8603_s8 + $0x2b4] sm:$0xf0] }
 0x25c   : > { %v5670_v22 = vor.u32 %v7526_v16, %v5669_v14 }
 0x25d   : > { %2779 = vmatmul.bf16.vlgmr.msrb.gmra.mxu0 %v8963_v5  ;;  %2821 = vmatmul.bf16.vlgmr.msrb.gmra.mxu3 %v8963_v5 }
 0x25e   : > { %2831 = vmatpush.bf16.msra.mxu0 %v6278_v23  ;;  %2873 = vmatpush.bf16.msra.mxu3 %v6282_v24  ;;  %v7522_v23 = vld [vmem:[%s8603_s8 + $0xc] sm:$0xf] }
 0x25f   : > { %2843 = vmatpush.bf16.msra.mxu1 %v5834_v31  ;;  %v5671_v24 = vld [vmem:[%s8603_s8 + $0x28] sm:$0xf0]  ;;  %v7555_v31 = vld [vmem:[%s8603_s8 + $0x114] sm:$0xf]  ;;  %2806 = vmatpush.bf16.msrb.mxu2 %v5670_v22 }
 0x260   : > { %v5674_v15 = vor.u32 %v7522_v23, %v5671_v24  ;;  %v5810_v34 = vor.u32 %v7555_v31, %v5807_v32  ;;  %v6127_v22 = vld [vmem:[%s8603_s8 + $0x3b0] sm:$0xf0]  ;;  %v6133_v23 = vld [vmem:[%s8603_s8 + $0x398] sm:$0xf] }
 0x261   : > { %v7640_v24 = vld [vmem:[%s8603_s8 + $0x3b4] sm:$0xf0] }
 0x262   : > { %2832 = vmatpush.bf16.msra.mxu0 %v6246_v36  ;;  %2874 = vmatpush.bf16.msra.mxu3 %v6250_v38  ;;  %v7551_v36 = vld [vmem:[%s8603_s8 + $0xec] sm:$0xf0]  ;;  %v7547_v38 = vld [vmem:[%s8603_s8 + $0xd4] sm:$0xf]  ;;  %v6134_v32 = vor.u32 %v7640_v24, %v6133_v23  ;;  %v7600_v23 = vld [vmem:[%s8603_s8 + $0x274] sm:$0xf0] }
 0x263   : > { %2844 = vmatpush.bf16.msra.mxu1 %v5802_v45  ;;  %v5774_v43 = vor.u32 %v7551_v36, %v5773_v35  ;;  %v5778_v44 = vor.u32 %v7547_v38, %v5775_v39  ;;  %v5741_v45 = vld [vmem:[%s8603_s8 + $0x90] sm:$0xf]  ;;  %v6095_v35 = vld [vmem:[%s8603_s8 + $0x370] sm:$0xf0]  ;;  %v6101_v36 = vld [vmem:[%s8603_s8 + $0x358] sm:$0xf]  ;;  %v6090_v39 = vor.u32 %v7626_v27, %v6087_v29 }
 0x264   : > { %v5742_v49 = vor.u32 %v7543_v46, %v5741_v45  ;;  %v7632_v38 = vld [vmem:[%s8603_s8 + $0x374] sm:$0xf0]  ;;  %v5933_v29 = vld [vmem:[%s8603_s8 + $0x210] sm:$0xf] }
 0x265   : > { %v6102_v46 = vor.u32 %v7632_v38, %v6101_v36  ;;  %v7711_v36 = vld [vmem:[%s8603_s8 + $0x5ec] sm:$0xf0]  ;;  %v5941_v38 = vld [vmem:[%s8603_s8 + $0x218] sm:$0xf] }
 0x266   : > { %2833 = vmatpush.bf16.msra.mxu0 %v6214_v51  ;;  %2875 = vmatpush.bf16.msra.mxu3 %v6218_v52  ;;  %v5709_v51 = vld [vmem:[%s8603_s8 + $0x50] sm:$0xf] }
 0x267   : > { %2845 = vmatpush.bf16.msra.mxu1 %v5770_v59  ;;  %v7535_v52 = vld [vmem:[%s8603_s8 + $0x6c] sm:$0xf0] }
 0x268   : > { %v5710_v56 = vor.u32 %v7535_v52, %v5709_v51  ;;  %v7527_v59 = vld [vmem:[%s8603_s8 + $0x2c] sm:$0xf0]  ;;  %v6069_v51 = vld [vmem:[%s8603_s8 + $0x318] sm:$0xf] }
 0x269   : > { %v5678_v62 = vor.u32 %v7527_v59, %v5677_v58  ;;  %v7624_v52 = vld [vmem:[%s8603_s8 + $0x334] sm:$0xf0]  ;;  %v6029_v59 = vld [vmem:[%s8603_s8 + $0x2d0] sm:$0xf] }
 0x26a   : > { %2834 = vmatpush.bf16.msra.mxu0 %v6182_v3  ;;  %2876 = vmatpush.bf16.msra.mxu3 %v6186_v4  ;;  %v7642_v3 = vld [vmem:[%s8603_s8 + $0x3cc] sm:$0xf]  ;;  %v6070_v58 = vor.u32 %v7624_v52, %v6069_v51 }
 0x26b   : > { %2846 = vmatpush.bf16.msra.mxu1 %v5738_v30  ;;  %v6151_v4 = vld [vmem:[%s8603_s8 + $0x3e8] sm:$0xf0]  ;;  %v6159_v30 = vld [vmem:[%s8603_s8 + $0x3f0] sm:$0xf0] }
 0x26c   : > { %v6154_v13 = vor.u32 %v7642_v3, %v6151_v4  ;;  %v6162_v18 = vor.u32 %v7643_v8, %v6159_v30  ;;  %v7602_v3 = vld [vmem:[%s8603_s8 + $0x28c] sm:$0xf]  ;;  %v7607_v8 = vld [vmem:[%s8603_s8 + $0x2ac] sm:$0xf0]  ;;  %v6005_v30 = vld [vmem:[%s8603_s8 + $0x298] sm:$0xf] }
 0x26d   : > { %v5991_v4 = vld [vmem:[%s8603_s8 + $0x2a8] sm:$0xf0] }
 0x26e   : > { %2883 = vmatpush.bf16.msrb.mxu0 %v5902_v6  ;;  %2925 = vmatpush.bf16.msrb.mxu3 %v5906_v7  ;;  %v6157_v6 = vld [vmem:[%s8603_s8 + $0x3d0] sm:$0xf]  ;;  %v5994_v12 = vor.u32 %v7602_v3, %v5991_v4 }
 0x26f   : > { %2847 = vmatpush.bf16.msra.mxu1 %v5706_v21  ;;  %v6158_v16 = vor.u32 %v7647_v28, %v6157_v6  ;;  %v7635_v21 = vld [vmem:[%s8603_s8 + $0x394] sm:$0xf]  ;;  %v5997_v28 = vld [vmem:[%s8603_s8 + $0x290] sm:$0xf] }
 0x270   : > { %v6130_v31 = vor.u32 %v7635_v21, %v6127_v22  ;;  %v5967_v21 = vld [vmem:[%s8603_s8 + $0x270] sm:$0xf0]  ;;  %v5973_v22 = vld [vmem:[%s8603_s8 + $0x258] sm:$0xf]  ;;  %v6349_v3 = vld [vmem:[%s8603_s8 + $0x550] sm:$0xf] }
 0x271   : > { %v7695_v4 = vld [vmem:[%s8603_s8 + $0x56c] sm:$0xf0] }
 0x272   : > { %2884 = vmatpush.bf16.msrb.mxu0 %v5870_v17  ;;  %2926 = vmatpush.bf16.msrb.mxu3 %v5874_v40  ;;  %v7634_v17 = vld [vmem:[%s8603_s8 + $0x38c] sm:$0xf] }
 0x273   : > { %2848 = vmatpush.bf16.msra.mxu1 %v5674_v15  ;;  %v6119_v40 = vld [vmem:[%s8603_s8 + $0x3a8] sm:$0xf0]  ;;  %v6093_v15 = vld [vmem:[%s8603_s8 + $0x350] sm:$0xf] }
 0x276   : > { %2885 = vmatpush.bf16.msrb.mxu0 %v5838_v25  ;;  %2927 = vmatpush.bf16.msrb.mxu3 %v5842_v26  ;;  %v6122_v25 = vor.u32 %v7634_v17, %v6119_v40  ;;  %v6126_v26 = vor.u32 %v7639_v42, %v6125_v20  ;;  %v5959_v17 = vld [vmem:[%s8603_s8 + $0x268] sm:$0xf0]  ;;  %v7599_v20 = vld [vmem:[%s8603_s8 + $0x26c] sm:$0xf0]  ;;  %v7595_v42 = vld [vmem:[%s8603_s8 + $0x254] sm:$0xf] }
 0x277   : > { %v1519_v41 = vpop.permute.xlu0 %1518 }
 0x278   : > { %1524 = vst.msk [vmem:[#allocation2 + $0x10] sm:$0xff] %vm1499_vm1, %v1519_v41 }
 0x27a   : > { %2886 = vmatpush.bf16.msrb.mxu0 %v5806_v33  ;;  %2928 = vmatpush.bf16.msrb.mxu3 %v5810_v34  ;;  %v7631_v33 = vld [vmem:[%s8603_s8 + $0x36c] sm:$0xf0]  ;;  %v7627_v34 = vld [vmem:[%s8603_s8 + $0x354] sm:$0xf] }
 0x27b   : > { %v6094_v41 = vor.u32 %v7631_v33, %v6093_v15  ;;  %v6098_v45 = vor.u32 %v7627_v34, %v6095_v35  ;;  %v5970_v15 = vor.u32 %v7595_v42, %v5967_v21  ;;  %v5974_v33 = vor.u32 %v7600_v23, %v5973_v22  ;;  %v5935_v34 = vld [vmem:[%s8603_s8 + $0x230] sm:$0xf0]  ;;  %v6413_v35 = vld [vmem:[%s8603_s8 + $0x5d0] sm:$0xf]  ;;  %v7688_v42 = vld [vmem:[%s8603_s8 + $0x534] sm:$0xf0] }
 0x27c   : > { %v6414_v48 = vor.u32 %v7711_v36, %v6413_v35  ;;  %v7684_v21 = vld [vmem:[%s8603_s8 + $0x51c] sm:$0xf] }
 0x27d   : > { %v6327_v22 = vld [vmem:[%s8603_s8 + $0x538] sm:$0xf0] }
 0x27e   : > { %2887 = vmatpush.bf16.msrb.mxu0 %v5774_v43  ;;  %2929 = vmatpush.bf16.msrb.mxu3 %v5778_v44  ;;  %v7618_v43 = vld [vmem:[%s8603_s8 + $0x30c] sm:$0xf]  ;;  %v6295_v35 = vld [vmem:[%s8603_s8 + $0x4f8] sm:$0xf0] }
 0x27f   : > { %v1521_v55 = vpop.permute.xlu0 %1520  ;;  %v1528_v0 = vld [vmem:[#allocation2 + $0x10] sm:$0xff]  ;;  %v6055_v44 = vld [vmem:[%s8603_s8 + $0x328] sm:$0xf0] }
 0x280   : > { %1525 = vst.msk [vmem:[#allocation2 + $0x28] sm:$0xff] %vm1499_vm1, %v1521_v55  ;;  %v1540_v9 = vmul.f32 %v1534_v1, %v1528_v0  ;;  %v6058_v53 = vor.u32 %v7618_v43, %v6055_v44  ;;  %v7610_v55 = vld [vmem:[%s8603_s8 + $0x2cc] sm:$0xf]  ;;  %v7616_v0 = vld [vmem:[%s8603_s8 + $0x2f4] sm:$0xf0] }
 0x281   : > { %v6415_v44 = vld [vmem:[%s8603_s8 + $0x5f0] sm:$0xf0] }
 0x282   : > { %2888 = vmatpush.bf16.msrb.mxu0 %v5742_v49  ;;  %2930 = vmatpush.bf16.msrb.mxu3 %v5746_v50  ;;  %v7619_v49 = vld [vmem:[%s8603_s8 + $0x314] sm:$0xf] }
 0x283   : > { %v6063_v50 = vld [vmem:[%s8603_s8 + $0x330] sm:$0xf0] }
 0x286   : > { %2889 = vmatpush.bf16.msrb.mxu0 %v5710_v56  ;;  %2931 = vmatpush.bf16.msrb.mxu3 %v5714_v57  ;;  %v6023_v56 = vld [vmem:[%s8603_s8 + $0x2e8] sm:$0xf0]  ;;  %v6066_v57 = vor.u32 %v7619_v49, %v6063_v50  ;;  %v7708_v49 = vld [vmem:[%s8603_s8 + $0x5dc] sm:$0xf] }
 0x287   : > { %v1531_v7 = vld [vmem:[#allocation2 + $0x28] sm:$0xff]  ;;  %v6026_v1 = vor.u32 %v7610_v55, %v6023_v56  ;;  %v6423_v50 = vld [vmem:[%s8603_s8 + $0x5f8] sm:$0xf0] }
 0x288   : > { %v1543_v10 = vmul.f32 %v1537_v2, %v1531_v7  ;;  %v6030_v2 = vor.u32 %v7615_v60, %v6029_v59  ;;  %v6381_v55 = vld [vmem:[%s8603_s8 + $0x590] sm:$0xf]  ;;  %v6383_v59 = vld [vmem:[%s8603_s8 + $0x5b0] sm:$0xf0]  ;;  %v6389_v60 = vld [vmem:[%s8603_s8 + $0x598] sm:$0xf] }
 0x289   : > { %v7703_v56 = vld [vmem:[%s8603_s8 + $0x5ac] sm:$0xf0] }
 0x28a   : > { %2890 = vmatpush.bf16.msrb.mxu0 %v5678_v62  ;;  %2932 = vmatpush.bf16.msrb.mxu3 %v5682_v63  ;;  %v9056_v14 = vpack.c.bf16 %v1543_v10, %v1540_v9  ;;  %v6031_v62 = vld [vmem:[%s8603_s8 + $0x2f0] sm:$0xf0]  ;;  %v6037_v63 = vld [vmem:[%s8603_s8 + $0x2d8] sm:$0xf] }
 0x28b   : > { %v6034_v6 = vor.u32 %v7611_v61, %v6031_v62  ;;  %v6038_v7 = vor.u32 %v7616_v0, %v6037_v63  ;;  %v7603_v9 = vld [vmem:[%s8603_s8 + $0x294] sm:$0xf]  ;;  %v7704_v61 = vld [vmem:[%s8603_s8 + $0x5b4] sm:$0xf0]  ;;  %v7700_v62 = vld [vmem:[%s8603_s8 + $0x59c] sm:$0xf]  ;;  %v6382_v0 = vor.u32 %v7703_v56, %v6381_v55 }
 0x28c   : > { %2751 = vmatmul.bf16.vlgmr.msra.gmra.mxu2 %v9056_v14  ;;  %2793 = vmatmul.bf16.vlgmr.msrb.gmra.mxu1 %v9056_v14  ;;  %v5999_v10 = vld [vmem:[%s8603_s8 + $0x2b0] sm:$0xf0]  ;;  %v6391_v63 = vld [vmem:[%s8603_s8 + $0x5b8] sm:$0xf0]  ;;  %v7663_v55 = vld [vmem:[%s8603_s8 + $0x46c] sm:$0xf0] }
 0x28d   : > { %2835 = vmatmul.bf16.vlgmr.msra.gmra.mxu0 %v9056_v14  ;;  %2855 = vmatpush.bf16.msra.mxu2 %v6154_v13  ;;  %v5998_v13 = vor.u32 %v7607_v8, %v5997_v28  ;;  %v6002_v40 = vor.u32 %v7603_v9, %v5999_v10  ;;  %v6351_v28 = vld [vmem:[%s8603_s8 + $0x570] sm:$0xf0]  ;;  %v6357_v8 = vld [vmem:[%s8603_s8 + $0x558] sm:$0xf]  ;;  %v7692_v10 = vld [vmem:[%s8603_s8 + $0x55c] sm:$0xf] }
 0x28e   : > { %2877 = vmatmul.bf16.vlgmr.msra.gmra.mxu3 %v9056_v14  ;;  %2897 = vmatpush.bf16.msrb.mxu1 %v6158_v16  ;;  %v7594_v16 = vld [vmem:[%s8603_s8 + $0x24c] sm:$0xf]  ;;  %v7696_v9 = vld [vmem:[%s8603_s8 + $0x574] sm:$0xf0]  ;;  %v7659_v56 = vld [vmem:[%s8603_s8 + $0x454] sm:$0xf] }
 0x28f   : > { %2939 = vmatpush.bf16.msra.mxu0 %v6162_v18  ;;  %2981 = vmatpush.bf16.msra.mxu3 %v6166_v19  ;;  %v6006_v18 = vor.u32 %v7608_v11, %v6005_v30  ;;  %v5965_v19 = vld [vmem:[%s8603_s8 + $0x250] sm:$0xf]  ;;  %v5962_v24 = vor.u32 %v7594_v16, %v5959_v17  ;;  %v6359_v30 = vld [vmem:[%s8603_s8 + $0x578] sm:$0xf0]  ;;  %v6350_v11 = vor.u32 %v7695_v4, %v6349_v3  ;;  %v7651_v4 = vld [vmem:[%s8603_s8 + $0x414] sm:$0xf] }
 0x290   : > { %v5966_v27 = vor.u32 %v7599_v20, %v5965_v19  ;;  %v6317_v16 = vld [vmem:[%s8603_s8 + $0x510] sm:$0xf]  ;;  %v6319_v19 = vld [vmem:[%s8603_s8 + $0x530] sm:$0xf0]  ;;  %v6325_v20 = vld [vmem:[%s8603_s8 + $0x518] sm:$0xf] }
 0x291   : > { %2856 = vmatpush.bf16.msra.mxu2 %v6122_v25  ;;  %v7586_v25 = vld [vmem:[%s8603_s8 + $0x20c] sm:$0xf]  ;;  %v7687_v17 = vld [vmem:[%s8603_s8 + $0x52c] sm:$0xf0] }
 0x292   : > { %2898 = vmatpush.bf16.msrb.mxu1 %v6126_v26  ;;  %v5927_v26 = vld [vmem:[%s8603_s8 + $0x228] sm:$0xf0]  ;;  %v6318_v23 = vor.u32 %v7687_v17, %v6317_v16  ;;  %v7655_v3 = vld [vmem:[%s8603_s8 + $0x42c] sm:$0xf0]  ;;  %v5911_v16 = vld [vmem:[%s8603_s8 + $0x1f8] sm:$0xf0] }
 0x293   : > { %2940 = vmatpush.bf16.msra.mxu0 %v6130_v31  ;;  %2982 = vmatpush.bf16.msra.mxu3 %v6134_v32  ;;  %v7591_v31 = vld [vmem:[%s8603_s8 + $0x22c] sm:$0xf0]  ;;  %v7587_v32 = vld [vmem:[%s8603_s8 + $0x214] sm:$0xf]  ;;  %v5930_v43 = vor.u32 %v7586_v25, %v5927_v26  ;;  %v6326_v25 = vor.u32 %v7688_v42, %v6325_v20  ;;  %v5877_v42 = vld [vmem:[%s8603_s8 + $0x198] sm:$0xf] }
 0x294   : > { %v5934_v47 = vor.u32 %v7591_v31, %v5933_v29  ;;  %v5938_v51 = vor.u32 %v7587_v32, %v5935_v34  ;;  %v6285_v26 = vld [vmem:[%s8603_s8 + $0x4d0] sm:$0xf]  ;;  %v7675_v29 = vld [vmem:[%s8603_s8 + $0x4d4] sm:$0xf]  ;;  %v6330_v31 = vor.u32 %v7684_v21, %v6327_v22  ;;  %v7676_v34 = vld [vmem:[%s8603_s8 + $0x4dc] sm:$0xf] }
 0x295   : > { %2857 = vmatpush.bf16.msra.mxu2 %v6090_v39  ;;  %v7592_v39 = vld [vmem:[%s8603_s8 + $0x234] sm:$0xf0]  ;;  %v6287_v32 = vld [vmem:[%s8603_s8 + $0x4f0] sm:$0xf0]  ;;  %v7572_v22 = vld [vmem:[%s8603_s8 + $0x19c] sm:$0xf] }
 0x296   : > { %2899 = vmatpush.bf16.msrb.mxu1 %v6094_v41  ;;  %v7707_v41 = vld [vmem:[%s8603_s8 + $0x5d4] sm:$0xf]  ;;  %v5942_v52 = vor.u32 %v7592_v39, %v5941_v38  ;;  %v6290_v38 = vor.u32 %v7675_v29, %v6287_v32  ;;  %v7576_v21 = vld [vmem:[%s8603_s8 + $0x1b4] sm:$0xf0]  ;;  %v7564_v29 = vld [vmem:[%s8603_s8 + $0x15c] sm:$0xf] }
 0x297   : > { %2941 = vmatpush.bf16.msra.mxu0 %v6098_v45  ;;  %2983 = vmatpush.bf16.msra.mxu3 %v6102_v46  ;;  %v6421_v45 = vld [vmem:[%s8603_s8 + $0x5d8] sm:$0xf] }
 0x298   : > { %v7712_v46 = vld [vmem:[%s8603_s8 + $0x5f4] sm:$0xf0] }
 0x299   : > { %2858 = vmatpush.bf16.msra.mxu2 %v6058_v53  ;;  %v6418_v53 = vor.u32 %v7707_v41, %v6415_v44  ;;  %v6253_v41 = vld [vmem:[%s8603_s8 + $0x490] sm:$0xf]  ;;  %v7667_v44 = vld [vmem:[%s8603_s8 + $0x494] sm:$0xf] }
 0x29a   : > { %2900 = vmatpush.bf16.msrb.mxu1 %v6062_v54  ;;  %v6422_v54 = vor.u32 %v7712_v46, %v6421_v45  ;;  %v6298_v45 = vor.u32 %v7676_v34, %v6295_v35  ;;  %v6255_v46 = vld [vmem:[%s8603_s8 + $0x4b0] sm:$0xf0]  ;;  %v7560_v34 = vld [vmem:[%s8603_s8 + $0x134] sm:$0xf0]  ;;  %v7556_v35 = vld [vmem:[%s8603_s8 + $0x11c] sm:$0xf] }
 0x29b   : > { %2942 = vmatpush.bf16.msra.mxu0 %v6066_v57  ;;  %2984 = vmatpush.bf16.msra.mxu3 %v6070_v58  ;;  %v7699_v57 = vld [vmem:[%s8603_s8 + $0x594] sm:$0xf]  ;;  %v6426_v58 = vor.u32 %v7708_v49, %v6423_v50  ;;  %v7668_v49 = vld [vmem:[%s8603_s8 + $0x49c] sm:$0xf] }
 0x29c   : > { %2807 = vmatmul.bf16.vlgmr.msrb.gmra.mxu2 %v8942_v37  ;;  %2849 = vmatmul.bf16.vlgmr.msra.gmra.mxu1 %v8942_v37  ;;  %v6263_v50 = vld [vmem:[%s8603_s8 + $0x4b8] sm:$0xf0] }
 0x29d   : > { %2859 = vmatpush.bf16.msra.mxu2 %v6026_v1  ;;  %2891 = vmatmul.bf16.vlgmr.msrb.gmra.mxu0 %v8942_v37  ;;  %v6386_v1 = vor.u32 %v7699_v57, %v6383_v59  ;;  %v6266_v57 = vor.u32 %v7668_v49, %v6263_v50  ;;  %v6229_v59 = vld [vmem:[%s8603_s8 + $0x458] sm:$0xf]  ;;  %v7540_v49 = vld [vmem:[%s8603_s8 + $0x9c] sm:$0xf] }
 0x29e   : > { %2901 = vmatpush.bf16.msrb.mxu1 %v6030_v2  ;;  %2933 = vmatmul.bf16.vlgmr.msrb.gmra.mxu3 %v8942_v37  ;;  %v6390_v2 = vor.u32 %v7704_v61, %v6389_v60  ;;  %v7664_v60 = vld [vmem:[%s8603_s8 + $0x474] sm:$0xf0]  ;;  %v7660_v61 = vld [vmem:[%s8603_s8 + $0x45c] sm:$0xf] }
 0x29f   : > { %2943 = vmatpush.bf16.msra.mxu0 %v6034_v6  ;;  %2985 = vmatpush.bf16.msra.mxu3 %v6038_v7  ;;  %v7691_v6 = vld [vmem:[%s8603_s8 + $0x554] sm:$0xf]  ;;  %v6394_v7 = vor.u32 %v7700_v62, %v6391_v63  ;;  %v6231_v62 = vld [vmem:[%s8603_s8 + $0x478] sm:$0xf0] }
 0x2a0   : > { %v5751_v50 = vld [vmem:[%s8603_s8 + $0xb8] sm:$0xf0] }
 0x2a1   : > { %2860 = vmatpush.bf16.msra.mxu2 %v5994_v12  ;;  %v6354_v12 = vor.u32 %v7691_v6, %v6351_v28  ;;  %v6191_v6 = vld [vmem:[%s8603_s8 + $0x430] sm:$0xf0]  ;;  %v6197_v28 = vld [vmem:[%s8603_s8 + $0x418] sm:$0xf] }
 0x2a2   : > { %2902 = vmatpush.bf16.msrb.mxu1 %v5998_v13  ;;  %v6358_v13 = vor.u32 %v7696_v9, %v6357_v8  ;;  %v7656_v8 = vld [vmem:[%s8603_s8 + $0x434] sm:$0xf0]  ;;  %v7652_v9 = vld [vmem:[%s8603_s8 + $0x41c] sm:$0xf]  ;;  %v6194_v17 = vor.u32 %v7651_v4, %v6191_v6 }
 0x2a3   : > { %2944 = vmatpush.bf16.msra.mxu0 %v6002_v40  ;;  %2986 = vmatpush.bf16.msra.mxu3 %v6006_v18  ;;  %v7683_v40 = vld [vmem:[%s8603_s8 + $0x514] sm:$0xf]  ;;  %v6362_v18 = vor.u32 %v7692_v10, %v6359_v30  ;;  %v6199_v10 = vld [vmem:[%s8603_s8 + $0x438] sm:$0xf0]  ;;  %v5909_v30 = vld [vmem:[%s8603_s8 + $0x1d8] sm:$0xf] }
 0x2a4   : > { %v7636_v4 = vld [vmem:[%s8603_s8 + $0x39c] sm:$0xf] }
 0x2a5   : > { %2861 = vmatpush.bf16.msra.mxu2 %v5962_v24  ;;  %v6322_v24 = vor.u32 %v7683_v40, %v6319_v19  ;;  %v6198_v40 = vor.u32 %v7656_v8, %v6197_v28  ;;  %v6135_v6 = vld [vmem:[%s8603_s8 + $0x3b8] sm:$0xf0] }
 0x2a6   : > { %2903 = vmatpush.bf16.msrb.mxu1 %v5966_v27  ;;  %v7679_v27 = vld [vmem:[%s8603_s8 + $0x4ec] sm:$0xf0]  ;;  %v7628_v28 = vld [vmem:[%s8603_s8 + $0x35c] sm:$0xf] }
 0x2a7   : > { %2945 = vmatpush.bf16.msra.mxu0 %v5970_v15  ;;  %2987 = vmatpush.bf16.msra.mxu3 %v5974_v33  ;;  %v6293_v15 = vld [vmem:[%s8603_s8 + $0x4d8] sm:$0xf]  ;;  %v6286_v36 = vor.u32 %v7679_v27, %v6285_v26  ;;  %v6103_v8 = vld [vmem:[%s8603_s8 + $0x378] sm:$0xf0] }
 0x2a8   : > { %v7680_v33 = vld [vmem:[%s8603_s8 + $0x4f4] sm:$0xf0] }
 0x2a9   : > { %2862 = vmatpush.bf16.msra.mxu2 %v5930_v43  ;;  %v6294_v39 = vor.u32 %v7680_v33, %v6293_v15  ;;  %v7671_v43 = vld [vmem:[%s8603_s8 + $0x4ac] sm:$0xf0]  ;;  %v5845_v26 = vld [vmem:[%s8603_s8 + $0x158] sm:$0xf] }
 0x2aa   : > { %2904 = vmatpush.bf16.msrb.mxu1 %v5934_v47  ;;  %v6261_v47 = vld [vmem:[%s8603_s8 + $0x498] sm:$0xf] }
 0x2ab   : > { %2946 = vmatpush.bf16.msra.mxu0 %v5938_v51  ;;  %2988 = vmatpush.bf16.msra.mxu3 %v5942_v52  ;;  %v6254_v51 = vor.u32 %v7671_v43, %v6253_v41  ;;  %v6258_v52 = vor.u32 %v7667_v44, %v6255_v46  ;;  %v7568_v27 = vld [vmem:[%s8603_s8 + $0x174] sm:$0xf0]  ;;  %v7548_v43 = vld [vmem:[%s8603_s8 + $0xdc] sm:$0xf] }
 0x2ac   : > { %2863 = vmatmul.bf16.vlgmr.msra.gmra.mxu2 %v8963_v5  ;;  %v5846_v32 = vor.u32 %v7568_v27, %v5845_v26  ;;  %v5813_v33 = vld [vmem:[%s8603_s8 + $0x118] sm:$0xf]  ;;  %v5783_v44 = vld [vmem:[%s8603_s8 + $0xf8] sm:$0xf0] }
 0x2ad   : > { %2911 = vmatpush.bf16.msrb.mxu2 %v6414_v48  ;;  %2905 = vmatmul.bf16.vlgmr.msrb.gmra.mxu1 %v8963_v5  ;;  %v7672_v48 = vld [vmem:[%s8603_s8 + $0x4b4] sm:$0xf0]  ;;  %v5786_v46 = vor.u32 %v7548_v43, %v5783_v44 }
 0x2ae   : > { %2953 = vmatpush.bf16.msra.mxu1 %v6418_v53  ;;  %2947 = vmatmul.bf16.vlgmr.msra.gmra.mxu0 %v8963_v5  ;;  %v6262_v53 = vor.u32 %v7672_v48, %v6261_v47  ;;  %v5781_v41 = vld [vmem:[%s8603_s8 + $0xd8] sm:$0xf] }
 0x2af   : > { %2995 = vmatpush.bf16.msrb.mxu0 %v6422_v54  ;;  %3037 = vmatpush.bf16.msrb.mxu3 %v6426_v58  ;;  %v6221_v54 = vld [vmem:[%s8603_s8 + $0x450] sm:$0xf]  ;;  %v6223_v58 = vld [vmem:[%s8603_s8 + $0x470] sm:$0xf0]  ;;  %v5749_v47 = vld [vmem:[%s8603_s8 + $0x98] sm:$0xf] }
 0x2b0   : > { %2989 = vmatmul.bf16.vlgmr.msra.gmra.mxu3 %v8963_v5  ;;  %v6222_v63 = vor.u32 %v7663_v55, %v6221_v54  ;;  %v7544_v48 = vld [vmem:[%s8603_s8 + $0xb4] sm:$0xf0]  ;;  %v7532_v55 = vld [vmem:[%s8603_s8 + $0x5c] sm:$0xf] }
 0x2b1   : > { %2912 = vmatpush.bf16.msrb.mxu2 %v6382_v0  ;;  %v6189_v0 = vld [vmem:[%s8603_s8 + $0x410] sm:$0xf]  ;;  %v7536_v54 = vld [vmem:[%s8603_s8 + $0x74] sm:$0xf0] }
 0x2b2   : > { %2954 = vmatpush.bf16.msra.mxu1 %v6386_v1  ;;  %v6226_v1 = vor.u32 %v7659_v56, %v6223_v58  ;;  %v5719_v56 = vld [vmem:[%s8603_s8 + $0x78] sm:$0xf0] }
 0x2b3   : > { %2996 = vmatpush.bf16.msrb.mxu0 %v6390_v2  ;;  %3038 = vmatpush.bf16.msrb.mxu3 %v6394_v7  ;;  %v6230_v2 = vor.u32 %v7664_v60, %v6229_v59  ;;  %v6234_v7 = vor.u32 %v7660_v61, %v6231_v62  ;;  %v5722_v58 = vor.u32 %v7532_v55, %v5719_v56  ;;  %v5685_v59 = vld [vmem:[%s8603_s8 + $0x18] sm:$0xf]  ;;  %v7524_v61 = vld [vmem:[%s8603_s8 + $0x1c] sm:$0xf] }
 0x2b4   : > { %v7528_v60 = vld [vmem:[%s8603_s8 + $0x34] sm:$0xf0]  ;;  %v5687_v62 = vld [vmem:[%s8603_s8 + $0x38] sm:$0xf0] }
 0x2b5   : > { %2913 = vmatpush.bf16.msrb.mxu2 %v6350_v11  ;;  %v7584_v11 = vld [vmem:[%s8603_s8 + $0x1f4] sm:$0xf0] }
 0x2b6   : > { %2955 = vmatpush.bf16.msra.mxu1 %v6354_v12  ;;  %v6190_v12 = vor.u32 %v7655_v3, %v6189_v0  ;;  %v5910_v19 = vor.u32 %v7584_v11, %v5909_v30  ;;  %v6167_v0 = vld [vmem:[%s8603_s8 + $0x3f8] sm:$0xf0] }
 0x2b7   : > { %2997 = vmatpush.bf16.msrb.mxu0 %v6358_v13  ;;  %3039 = vmatpush.bf16.msrb.mxu3 %v6362_v18  ;;  %v7580_v13 = vld [vmem:[%s8603_s8 + $0x1dc] sm:$0xf]  ;;  %v6202_v18 = vor.u32 %v7652_v9, %v6199_v10  ;;  %v6106_v9 = vor.u32 %v7628_v28, %v6103_v8 }
 0x2b8   : > { %v5914_v20 = vor.u32 %v7580_v13, %v5911_v16  ;;  %v7620_v10 = vld [vmem:[%s8603_s8 + $0x31c] sm:$0xf] }
 0x2b9   : > { %2914 = vmatpush.bf16.msrb.mxu2 %v6318_v23  ;;  %v5879_v23 = vld [vmem:[%s8603_s8 + $0x1b8] sm:$0xf0] }
 0x2ba   : > { %2956 = vmatpush.bf16.msra.mxu1 %v6322_v24  ;;  %v5878_v24 = vor.u32 %v7576_v21, %v5877_v42  ;;  %v6071_v30 = vld [vmem:[%s8603_s8 + $0x338] sm:$0xf0] }
 0x2bb   : > { %2998 = vmatpush.bf16.msrb.mxu0 %v6326_v25  ;;  %3040 = vmatpush.bf16.msrb.mxu3 %v6330_v31  ;;  %v5882_v25 = vor.u32 %v7572_v22, %v5879_v23  ;;  %v5847_v31 = vld [vmem:[%s8603_s8 + $0x178] sm:$0xf0]  ;;  %v6074_v11 = vor.u32 %v7620_v10, %v6071_v30 }
 0x2bc   : > { %v5850_v15 = vor.u32 %v7564_v29, %v5847_v31  ;;  %v7612_v13 = vld [vmem:[%s8603_s8 + $0x2dc] sm:$0xf] }
 0x2bd   : > { %2915 = vmatpush.bf16.msrb.mxu2 %v6286_v36  ;;  %v5815_v36 = vld [vmem:[%s8603_s8 + $0x138] sm:$0xf0] }
 0x2be   : > { %2957 = vmatpush.bf16.msra.mxu1 %v6290_v38  ;;  %v5814_v38 = vor.u32 %v7560_v34, %v5813_v33  ;;  %v6039_v16 = vld [vmem:[%s8603_s8 + $0x2f8] sm:$0xf0] }
 0x2bf   : > { %2999 = vmatpush.bf16.msrb.mxu0 %v6294_v39  ;;  %3041 = vmatpush.bf16.msrb.mxu3 %v6298_v45  ;;  %v5818_v39 = vor.u32 %v7556_v35, %v5815_v36  ;;  %v5975_v42 = vld [vmem:[%s8603_s8 + $0x278] sm:$0xf0] }
 0x2c0   : > { %v7588_v23 = vld [vmem:[%s8603_s8 + $0x21c] sm:$0xf] }
 0x2c1   : > { %2916 = vmatpush.bf16.msrb.mxu2 %v6254_v51  ;;  %v5750_v51 = vor.u32 %v7544_v48, %v5749_v47  ;;  %v1553_v44 = vld [vmem:[#allocation3 + $0x20] sm:$0xff] }
 0x2c2   : > { %2958 = vmatpush.bf16.msra.mxu1 %v6258_v52  ;;  %v5754_v52 = vor.u32 %v7540_v49, %v5751_v50  ;;  %v1552_v49 = vld [vmem:[#allocation3 + $0x40] sm:$0xff] }
 0x2c3   : > { %3000 = vmatpush.bf16.msrb.mxu0 %v6262_v53  ;;  %3042 = vmatpush.bf16.msrb.mxu3 %v6266_v57  ;;  %v5717_v53 = vld [vmem:[%s8603_s8 + $0x58] sm:$0xf] }
 0x2c4   : > { %v5718_v57 = vor.u32 %v7536_v54, %v5717_v53 }
 0x2c5   : > { %2917 = vmatpush.bf16.msrb.mxu2 %v6222_v63  ;;  %v7644_v63 = vld [vmem:[%s8603_s8 + $0x3dc] sm:$0xf] }
 0x2c6   : > { %2959 = vmatpush.bf16.msra.mxu1 %v6226_v1  ;;  %v5686_v1 = vor.u32 %v7528_v60, %v5685_v59  ;;  %v6170_v3 = vor.u32 %v7644_v63, %v6167_v0 }
 0x2c7   : > { %3001 = vmatpush.bf16.msrb.mxu0 %v6230_v2  ;;  %3043 = vmatpush.bf16.msrb.mxu3 %v6234_v7  ;;  %v5690_v2 = vor.u32 %v7524_v61, %v5687_v62  ;;  %v6138_v7 = vor.u32 %v7636_v4, %v6135_v6 }
 0x2c9   : > { %2918 = vmatpush.bf16.msrb.mxu2 %v6190_v12 }
 0x2ca   : > { %2960 = vmatpush.bf16.msra.mxu1 %v6194_v17  ;;  %v2724_v12 = vpop.f32.mrf.mxu0  ;;  %v6042_v17 = vor.u32 %v7612_v13, %v6039_v16 }
 0x2cb   : > { %3002 = vmatpush.bf16.msrb.mxu0 %v6198_v40  ;;  %3044 = vmatpush.bf16.msrb.mxu3 %v6202_v18  ;;  %v7604_v40 = vld [vmem:[%s8603_s8 + $0x29c] sm:$0xf] }
 0x2cc   : > { %2919 = vmatmul.bf16.vlgmr.msrb.gmra.mxu2 %v9056_v14  ;;  %v6007_v18 = vld [vmem:[%s8603_s8 + $0x2b8] sm:$0xf0] }
 0x2cd   : > { %2967 = vmatpush.bf16.msra.mxu2 %v5910_v19  ;;  %2961 = vmatmul.bf16.vlgmr.msra.gmra.mxu1 %v9056_v14  ;;  %v6010_v19 = vor.u32 %v7604_v40, %v6007_v18  ;;  %v1555_v40 = vld [vmem:[#allocation3 + $0x38] sm:$0xff] }
 0x2ce   : > { %3009 = vmatpush.bf16.msrb.mxu1 %v5914_v20  ;;  %3003 = vmatmul.bf16.vlgmr.msrb.gmra.mxu0 %v9056_v14  ;;  %v7596_v20 = vld [vmem:[%s8603_s8 + $0x25c] sm:$0xf] }
 0x2cf   : > { %3045 = vmatmul.bf16.vlgmr.msrb.gmra.mxu3 %v9056_v14  ;;  %v7552_v14 = vld [vmem:[%s8603_s8 + $0xf4] sm:$0xf0]  ;;  %v5978_v22 = vor.u32 %v7596_v20, %v5975_v42 }
 0x2d0   : > { %v5782_v45 = vor.u32 %v7552_v14, %v5781_v41  ;;  %v2766_v29 = vpop.f32.mrf.mxu3 }
 0x2d1   : > { %2968 = vmatpush.bf16.msra.mxu2 %v5878_v24  ;;  %v5943_v24 = vld [vmem:[%s8603_s8 + $0x238] sm:$0xf0]  ;;  %s9394_s8 = sld [smem:[#allocation30_spill]] (!%p6427_p5) }
 0x2d2   : > { %3010 = vmatpush.bf16.msrb.mxu1 %v5882_v25  ;;  %v2726_v21 = vpop.f32.mrf.mxu0  ;;  %v5946_v25 = vor.u32 %v7588_v23, %v5943_v24 }
 0x2d5   : > { %2969 = vmatpush.bf16.msra.mxu2 %v5846_v32  ;;  %v1545_v32 = vld [vmem:[#allocation3] sm:$0xff] }
 0x2d6   : > { %3011 = vmatpush.bf16.msrb.mxu1 %v5850_v15 }
 0x2d9   : > { %2970 = vmatpush.bf16.msra.mxu2 %v5814_v38  ;;  %v2768_v38 = vpop.f32.mrf.mxu3 }
 0x2da   : > { %3012 = vmatpush.bf16.msrb.mxu1 %v5818_v39  ;;  %v2780_v27 = vpop.f32.mrf.mxu0  ;;  %v1544_v39 = vld [vmem:[#allocation3 + $0x30] sm:$0xff] }
 0x2db   : > { %v2781_v31 = vadd.f32 %v2780_v27, %v2766_v29  ;;  %v1548_v29 = vld [vmem:[#allocation3 + $0x50] sm:$0xff] }
 0x2dd   : > { %2971 = vmatpush.bf16.msra.mxu2 %v5782_v45 }
 0x2de   : > { %3013 = vmatpush.bf16.msrb.mxu1 %v5786_v46 }
 0x2e1   : > { %2972 = vmatpush.bf16.msra.mxu2 %v5750_v51  ;;  %v2822_v54 = vpop.f32.mrf.mxu3 }
 0x2e2   : > { %3014 = vmatpush.bf16.msrb.mxu1 %v5754_v52  ;;  %v2782_v35 = vpop.f32.mrf.mxu0 }
 0x2e3   : > { %v2783_v14 = vadd.f32 %v2782_v35, %v2768_v38  ;;  %v1557_v35 = vld [vmem:[#allocation3 + $0x70] sm:$0xff] }
 0x2e5   : > { %2973 = vmatpush.bf16.msra.mxu2 %v5718_v57  ;;  %v1546_v57 = vld [vmem:[#allocation3 + $0x58] sm:$0xff] }
 0x2e6   : > { %3015 = vmatpush.bf16.msrb.mxu1 %v5722_v58 }
 0x2e9   : > { %2974 = vmatpush.bf16.msra.mxu2 %v5686_v1  ;;  %v2824_v62 = vpop.f32.mrf.mxu3  ;;  %v1554_v1 = vld [vmem:[#allocation3 + $0x10] sm:$0xff] }
 0x2ea   : > { %3016 = vmatpush.bf16.msrb.mxu1 %v5690_v2 }
 0x2ec   : > { %2975 = vmatmul.bf16.vlgmr.msra.gmra.mxu2 %v8942_v37 }
 0x2ed   : > { %3023 = vmatpush.bf16.msrb.mxu2 %v6170_v3  ;;  %3017 = vmatmul.bf16.vlgmr.msrb.gmra.mxu1 %v8942_v37  ;;  %v2738_v37 = vpop.f32.mrf.mxu1 }
 0x2ee   : > { %v2739_v36 = vadd.f32 %v2738_v37, %v2724_v12 }
 0x2f1   : > { %3024 = vmatpush.bf16.msrb.mxu2 %v6138_v7 }
 0x2f5   : > { %3025 = vmatpush.bf16.msrb.mxu2 %v6106_v9  ;;  %v2740_v26 = vpop.f32.mrf.mxu1  ;;  %v1547_v9 = vld [vmem:[#allocation3 + $0x18] sm:$0xff] }
 0x2f9   : > { %3026 = vmatpush.bf16.msrb.mxu2 %v6074_v11 }
 0x2fd   : > { %3027 = vmatpush.bf16.msrb.mxu2 %v6042_v17 }
 0x301   : > { %3028 = vmatpush.bf16.msrb.mxu2 %v6010_v19 }
 0x305   : > { %3029 = vmatpush.bf16.msrb.mxu2 %v5978_v22  ;;  %v1549_v22 = vld [vmem:[#allocation3 + $0x68] sm:$0xff] }
 0x309   : > { %3030 = vmatpush.bf16.msrb.mxu2 %v5946_v25  ;;  %v2794_v15 = vpop.f32.mrf.mxu1 }
 0x30a   : > { %v2795_v33 = vadd.f32 %v2794_v15, %v2781_v31  ;;  %v2836_v52 = vpop.f32.mrf.mxu0 }
 0x30c   : > { %3031 = vmatmul.bf16.vlgmr.msrb.gmra.mxu2 %v8963_v5  ;;  %v3052_v34 = vadd.f32 %v2795_v33, %v1545_v32  ;;  %v2741_v5 = vadd.f32 %v2740_v26, %v2726_v21 }
 0x30e   : > { %3068 = vst [vmem:[#allocation3] sm:$0xff] %v3052_v34 }
 0x30f   : > { %v2752_v41 = vpop.f32.mrf.mxu2 }
 0x310   : > { %v2753_v43 = vadd.f32 %v2752_v41, %v2739_v36 }
 0x311   : > { %v2796_v45 = vpop.f32.mrf.mxu1  ;;  %v2878_v7 = vpop.f32.mrf.mxu3 }
 0x312   : > { %v3051_v46 = vadd.f32 %v2753_v43, %v1544_v39  ;;  %v2797_v47 = vadd.f32 %v2796_v45, %v2783_v14  ;;  %v2838_v60 = vpop.f32.mrf.mxu0  ;;  %v1556_v14 = vld [vmem:[#allocation3 + $0x60] sm:$0xff] }
 0x314   : > { %3067 = vst [vmem:[#allocation3 + $0x30] sm:$0xff] %v3051_v46  ;;  %v3060_v48 = vadd.f32 %v2797_v47, %v1553_v44 }
 0x316   : > { %3076 = vst [vmem:[#allocation3 + $0x20] sm:$0xff] %v3060_v48 }
 0x317   : > { %v2754_v50 = vpop.f32.mrf.mxu2 }
 0x318   : > { %v2755_v51 = vadd.f32 %v2754_v50, %v2741_v5 }
 0x319   : > { %v2850_v58 = vpop.f32.mrf.mxu1  ;;  %v2880_v17 = vpop.f32.mrf.mxu3 }
 0x31a   : > { %v3059_v53 = vadd.f32 %v2755_v51, %v1552_v49  ;;  %v2892_v6 = vpop.f32.mrf.mxu0  ;;  %v1550_v49 = vld [vmem:[#allocation3 + $0x8] sm:$0xff] }
 0x31c   : > { %3075 = vst [vmem:[#allocation3 + $0x40] sm:$0xff] %v3059_v53 }
 0x31f   : > { %v2808_v55 = vpop.f32.mrf.mxu2 }
 0x320   : > { %v2823_v56 = vadd.f32 %v2822_v54, %v2808_v55 }
 0x321   : > { %v2852_v3 = vpop.f32.mrf.mxu1  ;;  %v2934_v42 = vpop.f32.mrf.mxu3 }
 0x322   : > { %v2837_v59 = vadd.f32 %v2836_v52, %v2823_v56  ;;  %v2894_v12 = vpop.f32.mrf.mxu0  ;;  %v1558_v56 = vld [vmem:[#allocation3 + $0x78] sm:$0xff] }
 0x324   : > { %v3053_v61 = vadd.f32 %v2837_v59, %v1546_v57 }
 0x326   : > { %3069 = vst [vmem:[#allocation3 + $0x58] sm:$0xff] %v3053_v61 }
 0x327   : > { %v2810_v63 = vpop.f32.mrf.mxu2 }
 0x328   : > { %v2825_v0 = vadd.f32 %v2824_v62, %v2810_v63  ;;  %v1551_v63 = vld [vmem:[#allocation3 + $0x48] sm:$0xff] }
 0x329   : > { %v2936_v32 = vpop.f32.mrf.mxu3 }
 0x32a   : > { %v2839_v2 = vadd.f32 %v2838_v60, %v2825_v0  ;;  %v2906_v11 = vpop.f32.mrf.mxu1 }
 0x32b   : > { %v2948_v20 = vpop.f32.mrf.mxu0  ;;  %v2907_v26 = vadd.f32 %v2906_v11, %v2892_v6 }
 0x32c   : > { %v3061_v4 = vadd.f32 %v2839_v2, %v1554_v1  ;;  %v2949_v21 = vadd.f32 %v2948_v20, %v2934_v42 }
 0x32e   : > { %3077 = vst [vmem:[#allocation3 + $0x10] sm:$0xff] %v3061_v4 }
 0x32f   : > { %v2864_v28 = vpop.f32.mrf.mxu2 }
 0x330   : > { %v2865_v8 = vadd.f32 %v2864_v28, %v2850_v58 }
 0x332   : > { %v2879_v10 = vadd.f32 %v2878_v7, %v2865_v8  ;;  %v2908_v37 = vpop.f32.mrf.mxu1  ;;  %v1559_v7 = vld [vmem:[#allocation3 + $0x28] sm:$0xff] }
 0x333   : > { %v2950_v27 = vpop.f32.mrf.mxu0  ;;  %v2909_v41 = vadd.f32 %v2908_v37, %v2894_v12  ;;  %v2990_v46 = vpop.f32.mrf.mxu3 }
 0x334   : > { %v3054_v30 = vadd.f32 %v2879_v10, %v1547_v9  ;;  %v2951_v33 = vadd.f32 %v2950_v27, %v2936_v32 }
 0x336   : > { %3070 = vst [vmem:[#allocation3 + $0x18] sm:$0xff] %v3054_v30 }
 0x337   : > { %v2866_v13 = vpop.f32.mrf.mxu2 }
 0x338   : > { %v2867_v16 = vadd.f32 %v2866_v13, %v2852_v3 }
 0x33a   : > { %v2881_v18 = vadd.f32 %v2880_v17, %v2867_v16 }
 0x33b   : > { %v2992_v52 = vpop.f32.mrf.mxu3 }
 0x33c   : > { %v3062_v19 = vadd.f32 %v2881_v18, %v1555_v40 }
 0x33e   : > { %3078 = vst [vmem:[#allocation3 + $0x38] sm:$0xff] %v3062_v19 }
 0x34a   : > { %v2962_v23 = vpop.f32.mrf.mxu1 }
 0x34b   : > { %v2963_v24 = vadd.f32 %v2962_v23, %v2949_v21  ;;  %v3004_v47 = vpop.f32.mrf.mxu0 }
 0x34d   : > { %v3056_v25 = vadd.f32 %v2963_v24, %v1549_v22 }
 0x34f   : > { %3072 = vst [vmem:[#allocation3 + $0x68] sm:$0xff] %v3056_v25  ;;  %v2920_v31 = vpop.f32.mrf.mxu2 }
 0x350   : > { %v2921_v15 = vadd.f32 %v2920_v31, %v2907_v26 }
 0x352   : > { %v3055_v34 = vadd.f32 %v2921_v15, %v1548_v29  ;;  %v2964_v36 = vpop.f32.mrf.mxu1  ;;  %v3046_v60 = vpop.f32.mrf.mxu3 }
 0x353   : > { %v2965_v38 = vadd.f32 %v2964_v36, %v2951_v33  ;;  %v3006_v55 = vpop.f32.mrf.mxu0 }
 0x354   : > { %3071 = vst [vmem:[#allocation3 + $0x50] sm:$0xff] %v3055_v34 }
 0x355   : > { %v3064_v39 = vadd.f32 %v2965_v38, %v1557_v35 }
 0x357   : > { %3080 = vst [vmem:[#allocation3 + $0x70] sm:$0xff] %v3064_v39  ;;  %v2922_v43 = vpop.f32.mrf.mxu2 }
 0x358   : > { %v2923_v44 = vadd.f32 %v2922_v43, %v2909_v41 }
 0x35a   : > { %v3063_v45 = vadd.f32 %v2923_v44, %v1556_v14  ;;  %v3048_v6 = vpop.f32.mrf.mxu3 }
 0x35c   : > { %3079 = vst [vmem:[#allocation3 + $0x60] sm:$0xff] %v3063_v45 }
 0x36a   : > { %v3018_v59 = vpop.f32.mrf.mxu1 }
 0x36f   : > { %v2976_v48 = vpop.f32.mrf.mxu2 }
 0x370   : > { %v2991_v5 = vadd.f32 %v2990_v46, %v2976_v48 }
 0x372   : > { %v3005_v50 = vadd.f32 %v3004_v47, %v2991_v5  ;;  %v3020_v2 = vpop.f32.mrf.mxu1 }
 0x374   : > { %v3057_v51 = vadd.f32 %v3005_v50, %v1550_v49 }
 0x376   : > { %3073 = vst [vmem:[#allocation3 + $0x8] sm:$0xff] %v3057_v51 }
 0x377   : > { %v2978_v53 = vpop.f32.mrf.mxu2 }
 0x378   : > { %v2993_v54 = vadd.f32 %v2992_v52, %v2978_v53 }
 0x37a   : > { %v3007_v57 = vadd.f32 %v3006_v55, %v2993_v54 }
 0x37c   : > { %v3065_v58 = vadd.f32 %v3007_v57, %v1558_v56 }
 0x37e   : > { %3081 = vst [vmem:[#allocation3 + $0x78] sm:$0xff] %v3065_v58 }
 0x38f   : > { %v3032_v61 = vpop.f32.mrf.mxu2 }
 0x390   : > { %v3033_v62 = vadd.f32 %v3032_v61, %v3018_v59 }
 0x392   : > { %v3047_v0 = vadd.f32 %v3046_v60, %v3033_v62 }
 0x394   : > { %v3058_v1 = vadd.f32 %v3047_v0, %v1551_v63 }
 0x396   : > { %3074 = vst [vmem:[#allocation3 + $0x48] sm:$0xff] %v3058_v1 }
 0x397   : > { %v3034_v3 = vpop.f32.mrf.mxu2 }
 0x398   : > { %v3035_v4 = vadd.f32 %v3034_v3, %v3020_v2 }
 0x39a   : > { %v3049_v28 = vadd.f32 %v3048_v6, %v3035_v4  ;;  %3086 = sbr.rel (%p6427_p5) target bundleno = 1512 (0x5e8), region = 131 }
 0x39c   : > { %v3066_v8 = vadd.f32 %v3049_v28, %v1559_v7 }
 0x39e   : > { %3082 = vst [vmem:[#allocation3 + $0x28] sm:$0xff] %v3066_v8 }
 0x39f   : > { %v6542_v9 = vld [vmem:[#allocation14 + $0xe0] sm:$0xf]  ;;  %v7743_v10 = vld [vmem:[#allocation14 + $0xec] sm:$0xf0]  ;;  %vm5197_vm2 = vcmask 7168  }
 0x3a0   : > { %v6670_v30 = vld [vmem:[#allocation14 + $0x1e0] sm:$0xf]  ;;  %v6543_v11 = vor.u32 %v7743_v10, %v6542_v9  ;;  %v7775_v12 = vld [vmem:[#allocation14 + $0x1ec] sm:$0xf0] }
 0x3a1   : > { %v6798_v13 = vld [vmem:[#allocation14 + $0x2e0] sm:$0xf]  ;;  %v7807_v16 = vld [vmem:[#allocation14 + $0x2ec] sm:$0xf0]  ;;  %v6671_v17 = vor.u32 %v7775_v12, %v6670_v30 }
 0x3a2   : > { %v6799_v40 = vor.u32 %v7807_v16, %v6798_v13  ;;  %v6926_v18 = vld [vmem:[#allocation14 + $0x3e0] sm:$0xf]  ;;  %v7839_v19 = vld [vmem:[#allocation14 + $0x3ec] sm:$0xf0]  ;;  %4707 = vmatpush.bf16.msra.mxu0 %v6543_v11 }
 0x3a3   : > { %v6526_v37 = vld [vmem:[#allocation14 + $0xc0] sm:$0xf]  ;;  %v6927_v20 = vor.u32 %v7839_v19, %v6926_v18  ;;  %v7739_v42 = vld [vmem:[#allocation14 + $0xcc] sm:$0xf0]  ;;  %4721 = vmatpush.bf16.msra.mxu1 %v6671_v17 }
 0x3a4   : > { %v6654_v21 = vld [vmem:[#allocation14 + $0x1c0] sm:$0xf]  ;;  %v7771_v22 = vld [vmem:[#allocation14 + $0x1cc] sm:$0xf0]  ;;  %4735 = vmatpush.bf16.msra.mxu2 %v6799_v40  ;;  %v6527_v23 = vor.u32 %v7739_v42, %v6526_v37 }
 0x3a5   : > { %v6655_v24 = vor.u32 %v7771_v22, %v6654_v21  ;;  %v6782_v25 = vld [vmem:[#allocation14 + $0x2c0] sm:$0xf]  ;;  %v7803_v26 = vld [vmem:[#allocation14 + $0x2cc] sm:$0xf0]  ;;  %4749 = vmatpush.bf16.msra.mxu3 %v6927_v20 }
 0x3a6   : > { %v6910_v27 = vld [vmem:[#allocation14 + $0x3c0] sm:$0xf]  ;;  %v6783_v29 = vor.u32 %v7803_v26, %v6782_v25  ;;  %v7835_v31 = vld [vmem:[#allocation14 + $0x3cc] sm:$0xf0]  ;;  %4708 = vmatpush.bf16.msra.mxu0 %v6527_v23 }
 0x3a7   : > { %v6510_v32 = vld [vmem:[#allocation14 + $0xa0] sm:$0xf]  ;;  %v7735_v15 = vld [vmem:[#allocation14 + $0xac] sm:$0xf0]  ;;  %v6911_v33 = vor.u32 %v7835_v31, %v6910_v27  ;;  %4722 = vmatpush.bf16.msra.mxu1 %v6655_v24 }
 0x3a8   : > { %v6638_v34 = vld [vmem:[#allocation14 + $0x1a0] sm:$0xf]  ;;  %v7767_v35 = vld [vmem:[#allocation14 + $0x1ac] sm:$0xf0]  ;;  %v6511_v38 = vor.u32 %v7735_v15, %v6510_v32  ;;  %4736 = vmatpush.bf16.msra.mxu2 %v6783_v29 }
 0x3a9   : > { %v6766_v36 = vld [vmem:[#allocation14 + $0x2a0] sm:$0xf]  ;;  %v7799_v39 = vld [vmem:[#allocation14 + $0x2ac] sm:$0xf0]  ;;  %v6639_v43 = vor.u32 %v7767_v35, %v6638_v34  ;;  %4750 = vmatpush.bf16.msra.mxu3 %v6911_v33 }
 0x3aa   : > { %v6894_v41 = vld [vmem:[#allocation14 + $0x3a0] sm:$0xf]  ;;  %v7831_v14 = vld [vmem:[#allocation14 + $0x3ac] sm:$0xf0]  ;;  %v6767_v44 = vor.u32 %v7799_v39, %v6766_v36  ;;  %4709 = vmatpush.bf16.msra.mxu0 %v6511_v38 }
 0x3ab   : > { %v6494_v45 = vld [vmem:[#allocation14 + $0x80] sm:$0xf]  ;;  %v7731_v46 = vld [vmem:[#allocation14 + $0x8c] sm:$0xf0]  ;;  %v6895_v48 = vor.u32 %v7831_v14, %v6894_v41  ;;  %4723 = vmatpush.bf16.msra.mxu1 %v6639_v43 }
 0x3ac   : > { %v6622_v47 = vld [vmem:[#allocation14 + $0x180] sm:$0xf]  ;;  %v7763_v5 = vld [vmem:[#allocation14 + $0x18c] sm:$0xf0]  ;;  %v6495_v53 = vor.u32 %v7731_v46, %v6494_v45  ;;  %4737 = vmatpush.bf16.msra.mxu2 %v6767_v44 }
 0x3ad   : > { %v6750_v49 = vld [vmem:[#allocation14 + $0x280] sm:$0xf]  ;;  %v7795_v50 = vld [vmem:[#allocation14 + $0x28c] sm:$0xf0]  ;;  %v6623_v54 = vor.u32 %v7763_v5, %v6622_v47  ;;  %4751 = vmatpush.bf16.msra.mxu3 %v6895_v48 }
 0x3ae   : > { %v6878_v51 = vld [vmem:[#allocation14 + $0x380] sm:$0xf]  ;;  %v7827_v52 = vld [vmem:[#allocation14 + $0x38c] sm:$0xf0]  ;;  %v6751_v55 = vor.u32 %v7795_v50, %v6750_v49  ;;  %4710 = vmatpush.bf16.msra.mxu0 %v6495_v53 }
 0x3af   : > { %v6478_v56 = vld [vmem:[#allocation14 + $0x60] sm:$0xf]  ;;  %v7727_v57 = vld [vmem:[#allocation14 + $0x6c] sm:$0xf0]  ;;  %v6879_v59 = vor.u32 %v7827_v52, %v6878_v51  ;;  %4724 = vmatpush.bf16.msra.mxu1 %v6623_v54 }
 0x3b0   : > { %v6606_v58 = vld [vmem:[#allocation14 + $0x160] sm:$0xf]  ;;  %v7759_v60 = vld [vmem:[#allocation14 + $0x16c] sm:$0xf0]  ;;  %v6479_v1 = vor.u32 %v7727_v57, %v6478_v56  ;;  %4738 = vmatpush.bf16.msra.mxu2 %v6751_v55 }
 0x3b1   : > { %v6734_v61 = vld [vmem:[#allocation14 + $0x260] sm:$0xf]  ;;  %v7791_v62 = vld [vmem:[#allocation14 + $0x26c] sm:$0xf0]  ;;  %v6607_v2 = vor.u32 %v7759_v60, %v6606_v58  ;;  %4752 = vmatpush.bf16.msra.mxu3 %v6879_v59 }
 0x3b2   : > { %v6862_v63 = vld [vmem:[#allocation14 + $0x360] sm:$0xf]  ;;  %v7823_v0 = vld [vmem:[#allocation14 + $0x36c] sm:$0xf0]  ;;  %v6735_v3 = vor.u32 %v7791_v62, %v6734_v61  ;;  %4711 = vmatpush.bf16.msra.mxu0 %v6479_v1 }
 0x3b3   : > { %v6462_v4 = vld [vmem:[#allocation14 + $0x40] sm:$0xf]  ;;  %v7723_v6 = vld [vmem:[#allocation14 + $0x4c] sm:$0xf0]  ;;  %v6863_v28 = vor.u32 %v7823_v0, %v6862_v63  ;;  %4725 = vmatpush.bf16.msra.mxu1 %v6607_v2  ;;  %v9252_v2 = vld [vmem:[#allocation13] sm:$0xff] }
 0x3b4   : > { %v6590_v7 = vld [vmem:[#allocation14 + $0x140] sm:$0xf]  ;;  %v7755_v8 = vld [vmem:[#allocation14 + $0x14c] sm:$0xf0]  ;;  %v6463_v12 = vor.u32 %v7723_v6, %v6462_v4  ;;  %4739 = vmatpush.bf16.msra.mxu2 %v6735_v3  ;;  %v3105_v6 = vperm.slane %v9252_v2, 0 }
 0x3b5   : > { %v6718_v9 = vld [vmem:[#allocation14 + $0x240] sm:$0xf]  ;;  %v7787_v10 = vld [vmem:[#allocation14 + $0x24c] sm:$0xf0]  ;;  %v6591_v13 = vor.u32 %v7755_v8, %v6590_v7  ;;  %4753 = vmatpush.bf16.msra.mxu3 %v6863_v28  ;;  %v3107_v8 = vperm.slane %v9252_v2, 2 }
 0x3b6   : > { %v6846_v30 = vld [vmem:[#allocation14 + $0x340] sm:$0xf]  ;;  %v7819_v11 = vld [vmem:[#allocation14 + $0x34c] sm:$0xf0]  ;;  %v6719_v16 = vor.u32 %v7787_v10, %v6718_v9  ;;  %4712 = vmatpush.bf16.msra.mxu0 %v6463_v12 }
 0x3b7   : > { %v6446_v17 = vld [vmem:[#allocation14 + $0x20] sm:$0xf]  ;;  %v7719_v40 = vld [vmem:[#allocation14 + $0x2c] sm:$0xf0]  ;;  %v6847_v19 = vor.u32 %v7819_v11, %v6846_v30  ;;  %4726 = vmatpush.bf16.msra.mxu1 %v6591_v13 }
 0x3b8   : > { %v6574_v18 = vld [vmem:[#allocation14 + $0x120] sm:$0xf]  ;;  %v7751_v37 = vld [vmem:[#allocation14 + $0x12c] sm:$0xf0]  ;;  %v6447_v23 = vor.u32 %v7719_v40, %v6446_v17  ;;  %4740 = vmatpush.bf16.msra.mxu2 %v6719_v16 }
 0x3b9   : > { %v6702_v20 = vld [vmem:[#allocation14 + $0x220] sm:$0xf]  ;;  %v7783_v42 = vld [vmem:[#allocation14 + $0x22c] sm:$0xf0]  ;;  %v6575_v27 = vor.u32 %v7751_v37, %v6574_v18  ;;  %4754 = vmatpush.bf16.msra.mxu3 %v6847_v19 }
 0x3ba   : > { %v6830_v21 = vld [vmem:[#allocation14 + $0x320] sm:$0xf]  ;;  %v7815_v22 = vld [vmem:[#allocation14 + $0x32c] sm:$0xf0]  ;;  %v6703_v29 = vor.u32 %v7783_v42, %v6702_v20  ;;  %4713 = vmatpush.bf16.msra.mxu0 %v6447_v23 }
 0x3bb   : > { %v6430_v24 = vld [vmem:[#allocation14] sm:$0xf]  ;;  %v7715_v25 = vld [vmem:[#allocation14 + $0xc] sm:$0xf0]  ;;  %v6831_v33 = vor.u32 %v7815_v22, %v6830_v21  ;;  %4727 = vmatpush.bf16.msra.mxu1 %v6575_v27 }
 0x3bc   : > { %v6558_v26 = vld [vmem:[#allocation14 + $0x100] sm:$0xf]  ;;  %v7747_v31 = vld [vmem:[#allocation14 + $0x10c] sm:$0xf0]  ;;  %v6431_v14 = vor.u32 %v7715_v25, %v6430_v24  ;;  %4741 = vmatpush.bf16.msra.mxu2 %v6703_v29  ;;  %v3106_v24 = vperm.slane %v9252_v2, 1 }
 0x3bd   : > { %v6686_v32 = vld [vmem:[#allocation14 + $0x200] sm:$0xf]  ;;  %v7779_v15 = vld [vmem:[#allocation14 + $0x20c] sm:$0xf0]  ;;  %v6559_v46 = vor.u32 %v7747_v31, %v6558_v26  ;;  %4755 = vmatpush.bf16.msra.mxu3 %v6831_v33 }
 0x3be   : > { %v6814_v34 = vld [vmem:[#allocation14 + $0x300] sm:$0xf]  ;;  %v7811_v35 = vld [vmem:[#allocation14 + $0x30c] sm:$0xf0]  ;;  %v6687_v47 = vor.u32 %v7779_v15, %v6686_v32  ;;  %4714 = vmatpush.bf16.msra.mxu0 %v6431_v14 }
 0x3bf   : > { %v7054_v36 = vld [vmem:[#allocation14 + $0x4e0] sm:$0xf]  ;;  %v7871_v38 = vld [vmem:[#allocation14 + $0x4ec] sm:$0xf0]  ;;  %v6815_v50 = vor.u32 %v7811_v35, %v6814_v34  ;;  %4728 = vmatpush.bf16.msra.mxu1 %v6559_v46 }
 0x3c0   : > { %v7182_v39 = vld [vmem:[#allocation14 + $0x5e0] sm:$0xf]  ;;  %v7903_v41 = vld [vmem:[#allocation14 + $0x5ec] sm:$0xf0]  ;;  %v7055_v51 = vor.u32 %v7871_v38, %v7054_v36  ;;  %4742 = vmatpush.bf16.msra.mxu2 %v6687_v47  ;;  %v3108_v38 = vperm.slane %v9252_v2, 3 }
 0x3c1   : > { %v7310_v43 = vld [vmem:[#allocation14 + $0x6e0] sm:$0xf]  ;;  %v7935_v44 = vld [vmem:[#allocation14 + $0x6ec] sm:$0xf0]  ;;  %v7183_v55 = vor.u32 %v7903_v41, %v7182_v39  ;;  %4756 = vmatpush.bf16.msra.mxu3 %v6815_v50 }
 0x3c2   : > { %v7438_v45 = vld [vmem:[#allocation14 + $0x7e0] sm:$0xf]  ;;  %v7967_v48 = vld [vmem:[#allocation14 + $0x7ec] sm:$0xf0]  ;;  %v7311_v56 = vor.u32 %v7935_v44, %v7310_v43  ;;  %4763 = vmatpush.bf16.msrb.mxu0 %v7055_v51 }
 0x3c3   : > { %v7038_v5 = vld [vmem:[#allocation14 + $0x4c0] sm:$0xf]  ;;  %v7867_v49 = vld [vmem:[#allocation14 + $0x4cc] sm:$0xf0]  ;;  %v7439_v60 = vor.u32 %v7967_v48, %v7438_v45  ;;  %4777 = vmatpush.bf16.msrb.mxu1 %v7183_v55 }
 0x3c4   : > { %v7166_v52 = vld [vmem:[#allocation14 + $0x5c0] sm:$0xf]  ;;  %v7899_v53 = vld [vmem:[#allocation14 + $0x5cc] sm:$0xf0]  ;;  %v7039_v3 = vor.u32 %v7867_v49, %v7038_v5  ;;  %4791 = vmatpush.bf16.msrb.mxu2 %v7311_v56 }
 0x3c5   : > { %v7294_v54 = vld [vmem:[#allocation14 + $0x6c0] sm:$0xf]  ;;  %v7931_v57 = vld [vmem:[#allocation14 + $0x6cc] sm:$0xf0]  ;;  %v7167_v9 = vor.u32 %v7899_v53, %v7166_v52  ;;  %4805 = vmatpush.bf16.msrb.mxu3 %v7439_v60 }
 0x3c6   : > { %v7422_v58 = vld [vmem:[#allocation14 + $0x7c0] sm:$0xf]  ;;  %v7963_v59 = vld [vmem:[#allocation14 + $0x7cc] sm:$0xf0]  ;;  %v7295_v10 = vor.u32 %v7931_v57, %v7294_v54  ;;  %4764 = vmatpush.bf16.msrb.mxu0 %v7039_v3 }
 0x3c7   : > { %v9246_v61 = vld [vmem:[#allocation14 + $0x4a0] sm:$0xf]  ;;  %v9248_v62 = vld [vmem:[#allocation14 + $0x4ac] sm:$0xf0]  ;;  %v7423_v30 = vor.u32 %v7963_v59, %v7422_v58  ;;  %4778 = vmatpush.bf16.msrb.mxu1 %v7167_v9 }
 0x3c8   : > { %v9250_v63 = vld [vmem:[#allocation14 + $0x5a0] sm:$0xf]  ;;  %v3095_v1 = vld [vmem:[#allocation3 + $0x40] sm:$0xff]  ;;  %v3089_v7 = vld [vmem:[#allocation3 + $0x58] sm:$0xff]  ;;  %v7023_v37 = vor.u32 %v9248_v62, %v9246_v61  ;;  %4792 = vmatpush.bf16.msrb.mxu2 %v7295_v10 }
 0x3c9   : > { %v3087_v0 = vld [vmem:[#allocation3 + $0x30] sm:$0xff]  ;;  %v7895_v4 = vld [vmem:[#allocation14 + $0x5ac] sm:$0xf0]  ;;  %v3129_v40 = vadd.f32 %v3105_v6, %v3095_v1  ;;  %v3123_v18 = vadd.f32 %v3107_v8, %v3089_v7  ;;  %4806 = vmatpush.bf16.msrb.mxu3 %v7423_v30 }
 0x3ca   : > { %v3097_v28 = vld [vmem:[#allocation3 + $0x10] sm:$0xff]  ;;  %v7927_v12 = vld [vmem:[#allocation14 + $0x6ac] sm:$0xf0]  ;;  %v3121_v17 = vadd.f32 %v3105_v6, %v3087_v0  ;;  %v7151_v20 = vor.u32 %v7895_v4, %v9250_v63  ;;  %4765 = vmatpush.bf16.msrb.mxu0 %v7023_v37 }
 0x3cb   : > { %v7278_v11 = vld [vmem:[#allocation14 + $0x6a0] sm:$0xf]  ;;  %v7959_v16 = vld [vmem:[#allocation14 + $0x7ac] sm:$0xf0]  ;;  %v3131_v19 = vadd.f32 %v3107_v8, %v3097_v28  ;;  %v3145_v26 = vmax.f32 %v3129_v40, 0.0  ;;  %v3139_v27 = vmax.f32 %v3123_v18, 0.0 }
 0x3cc   : > { %v7406_v13 = vld [vmem:[#allocation14 + $0x7a0] sm:$0xf]  ;;  %v7859_v21 = vld [vmem:[#allocation14 + $0x48c] sm:$0xf0]  ;;  %v3137_v25 = vmax.f32 %v3121_v17, 0.0  ;;  %v7279_v15 = vor.u32 %v7927_v12, %v7278_v11  ;;  %4779 = vmatpush.bf16.msrb.mxu1 %v7151_v20 }
 0x3cd   : > { %v7006_v42 = vld [vmem:[#allocation14 + $0x480] sm:$0xf]  ;;  %v3088_v22 = vld [vmem:[#allocation3] sm:$0xff]  ;;  %v3147_v29 = vmax.f32 %v3131_v19, 0.0  ;;  %v3090_v31 = vld [vmem:[#allocation3 + $0x18] sm:$0xff]  ;;  %v7407_v39 = vor.u32 %v7959_v16, %v7406_v13 }
 0x3ce   : > { %v3096_v23 = vld [vmem:[#allocation3 + $0x20] sm:$0xff]  ;;  %v3098_v32 = vld [vmem:[#allocation3 + $0x38] sm:$0xff]  ;;  %v7134_v33 = vld [vmem:[#allocation14 + $0x580] sm:$0xf]  ;;  %v3122_v35 = vadd.f32 %v3106_v24, %v3088_v22  ;;  %v9261_v43 = vpack.c.bf16 %v3145_v26, %v3137_v25  ;;  %v3124_v5 = vadd.f32 %v3108_v38, %v3090_v31  ;;  %v7007_v50 = vor.u32 %v7859_v21, %v7006_v42  ;;  %4793 = vmatpush.bf16.msrb.mxu2 %v7279_v15 }
 0x3cf   : > { %v7891_v34 = vld [vmem:[#allocation14 + $0x58c] sm:$0xf0]  ;;  %v3130_v36 = vadd.f32 %v3106_v24, %v3096_v23  ;;  %v7262_v41 = vld [vmem:[#allocation14 + $0x680] sm:$0xf]  ;;  %v9263_v44 = vpack.c.bf16 %v3147_v29, %v3139_v27  ;;  %v3132_v49 = vadd.f32 %v3108_v38, %v3098_v32  ;;  %4807 = vmatpush.bf16.msrb.mxu3 %v7407_v39  ;;  %v3109_v21 = vperm.slane %v9252_v2, 4 }
 0x3d0   : > { %v7923_v14 = vld [vmem:[#allocation14 + $0x68c] sm:$0xf0]  ;;  %v7390_v45 = vld [vmem:[#allocation14 + $0x780] sm:$0xf]  ;;  %v3138_v47 = vmax.f32 %v3122_v35, 0.0  ;;  %v7135_v51 = vor.u32 %v7891_v34, %v7134_v33  ;;  %v3140_v57 = vmax.f32 %v3124_v5, 0.0  ;;  %4715 = vmatmul.bf16.vlgmr.msra.gmra.mxu0 %v9261_v43 }
 0x3d1   : > { %v7955_v46 = vld [vmem:[#allocation14 + $0x78c] sm:$0xf0]  ;;  %v3146_v48 = vmax.f32 %v3130_v36, 0.0  ;;  %4743 = vmatmul.bf16.vlgmr.msra.gmra.mxu2 %v9263_v44  ;;  %v6990_v52 = vld [vmem:[#allocation14 + $0x460] sm:$0xf]  ;;  %v7263_v53 = vor.u32 %v7923_v14, %v7262_v41  ;;  %v3148_v58 = vmax.f32 %v3132_v49, 0.0  ;;  %4766 = vmatpush.bf16.msrb.mxu0 %v7007_v50 }
 0x3d2   : > { %v7855_v54 = vld [vmem:[#allocation14 + $0x46c] sm:$0xf0]  ;;  %v7118_v55 = vld [vmem:[#allocation14 + $0x560] sm:$0xf]  ;;  %v7391_v59 = vor.u32 %v7955_v46, %v7390_v45  ;;  %4780 = vmatpush.bf16.msrb.mxu1 %v7135_v51  ;;  %v3111_v29 = vperm.slane %v9252_v2, 6  ;;  %v3110_v31 = vperm.slane %v9252_v2, 5 }
 0x3d3   : > { %v9266_v56 = vpack.c.bf16 %v3146_v48, %v3138_v47  ;;  %v7887_v60 = vld [vmem:[#allocation14 + $0x56c] sm:$0xf0]  ;;  %v7246_v61 = vld [vmem:[#allocation14 + $0x660] sm:$0xf]  ;;  %v9270_v1 = vpack.c.bf16 %v3148_v58, %v3140_v57  ;;  %v6991_v3 = vor.u32 %v7855_v54, %v6990_v52  ;;  %4794 = vmatpush.bf16.msrb.mxu2 %v7263_v53  ;;  %v3112_v35 = vperm.slane %v9252_v2, 7 }
 0x3d4   : > { %v7919_v62 = vld [vmem:[#allocation14 + $0x66c] sm:$0xf0]  ;;  %v7374_v63 = vld [vmem:[#allocation14 + $0x760] sm:$0xf]  ;;  %v7119_v28 = vor.u32 %v7887_v60, %v7118_v55  ;;  %4808 = vmatpush.bf16.msrb.mxu3 %v7391_v59  ;;  %v7741_v59 = vld [vmem:[#allocation14 + $0xe4] sm:$0xf] }
 0x3d5   : > { %v7951_v0 = vld [vmem:[#allocation14 + $0x76c] sm:$0xf0]  ;;  %4729 = vmatmul.bf16.vlgmr.msra.gmra.mxu1 %v9266_v56  ;;  %v6974_v4 = vld [vmem:[#allocation14 + $0x440] sm:$0xf]  ;;  %v7247_v8 = vor.u32 %v7919_v62, %v7246_v61  ;;  %4757 = vmatmul.bf16.vlgmr.msra.gmra.mxu3 %v9270_v1  ;;  %v6544_v60 = vld [vmem:[#allocation14 + $0xf0] sm:$0xf0] }
 0x3d6   : > { %v7851_v6 = vld [vmem:[#allocation14 + $0x44c] sm:$0xf0]  ;;  %v7102_v7 = vld [vmem:[#allocation14 + $0x540] sm:$0xf]  ;;  %v7375_v11 = vor.u32 %v7951_v0, %v7374_v63  ;;  %4767 = vmatpush.bf16.msrb.mxu0 %v6991_v3  ;;  %4781 = vmatpush.bf16.msrb.mxu1 %v7119_v28  ;;  %v7773_v0 = vld [vmem:[#allocation14 + $0x1e4] sm:$0xf] }
 0x3d7   : > { %v7883_v9 = vld [vmem:[#allocation14 + $0x54c] sm:$0xf0]  ;;  %v7230_v10 = vld [vmem:[#allocation14 + $0x640] sm:$0xf]  ;;  %v6975_v19 = vor.u32 %v7851_v6, %v6974_v4  ;;  %4795 = vmatpush.bf16.msrb.mxu2 %v7247_v8  ;;  %v6672_v3 = vld [vmem:[#allocation14 + $0x1f0] sm:$0xf0] }
 0x3d8   : > { %v7915_v30 = vld [vmem:[#allocation14 + $0x64c] sm:$0xf0]  ;;  %v7358_v12 = vld [vmem:[#allocation14 + $0x740] sm:$0xf]  ;;  %v7103_v22 = vor.u32 %v7883_v9, %v7102_v7  ;;  %4809 = vmatpush.bf16.msrb.mxu3 %v7375_v11  ;;  %v7805_v4 = vld [vmem:[#allocation14 + $0x2e4] sm:$0xf] }
 0x3d9   : > { %v7947_v13 = vld [vmem:[#allocation14 + $0x74c] sm:$0xf0]  ;;  %v6958_v16 = vld [vmem:[#allocation14 + $0x420] sm:$0xf]  ;;  %v7231_v23 = vor.u32 %v7915_v30, %v7230_v10  ;;  %v6800_v28 = vld [vmem:[#allocation14 + $0x2f0] sm:$0xf0] }
 0x3da   : > { %v7847_v17 = vld [vmem:[#allocation14 + $0x42c] sm:$0xf0]  ;;  %v9273_v40 = vld [vmem:[#allocation14 + $0x520] sm:$0xf]  ;;  %v7359_v32 = vor.u32 %v7947_v13, %v7358_v12  ;;  %4768 = vmatpush.bf16.msrb.mxu0 %v6975_v19  ;;  %4782 = vmatpush.bf16.msrb.mxu1 %v7103_v22  ;;  %v7837_v8 = vld [vmem:[#allocation14 + $0x3e4] sm:$0xf] }
 0x3db   : > { %v7879_v18 = vld [vmem:[#allocation14 + $0x52c] sm:$0xf0]  ;;  %v7214_v37 = vld [vmem:[#allocation14 + $0x620] sm:$0xf]  ;;  %v6959_v36 = vor.u32 %v7847_v17, %v6958_v16  ;;  %4796 = vmatpush.bf16.msrb.mxu2 %v7231_v23  ;;  %v6928_v30 = vld [vmem:[#allocation14 + $0x3f0] sm:$0xf0] }
 0x3dc   : > { %v7911_v20 = vld [vmem:[#allocation14 + $0x62c] sm:$0xf0]  ;;  %v3091_v42 = vld [vmem:[#allocation3 + $0x50] sm:$0xff]  ;;  %v3093_v27 = vld [vmem:[#allocation3 + $0x8] sm:$0xff]  ;;  %v7087_v38 = vor.u32 %v7879_v18, %v9273_v40  ;;  %4810 = vmatpush.bf16.msrb.mxu3 %v7359_v32  ;;  %v6547_v40 = vor.u32 %v7741_v59, %v6544_v60  ;;  %v6931_v23 = vor.u32 %v7837_v8, %v6928_v30 }
 0x3dd   : > { %v7342_v24 = vld [vmem:[#allocation14 + $0x720] sm:$0xf]  ;;  %v7943_v25 = vld [vmem:[#allocation14 + $0x72c] sm:$0xf0]  ;;  %v7215_v45 = vor.u32 %v7911_v20, %v7214_v37  ;;  %v3125_v5 = vadd.f32 %v3109_v21, %v3091_v42  ;;  %v3127_v50 = vadd.f32 %v3111_v29, %v3093_v27  ;;  %v6675_v37 = vor.u32 %v7773_v0, %v6672_v3  ;;  %v7737_v42 = vld [vmem:[#allocation14 + $0xc4] sm:$0xf] }
 0x3de   : > { %v3099_v26 = vld [vmem:[#allocation3 + $0x60] sm:$0xff]  ;;  %v3101_v15 = vld [vmem:[#allocation3 + $0x78] sm:$0xff]  ;;  %v3092_v33 = vld [vmem:[#allocation3 + $0x68] sm:$0xff]  ;;  %v7343_v57 = vor.u32 %v7943_v25, %v7342_v24  ;;  %4769 = vmatpush.bf16.msrb.mxu0 %v6959_v36  ;;  %4783 = vmatpush.bf16.msrb.mxu1 %v7087_v38  ;;  %v6803_v20 = vor.u32 %v7805_v4, %v6800_v28 }
 0x3df   : > { %v3100_v34 = vld [vmem:[#allocation3 + $0x70] sm:$0xff]  ;;  %v3094_v41 = vld [vmem:[#allocation3 + $0x48] sm:$0xff]  ;;  %v7843_v46 = vld [vmem:[#allocation14 + $0x40c] sm:$0xf0]  ;;  %v3133_v49 = vadd.f32 %v3109_v21, %v3099_v26  ;;  %v3135_v2 = vadd.f32 %v3111_v29, %v3101_v15  ;;  %v3126_v54 = vadd.f32 %v3110_v31, %v3092_v33  ;;  %v3141_v9 = vmax.f32 %v3125_v5, 0.0  ;;  %4797 = vmatpush.bf16.msrb.mxu2 %v7215_v45 }
 0x3e0   : > { %v6942_v39 = vld [vmem:[#allocation14 + $0x400] sm:$0xf]  ;;  %v7875_v48 = vld [vmem:[#allocation14 + $0x50c] sm:$0xf0]  ;;  %v3134_v55 = vadd.f32 %v3110_v31, %v3100_v34  ;;  %v3128_v61 = vadd.f32 %v3112_v35, %v3094_v41  ;;  %v3143_v11 = vmax.f32 %v3127_v50, 0.0  ;;  %4811 = vmatpush.bf16.msrb.mxu3 %v7343_v57 }
 0x3e1   : > { %v3102_v14 = vld [vmem:[#allocation3 + $0x28] sm:$0xff]  ;;  %v7907_v52 = vld [vmem:[#allocation14 + $0x60c] sm:$0xf0]  ;;  %v6943_v63 = vor.u32 %v7843_v46, %v6942_v39  ;;  %v3149_v10 = vmax.f32 %v3133_v49, 0.0  ;;  %v3151_v12 = vmax.f32 %v3135_v2, 0.0  ;;  %v3142_v13 = vmax.f32 %v3126_v54, 0.0 }
 0x3e2   : > { %v7070_v47 = vld [vmem:[#allocation14 + $0x500] sm:$0xf]  ;;  %v7939_v58 = vld [vmem:[#allocation14 + $0x70c] sm:$0xf0]  ;;  %v3136_v62 = vadd.f32 %v3112_v35, %v3102_v14  ;;  %v3150_v16 = vmax.f32 %v3134_v55, 0.0  ;;  %v3144_v18 = vmax.f32 %v3128_v61, 0.0 }
 0x3e3   : > { %v7198_v51 = vld [vmem:[#allocation14 + $0x600] sm:$0xf]  ;;  %v7071_v6 = vor.u32 %v7875_v48, %v7070_v47  ;;  %v6528_v21 = vld [vmem:[#allocation14 + $0xd0] sm:$0xf0]  ;;  %v7769_v22 = vld [vmem:[#allocation14 + $0x1c4] sm:$0xf]  ;;  %4770 = vmatpush.bf16.msrb.mxu0 %v6943_v63  ;;  %v9280_v24 = vpack.c.bf16 %v3149_v10, %v3141_v9  ;;  %v9282_v29 = vpack.c.bf16 %v3151_v12, %v3143_v11 }
 0x3e4   : > { %v7326_v53 = vld [vmem:[#allocation14 + $0x700] sm:$0xf]  ;;  %v7199_v7 = vor.u32 %v7907_v52, %v7198_v51  ;;  %v3152_v19 = vmax.f32 %v3136_v62, 0.0  ;;  %v6656_v25 = vld [vmem:[#allocation14 + $0x1d0] sm:$0xf0]  ;;  %v9284_v31 = vpack.c.bf16 %v3150_v16, %v3142_v13  ;;  %v6531_v34 = vor.u32 %v7737_v42, %v6528_v21 }
 0x3e5   : > { %v7327_v17 = vor.u32 %v7939_v58, %v7326_v53  ;;  %v7801_v26 = vld [vmem:[#allocation14 + $0x2c4] sm:$0xf]  ;;  %v6784_v27 = vld [vmem:[#allocation14 + $0x2d0] sm:$0xf0]  ;;  %4784 = vmatpush.bf16.msrb.mxu1 %v7071_v6  ;;  %v6659_v35 = vor.u32 %v7769_v22, %v6656_v25 }
 0x3e6   : > { %4798 = vmatpush.bf16.msrb.mxu2 %v7199_v7  ;;  %v7833_v32 = vld [vmem:[#allocation14 + $0x3c4] sm:$0xf]  ;;  %v6912_v15 = vld [vmem:[#allocation14 + $0x3d0] sm:$0xf0]  ;;  %v9286_v33 = vpack.c.bf16 %v3152_v19, %v3144_v18  ;;  %v6787_v36 = vor.u32 %v7801_v26, %v6784_v27  ;;  %4771 = vmatmul.bf16.vlgmr.msrb.gmra.mxu0 %v9280_v24 }
 0x3e7   : > { %4812 = vmatpush.bf16.msrb.mxu3 %v7327_v17  ;;  %4819 = vmatpush.bf16.msra.mxu0 %v6547_v40  ;;  %v7733_v38 = vld [vmem:[#allocation14 + $0xa4] sm:$0xf]  ;;  %v6512_v39 = vld [vmem:[#allocation14 + $0xb0] sm:$0xf0]  ;;  %v6915_v14 = vor.u32 %v7833_v32, %v6912_v15 }
 0x3e8   : > { %v7765_v41 = vld [vmem:[#allocation14 + $0x1a4] sm:$0xf]  ;;  %v6640_v45 = vld [vmem:[#allocation14 + $0x1b0] sm:$0xf0]  ;;  %4785 = vmatmul.bf16.vlgmr.msrb.gmra.mxu1 %v9284_v31  ;;  %v6515_v49 = vor.u32 %v7733_v38, %v6512_v39 }
 0x3e9   : > { %4833 = vmatpush.bf16.msra.mxu1 %v6675_v37  ;;  %v7797_v46 = vld [vmem:[#allocation14 + $0x2a4] sm:$0xf]  ;;  %v6768_v47 = vld [vmem:[#allocation14 + $0x2b0] sm:$0xf0]  ;;  %4799 = vmatmul.bf16.vlgmr.msrb.gmra.mxu2 %v9282_v29  ;;  %v6643_v50 = vor.u32 %v7765_v41, %v6640_v45 }
 0x3ea   : > { %4847 = vmatpush.bf16.msra.mxu2 %v6803_v20  ;;  %v7829_v48 = vld [vmem:[#allocation14 + $0x3a4] sm:$0xf]  ;;  %v6896_v5 = vld [vmem:[#allocation14 + $0x3b0] sm:$0xf0]  ;;  %4813 = vmatmul.bf16.vlgmr.msrb.gmra.mxu3 %v9286_v33  ;;  %v6771_v51 = vor.u32 %v7797_v46, %v6768_v47 }
 0x3eb   : > { %4861 = vmatpush.bf16.msra.mxu3 %v6931_v23  ;;  %4820 = vmatpush.bf16.msra.mxu0 %v6531_v34  ;;  %v7729_v52 = vld [vmem:[#allocation14 + $0x84] sm:$0xf]  ;;  %v6496_v53 = vld [vmem:[#allocation14 + $0x90] sm:$0xf0]  ;;  %v6899_v54 = vor.u32 %v7829_v48, %v6896_v5 }
 0x3ec   : > { %v7761_v2 = vld [vmem:[#allocation14 + $0x184] sm:$0xf]  ;;  %v6624_v55 = vld [vmem:[#allocation14 + $0x190] sm:$0xf0]  ;;  %v6499_v61 = vor.u32 %v7729_v52, %v6496_v53 }
 0x3ed   : > { %4834 = vmatpush.bf16.msra.mxu1 %v6659_v35  ;;  %v7793_v57 = vld [vmem:[#allocation14 + $0x284] sm:$0xf]  ;;  %v6752_v58 = vld [vmem:[#allocation14 + $0x290] sm:$0xf0]  ;;  %v6627_v62 = vor.u32 %v7761_v2, %v6624_v55 }
 0x3ee   : > { %4848 = vmatpush.bf16.msra.mxu2 %v6787_v36  ;;  %v7825_v59 = vld [vmem:[#allocation14 + $0x384] sm:$0xf]  ;;  %v6880_v60 = vld [vmem:[#allocation14 + $0x390] sm:$0xf0]  ;;  %v6755_v63 = vor.u32 %v7793_v57, %v6752_v58 }
 0x3ef   : > { %4862 = vmatpush.bf16.msra.mxu3 %v6915_v14  ;;  %4821 = vmatpush.bf16.msra.mxu0 %v6515_v49  ;;  %v7725_v0 = vld [vmem:[#allocation14 + $0x64] sm:$0xf]  ;;  %v6480_v3 = vld [vmem:[#allocation14 + $0x70] sm:$0xf0]  ;;  %v6883_v6 = vor.u32 %v7825_v59, %v6880_v60 }
 0x3f0   : > { %v7757_v4 = vld [vmem:[#allocation14 + $0x164] sm:$0xf]  ;;  %v6608_v7 = vld [vmem:[#allocation14 + $0x170] sm:$0xf0]  ;;  %v6483_v30 = vor.u32 %v7725_v0, %v6480_v3 }
 0x3f1   : > { %4835 = vmatpush.bf16.msra.mxu1 %v6643_v50  ;;  %v7789_v28 = vld [vmem:[#allocation14 + $0x264] sm:$0xf]  ;;  %v6736_v8 = vld [vmem:[#allocation14 + $0x270] sm:$0xf0]  ;;  %v6611_v11 = vor.u32 %v7757_v4, %v6608_v7 }
 0x3f2   : > { %4849 = vmatpush.bf16.msra.mxu2 %v6771_v51  ;;  %v7821_v9 = vld [vmem:[#allocation14 + $0x364] sm:$0xf]  ;;  %v6864_v10 = vld [vmem:[#allocation14 + $0x370] sm:$0xf0]  ;;  %v6739_v12 = vor.u32 %v7789_v28, %v6736_v8 }
 0x3f3   : > { %4863 = vmatpush.bf16.msra.mxu3 %v6899_v54  ;;  %4822 = vmatpush.bf16.msra.mxu0 %v6499_v61  ;;  %v7721_v13 = vld [vmem:[#allocation14 + $0x44] sm:$0xf]  ;;  %v6464_v16 = vld [vmem:[#allocation14 + $0x50] sm:$0xf0]  ;;  %v6867_v40 = vor.u32 %v7821_v9, %v6864_v10 }
 0x3f4   : > { %v7753_v17 = vld [vmem:[#allocation14 + $0x144] sm:$0xf]  ;;  %v6592_v18 = vld [vmem:[#allocation14 + $0x150] sm:$0xf0]  ;;  %v6467_v21 = vor.u32 %v7721_v13, %v6464_v16 }
 0x3f5   : > { %4836 = vmatpush.bf16.msra.mxu1 %v6627_v62  ;;  %v7785_v19 = vld [vmem:[#allocation14 + $0x244] sm:$0xf]  ;;  %v6720_v37 = vld [vmem:[#allocation14 + $0x250] sm:$0xf0]  ;;  %v6595_v22 = vor.u32 %v7753_v17, %v6592_v18 }
 0x3f6   : > { %4850 = vmatpush.bf16.msra.mxu2 %v6755_v63  ;;  %v7817_v20 = vld [vmem:[#allocation14 + $0x344] sm:$0xf]  ;;  %v6848_v42 = vld [vmem:[#allocation14 + $0x350] sm:$0xf0]  ;;  %v6723_v23 = vor.u32 %v7785_v19, %v6720_v37 }
 0x3f7   : > { %4864 = vmatpush.bf16.msra.mxu3 %v6883_v6  ;;  %4823 = vmatpush.bf16.msra.mxu0 %v6483_v30  ;;  %v7717_v25 = vld [vmem:[#allocation14 + $0x24] sm:$0xf]  ;;  %v6448_v26 = vld [vmem:[#allocation14 + $0x30] sm:$0xf0]  ;;  %v6851_v32 = vor.u32 %v7817_v20, %v6848_v42 }
 0x3f8   : > { %v7749_v27 = vld [vmem:[#allocation14 + $0x124] sm:$0xf]  ;;  %v6576_v15 = vld [vmem:[#allocation14 + $0x130] sm:$0xf0]  ;;  %v6451_v39 = vor.u32 %v7717_v25, %v6448_v26 }
 0x3f9   : > { %4837 = vmatpush.bf16.msra.mxu1 %v6611_v11  ;;  %v7781_v34 = vld [vmem:[#allocation14 + $0x224] sm:$0xf]  ;;  %v6704_v35 = vld [vmem:[#allocation14 + $0x230] sm:$0xf0]  ;;  %v6579_v45 = vor.u32 %v7749_v27, %v6576_v15 }
 0x3fa   : > { %4851 = vmatpush.bf16.msra.mxu2 %v6739_v12  ;;  %v7813_v36 = vld [vmem:[#allocation14 + $0x324] sm:$0xf]  ;;  %v6832_v38 = vld [vmem:[#allocation14 + $0x330] sm:$0xf0]  ;;  %v6707_v46 = vor.u32 %v7781_v34, %v6704_v35 }
 0x3fb   : > { %4865 = vmatpush.bf16.msra.mxu3 %v6867_v40  ;;  %4824 = vmatpush.bf16.msra.mxu0 %v6467_v21  ;;  %v7713_v41 = vld [vmem:[#allocation14 + $0x4] sm:$0xf]  ;;  %v6432_v14 = vld [vmem:[#allocation14 + $0x10] sm:$0xf0]  ;;  %v6835_v49 = vor.u32 %v7813_v36, %v6832_v38 }
 0x3fc   : > { %v7745_v47 = vld [vmem:[#allocation14 + $0x104] sm:$0xf]  ;;  %v6560_v48 = vld [vmem:[#allocation14 + $0x110] sm:$0xf0]  ;;  %v6435_v55 = vor.u32 %v7713_v41, %v6432_v14 }
 0x3fd   : > { %4838 = vmatpush.bf16.msra.mxu1 %v6595_v22  ;;  %v7777_v5 = vld [vmem:[#allocation14 + $0x204] sm:$0xf]  ;;  %v6688_v50 = vld [vmem:[#allocation14 + $0x210] sm:$0xf0]  ;;  %v6563_v60 = vor.u32 %v7745_v47, %v6560_v48 }
 0x3fe   : > { %4852 = vmatpush.bf16.msra.mxu2 %v6723_v23  ;;  %v7809_v51 = vld [vmem:[#allocation14 + $0x304] sm:$0xf]  ;;  %v6816_v52 = vld [vmem:[#allocation14 + $0x310] sm:$0xf0]  ;;  %v6691_v61 = vor.u32 %v7777_v5, %v6688_v50 }
 0x3ff   : > { %4866 = vmatpush.bf16.msra.mxu3 %v6851_v32  ;;  %v7869_v53 = vld [vmem:[#allocation14 + $0x4e4] sm:$0xf]  ;;  %v7056_v2 = vld [vmem:[#allocation14 + $0x4f0] sm:$0xf0]  ;;  %4825 = vmatpush.bf16.msra.mxu0 %v6451_v39  ;;  %v6819_v0 = vor.u32 %v7809_v51, %v6816_v52 }
 0x400   : > { %v7901_v54 = vld [vmem:[#allocation14 + $0x5e4] sm:$0xf]  ;;  %v7184_v57 = vld [vmem:[#allocation14 + $0x5f0] sm:$0xf0]  ;;  %v7059_v3 = vor.u32 %v7869_v53, %v7056_v2 }
 0x401   : > { %v7933_v58 = vld [vmem:[#allocation14 + $0x6e4] sm:$0xf]  ;;  %v7312_v59 = vld [vmem:[#allocation14 + $0x6f0] sm:$0xf0]  ;;  %4839 = vmatpush.bf16.msra.mxu1 %v6579_v45  ;;  %v7187_v4 = vor.u32 %v7901_v54, %v7184_v57 }
 0x402   : > { %4853 = vmatpush.bf16.msra.mxu2 %v6707_v46  ;;  %v7965_v62 = vld [vmem:[#allocation14 + $0x7e4] sm:$0xf]  ;;  %v7440_v63 = vld [vmem:[#allocation14 + $0x7f0] sm:$0xf0]  ;;  %v7315_v6 = vor.u32 %v7933_v58, %v7312_v59 }
 0x403   : > { %4867 = vmatpush.bf16.msra.mxu3 %v6835_v49  ;;  %v7865_v7 = vld [vmem:[#allocation14 + $0x4c4] sm:$0xf]  ;;  %v7040_v28 = vld [vmem:[#allocation14 + $0x4d0] sm:$0xf0]  ;;  %4826 = vmatpush.bf16.msra.mxu0 %v6435_v55  ;;  %v7443_v9 = vor.u32 %v7965_v62, %v7440_v63 }
 0x404   : > { %v7897_v8 = vld [vmem:[#allocation14 + $0x5c4] sm:$0xf]  ;;  %v7168_v10 = vld [vmem:[#allocation14 + $0x5d0] sm:$0xf0]  ;;  %v7043_v16 = vor.u32 %v7865_v7, %v7040_v28 }
 0x405   : > { %v7929_v30 = vld [vmem:[#allocation14 + $0x6c4] sm:$0xf]  ;;  %v7296_v11 = vld [vmem:[#allocation14 + $0x6d0] sm:$0xf0]  ;;  %4840 = vmatpush.bf16.msra.mxu1 %v6563_v60  ;;  %v7171_v17 = vor.u32 %v7897_v8, %v7168_v10 }
 0x406   : > { %4854 = vmatpush.bf16.msra.mxu2 %v6691_v61  ;;  %v7961_v12 = vld [vmem:[#allocation14 + $0x7c4] sm:$0xf]  ;;  %v7424_v13 = vld [vmem:[#allocation14 + $0x7d0] sm:$0xf0]  ;;  %v7299_v40 = vor.u32 %v7929_v30, %v7296_v11  ;;  %4827 = vmatmul.bf16.vlgmr.msra.gmra.mxu0 %v9261_v43 }
 0x407   : > { %4868 = vmatpush.bf16.msra.mxu3 %v6819_v0  ;;  %4875 = vmatpush.bf16.msrb.mxu0 %v7059_v3  ;;  %v7861_v18 = vld [vmem:[#allocation14 + $0x4a4] sm:$0xf]  ;;  %v7024_v19 = vld [vmem:[#allocation14 + $0x4b0] sm:$0xf0]  ;;  %v7427_v20 = vor.u32 %v7961_v12, %v7424_v13 }
 0x408   : > { %v7893_v37 = vld [vmem:[#allocation14 + $0x5a4] sm:$0xf]  ;;  %v7152_v42 = vld [vmem:[#allocation14 + $0x5b0] sm:$0xf0]  ;;  %4841 = vmatmul.bf16.vlgmr.msra.gmra.mxu1 %v9266_v56  ;;  %v7027_v26 = vor.u32 %v7861_v18, %v7024_v19 }
 0x409   : > { %4889 = vmatpush.bf16.msrb.mxu1 %v7187_v4  ;;  %v7925_v21 = vld [vmem:[#allocation14 + $0x6a4] sm:$0xf]  ;;  %v7280_v22 = vld [vmem:[#allocation14 + $0x6b0] sm:$0xf0]  ;;  %4855 = vmatmul.bf16.vlgmr.msra.gmra.mxu2 %v9263_v44  ;;  %v7155_v27 = vor.u32 %v7893_v37, %v7152_v42 }
 0x40a   : > { %4903 = vmatpush.bf16.msrb.mxu2 %v7315_v6  ;;  %v7957_v23 = vld [vmem:[#allocation14 + $0x7a4] sm:$0xf]  ;;  %v7408_v25 = vld [vmem:[#allocation14 + $0x7b0] sm:$0xf0]  ;;  %4869 = vmatmul.bf16.vlgmr.msra.gmra.mxu3 %v9270_v1  ;;  %v7283_v32 = vor.u32 %v7925_v21, %v7280_v22 }
 0x40b   : > { %4917 = vmatpush.bf16.msrb.mxu3 %v7443_v9  ;;  %4876 = vmatpush.bf16.msrb.mxu0 %v7043_v16  ;;  %v7857_v15 = vld [vmem:[#allocation14 + $0x484] sm:$0xf]  ;;  %v7008_v34 = vld [vmem:[#allocation14 + $0x490] sm:$0xf0]  ;;  %v7411_v36 = vor.u32 %v7957_v23, %v7408_v25 }
 0x40c   : > { %v7889_v35 = vld [vmem:[#allocation14 + $0x584] sm:$0xf]  ;;  %v7136_v38 = vld [vmem:[#allocation14 + $0x590] sm:$0xf0]  ;;  %v7011_v46 = vor.u32 %v7857_v15, %v7008_v34  ;;  %v6550_v34 = vld [vmem:[#allocation14 + $0xe8] sm:$0xf] }
 0x40d   : > { %4890 = vmatpush.bf16.msrb.mxu1 %v7171_v17  ;;  %v7921_v39 = vld [vmem:[#allocation14 + $0x684] sm:$0xf]  ;;  %v7264_v41 = vld [vmem:[#allocation14 + $0x690] sm:$0xf0]  ;;  %v7139_v47 = vor.u32 %v7889_v35, %v7136_v38  ;;  %v7744_v35 = vld [vmem:[#allocation14 + $0xf4] sm:$0xf0] }
 0x40e   : > { %4904 = vmatpush.bf16.msrb.mxu2 %v7299_v40  ;;  %v7953_v14 = vld [vmem:[#allocation14 + $0x784] sm:$0xf]  ;;  %v7392_v45 = vld [vmem:[#allocation14 + $0x790] sm:$0xf0]  ;;  %v7267_v48 = vor.u32 %v7921_v39, %v7264_v41  ;;  %v7776_v39 = vld [vmem:[#allocation14 + $0x1f4] sm:$0xf0] }
 0x40f   : > { %4918 = vmatpush.bf16.msrb.mxu3 %v7427_v20  ;;  %4877 = vmatpush.bf16.msrb.mxu0 %v7027_v26  ;;  %v7853_v5 = vld [vmem:[#allocation14 + $0x464] sm:$0xf]  ;;  %v6992_v49 = vld [vmem:[#allocation14 + $0x470] sm:$0xf0]  ;;  %v7395_v51 = vor.u32 %v7953_v14, %v7392_v45  ;;  %v6806_v41 = vld [vmem:[#allocation14 + $0x2e8] sm:$0xf] }
 0x410   : > { %v7885_v50 = vld [vmem:[#allocation14 + $0x564] sm:$0xf]  ;;  %v7120_v52 = vld [vmem:[#allocation14 + $0x570] sm:$0xf0]  ;;  %v6995_v57 = vor.u32 %v7853_v5, %v6992_v49  ;;  %v7808_v14 = vld [vmem:[#allocation14 + $0x2f4] sm:$0xf0]  ;;  %v6551_v49 = vor.u32 %v7744_v35, %v6550_v34 }
 0x411   : > { %4891 = vmatpush.bf16.msrb.mxu1 %v7155_v27  ;;  %v7917_v53 = vld [vmem:[#allocation14 + $0x664] sm:$0xf]  ;;  %v7248_v2 = vld [vmem:[#allocation14 + $0x670] sm:$0xf0]  ;;  %v7123_v58 = vor.u32 %v7885_v50, %v7120_v52  ;;  %v6534_v52 = vld [vmem:[#allocation14 + $0xc8] sm:$0xf] }
 0x412   : > { %4905 = vmatpush.bf16.msrb.mxu2 %v7283_v32  ;;  %v7949_v54 = vld [vmem:[#allocation14 + $0x764] sm:$0xf]  ;;  %v7376_v55 = vld [vmem:[#allocation14 + $0x770] sm:$0xf0]  ;;  %v7251_v59 = vor.u32 %v7917_v53, %v7248_v2  ;;  %v7740_v53 = vld [vmem:[#allocation14 + $0xd4] sm:$0xf0] }
 0x413   : > { %4919 = vmatpush.bf16.msrb.mxu3 %v7411_v36  ;;  %4878 = vmatpush.bf16.msrb.mxu0 %v7011_v46  ;;  %v7849_v60 = vld [vmem:[#allocation14 + $0x444] sm:$0xf]  ;;  %v6976_v61 = vld [vmem:[#allocation14 + $0x450] sm:$0xf0]  ;;  %v7379_v63 = vor.u32 %v7949_v54, %v7376_v55  ;;  %v6678_v36 = vld [vmem:[#allocation14 + $0x1e8] sm:$0xf] }
 0x414   : > { %v7881_v62 = vld [vmem:[#allocation14 + $0x544] sm:$0xf]  ;;  %v7104_v0 = vld [vmem:[#allocation14 + $0x550] sm:$0xf0]  ;;  %v6979_v28 = vor.u32 %v7849_v60, %v6976_v61  ;;  %v6679_v50 = vor.u32 %v7776_v39, %v6678_v36  ;;  %v6662_v2 = vld [vmem:[#allocation14 + $0x1c8] sm:$0xf]  ;;  %v6535_v61 = vor.u32 %v7740_v53, %v6534_v52 }
 0x415   : > { %4892 = vmatpush.bf16.msrb.mxu1 %v7139_v47  ;;  %v7913_v3 = vld [vmem:[#allocation14 + $0x644] sm:$0xf]  ;;  %v7232_v4 = vld [vmem:[#allocation14 + $0x650] sm:$0xf0]  ;;  %v7107_v8 = vor.u32 %v7881_v62, %v7104_v0  ;;  %v6934_v47 = vld [vmem:[#allocation14 + $0x3e8] sm:$0xf] }
 0x416   : > { %4906 = vmatpush.bf16.msrb.mxu2 %v7267_v48  ;;  %v7945_v6 = vld [vmem:[#allocation14 + $0x744] sm:$0xf]  ;;  %v7360_v7 = vld [vmem:[#allocation14 + $0x750] sm:$0xf0]  ;;  %v7235_v9 = vor.u32 %v7913_v3, %v7232_v4  ;;  %v7840_v48 = vld [vmem:[#allocation14 + $0x3f4] sm:$0xf0] }
 0x417   : > { %4920 = vmatpush.bf16.msrb.mxu3 %v7395_v51  ;;  %4879 = vmatpush.bf16.msrb.mxu0 %v6995_v57  ;;  %v7845_v10 = vld [vmem:[#allocation14 + $0x424] sm:$0xf]  ;;  %v6960_v30 = vld [vmem:[#allocation14 + $0x430] sm:$0xf0]  ;;  %v7363_v12 = vor.u32 %v7945_v6, %v7360_v7  ;;  %v6807_v51 = vor.u32 %v7808_v14, %v6806_v41  ;;  %v6935_v54 = vor.u32 %v7840_v48, %v6934_v47  ;;  %v7772_v55 = vld [vmem:[#allocation14 + $0x1d4] sm:$0xf0] }
 0x418   : > { %v7877_v11 = vld [vmem:[#allocation14 + $0x524] sm:$0xf]  ;;  %v7088_v13 = vld [vmem:[#allocation14 + $0x530] sm:$0xf0]  ;;  %v6963_v19 = vor.u32 %v7845_v10, %v6960_v30  ;;  %v6790_v57 = vld [vmem:[#allocation14 + $0x2c8] sm:$0xf]  ;;  %v6663_v62 = vor.u32 %v7772_v55, %v6662_v2 }
 0x419   : > { %4893 = vmatpush.bf16.msrb.mxu1 %v7123_v58  ;;  %v7909_v16 = vld [vmem:[#allocation14 + $0x624] sm:$0xf]  ;;  %v7216_v17 = vld [vmem:[#allocation14 + $0x630] sm:$0xf0]  ;;  %v7091_v42 = vor.u32 %v7877_v11, %v7088_v13  ;;  %v7804_v58 = vld [vmem:[#allocation14 + $0x2d4] sm:$0xf0] }
 0x41a   : > { %4907 = vmatpush.bf16.msrb.mxu2 %v7251_v59  ;;  %v7941_v40 = vld [vmem:[#allocation14 + $0x724] sm:$0xf]  ;;  %v7344_v18 = vld [vmem:[#allocation14 + $0x730] sm:$0xf0]  ;;  %v7219_v21 = vor.u32 %v7909_v16, %v7216_v17  ;;  %v6918_v59 = vld [vmem:[#allocation14 + $0x3c8] sm:$0xf] }
 0x41b   : > { %4921 = vmatpush.bf16.msrb.mxu3 %v7379_v63  ;;  %4880 = vmatpush.bf16.msrb.mxu0 %v6979_v28  ;;  %v7841_v37 = vld [vmem:[#allocation14 + $0x404] sm:$0xf]  ;;  %v6944_v20 = vld [vmem:[#allocation14 + $0x410] sm:$0xf0]  ;;  %v7347_v26 = vor.u32 %v7941_v40, %v7344_v18  ;;  %v7836_v60 = vld [vmem:[#allocation14 + $0x3d4] sm:$0xf0]  ;;  %v6791_v63 = vor.u32 %v7804_v58, %v6790_v57 }
 0x41c   : > { %v7873_v22 = vld [vmem:[#allocation14 + $0x504] sm:$0xf]  ;;  %v7072_v23 = vld [vmem:[#allocation14 + $0x510] sm:$0xf0]  ;;  %v6947_v38 = vor.u32 %v7841_v37, %v6944_v20  ;;  %v6518_v0 = vld [vmem:[#allocation14 + $0xa8] sm:$0xf]  ;;  %v6919_v6 = vor.u32 %v7836_v60, %v6918_v59 }
 0x41d   : > { %4894 = vmatpush.bf16.msrb.mxu1 %v7107_v8  ;;  %v7905_v25 = vld [vmem:[#allocation14 + $0x604] sm:$0xf]  ;;  %v7200_v27 = vld [vmem:[#allocation14 + $0x610] sm:$0xf0]  ;;  %v7075_v45 = vor.u32 %v7873_v22, %v7072_v23  ;;  %v7736_v3 = vld [vmem:[#allocation14 + $0xb4] sm:$0xf0] }
 0x41e   : > { %4908 = vmatpush.bf16.msrb.mxu2 %v7235_v9  ;;  %v7937_v32 = vld [vmem:[#allocation14 + $0x704] sm:$0xf]  ;;  %v7328_v15 = vld [vmem:[#allocation14 + $0x710] sm:$0xf0]  ;;  %v7203_v46 = vor.u32 %v7905_v25, %v7200_v27  ;;  %v6646_v4 = vld [vmem:[#allocation14 + $0x1a8] sm:$0xf]  ;;  %v6519_v30 = vor.u32 %v7736_v3, %v6518_v0 }
 0x41f   : > { %4922 = vmatpush.bf16.msrb.mxu3 %v7363_v12  ;;  %4881 = vmatpush.bf16.msrb.mxu0 %v6963_v19  ;;  %v7331_v5 = vor.u32 %v7937_v32, %v7328_v15  ;;  %v7768_v7 = vld [vmem:[#allocation14 + $0x1b4] sm:$0xf0]  ;;  %v6774_v28 = vld [vmem:[#allocation14 + $0x2a8] sm:$0xf] }
 0x420   : > { %v7800_v8 = vld [vmem:[#allocation14 + $0x2b4] sm:$0xf0]  ;;  %v6902_v9 = vld [vmem:[#allocation14 + $0x3a8] sm:$0xf]  ;;  %v6647_v11 = vor.u32 %v7768_v7, %v6646_v4 }
 0x421   : > { %4895 = vmatpush.bf16.msrb.mxu1 %v7091_v42  ;;  %v7832_v10 = vld [vmem:[#allocation14 + $0x3b4] sm:$0xf0]  ;;  %v6775_v12 = vor.u32 %v7800_v8, %v6774_v28  ;;  %v6502_v13 = vld [vmem:[#allocation14 + $0x88] sm:$0xf] }
 0x422   : > { %4909 = vmatpush.bf16.msrb.mxu2 %v7219_v21  ;;  %v7732_v16 = vld [vmem:[#allocation14 + $0x94] sm:$0xf0]  ;;  %v6630_v17 = vld [vmem:[#allocation14 + $0x188] sm:$0xf]  ;;  %v6903_v40 = vor.u32 %v7832_v10, %v6902_v9 }
 0x423   : > { %4923 = vmatpush.bf16.msrb.mxu3 %v7347_v26  ;;  %4882 = vmatpush.bf16.msrb.mxu0 %v6947_v38  ;;  %v7764_v18 = vld [vmem:[#allocation14 + $0x194] sm:$0xf0]  ;;  %v6758_v19 = vld [vmem:[#allocation14 + $0x288] sm:$0xf]  ;;  %v6503_v21 = vor.u32 %v7732_v16, %v6502_v13 }
 0x424   : > { %v7796_v37 = vld [vmem:[#allocation14 + $0x294] sm:$0xf0]  ;;  %v6886_v20 = vld [vmem:[#allocation14 + $0x388] sm:$0xf]  ;;  %v6631_v22 = vor.u32 %v7764_v18, %v6630_v17 }
 0x425   : > { %4896 = vmatpush.bf16.msrb.mxu1 %v7075_v45  ;;  %v7828_v42 = vld [vmem:[#allocation14 + $0x394] sm:$0xf0]  ;;  %v6759_v23 = vor.u32 %v7796_v37, %v6758_v19  ;;  %v6486_v25 = vld [vmem:[#allocation14 + $0x68] sm:$0xf] }
 0x426   : > { %4910 = vmatpush.bf16.msrb.mxu2 %v7203_v46  ;;  %4883 = vmatmul.bf16.vlgmr.msrb.gmra.mxu0 %v9280_v24  ;;  %v7728_v26 = vld [vmem:[#allocation14 + $0x74] sm:$0xf0]  ;;  %v6614_v27 = vld [vmem:[#allocation14 + $0x168] sm:$0xf]  ;;  %v6887_v32 = vor.u32 %v7828_v42, %v6886_v20 }
 0x427   : > { %4924 = vmatpush.bf16.msrb.mxu3 %v7331_v5  ;;  %4931 = vmatpush.bf16.msra.mxu0 %v6551_v49  ;;  %v7760_v15 = vld [vmem:[#allocation14 + $0x174] sm:$0xf0]  ;;  %v6742_v34 = vld [vmem:[#allocation14 + $0x268] sm:$0xf]  ;;  %v6487_v39 = vor.u32 %v7728_v26, %v6486_v25 }
 0x428   : > { %4897 = vmatmul.bf16.vlgmr.msrb.gmra.mxu1 %v9284_v31  ;;  %v7792_v35 = vld [vmem:[#allocation14 + $0x274] sm:$0xf0]  ;;  %v6870_v36 = vld [vmem:[#allocation14 + $0x368] sm:$0xf]  ;;  %v6615_v41 = vor.u32 %v7760_v15, %v6614_v27 }
 0x429   : > { %4945 = vmatpush.bf16.msra.mxu1 %v6679_v50  ;;  %4911 = vmatmul.bf16.vlgmr.msrb.gmra.mxu2 %v9282_v29  ;;  %v7824_v38 = vld [vmem:[#allocation14 + $0x374] sm:$0xf0]  ;;  %v6743_v14 = vor.u32 %v7792_v35, %v6742_v34  ;;  %v6470_v45 = vld [vmem:[#allocation14 + $0x48] sm:$0xf] }
 0x42a   : > { %4959 = vmatpush.bf16.msra.mxu2 %v6807_v51  ;;  %4925 = vmatmul.bf16.vlgmr.msrb.gmra.mxu3 %v9286_v33  ;;  %v7724_v46 = vld [vmem:[#allocation14 + $0x54] sm:$0xf0]  ;;  %v6598_v47 = vld [vmem:[#allocation14 + $0x148] sm:$0xf]  ;;  %v6871_v48 = vor.u32 %v7824_v38, %v6870_v36 }
 0x42b   : > { %4973 = vmatpush.bf16.msra.mxu3 %v6935_v54  ;;  %4932 = vmatpush.bf16.msra.mxu0 %v6535_v61  ;;  %v7756_v5 = vld [vmem:[#allocation14 + $0x154] sm:$0xf0]  ;;  %v6726_v49 = vld [vmem:[#allocation14 + $0x248] sm:$0xf]  ;;  %v6471_v53 = vor.u32 %v7724_v46, %v6470_v45 }
 0x42c   : > { %v7788_v50 = vld [vmem:[#allocation14 + $0x254] sm:$0xf0]  ;;  %v6854_v51 = vld [vmem:[#allocation14 + $0x348] sm:$0xf]  ;;  %v6599_v2 = vor.u32 %v7756_v5, %v6598_v47 }
 0x42d   : > { %4946 = vmatpush.bf16.msra.mxu1 %v6663_v62  ;;  %v7820_v52 = vld [vmem:[#allocation14 + $0x354] sm:$0xf0]  ;;  %v6727_v54 = vor.u32 %v7788_v50, %v6726_v49  ;;  %v6454_v55 = vld [vmem:[#allocation14 + $0x28] sm:$0xf] }
 0x42e   : > { %4960 = vmatpush.bf16.msra.mxu2 %v6791_v63  ;;  %v7720_v57 = vld [vmem:[#allocation14 + $0x34] sm:$0xf0]  ;;  %v6582_v58 = vld [vmem:[#allocation14 + $0x128] sm:$0xf]  ;;  %v6855_v59 = vor.u32 %v7820_v52, %v6854_v51 }
 0x42f   : > { %4974 = vmatpush.bf16.msra.mxu3 %v6919_v6  ;;  %4933 = vmatpush.bf16.msra.mxu0 %v6519_v30  ;;  %v7752_v60 = vld [vmem:[#allocation14 + $0x134] sm:$0xf0]  ;;  %v6710_v61 = vld [vmem:[#allocation14 + $0x228] sm:$0xf]  ;;  %v6455_v3 = vor.u32 %v7720_v57, %v6454_v55 }
 0x430   : > { %v7784_v62 = vld [vmem:[#allocation14 + $0x234] sm:$0xf0]  ;;  %v6838_v63 = vld [vmem:[#allocation14 + $0x328] sm:$0xf]  ;;  %v6583_v7 = vor.u32 %v7752_v60, %v6582_v58 }
 0x431   : > { %4947 = vmatpush.bf16.msra.mxu1 %v6647_v11  ;;  %v7816_v0 = vld [vmem:[#allocation14 + $0x334] sm:$0xf0]  ;;  %v6438_v4 = vld [vmem:[#allocation14 + $0x8] sm:$0xf]  ;;  %v6711_v28 = vor.u32 %v7784_v62, %v6710_v61 }
 0x432   : > { %4961 = vmatpush.bf16.msra.mxu2 %v6775_v12  ;;  %v7716_v6 = vld [vmem:[#allocation14 + $0x14] sm:$0xf0]  ;;  %v6566_v8 = vld [vmem:[#allocation14 + $0x108] sm:$0xf]  ;;  %v6839_v30 = vor.u32 %v7816_v0, %v6838_v63 }
 0x433   : > { %4975 = vmatpush.bf16.msra.mxu3 %v6903_v40  ;;  %4934 = vmatpush.bf16.msra.mxu0 %v6503_v21  ;;  %v7748_v9 = vld [vmem:[#allocation14 + $0x114] sm:$0xf0]  ;;  %v6694_v10 = vld [vmem:[#allocation14 + $0x208] sm:$0xf]  ;;  %v6439_v18 = vor.u32 %v7716_v6, %v6438_v4 }
 0x434   : > { %v7780_v11 = vld [vmem:[#allocation14 + $0x214] sm:$0xf0]  ;;  %v6822_v12 = vld [vmem:[#allocation14 + $0x308] sm:$0xf]  ;;  %v6567_v42 = vor.u32 %v7748_v9, %v6566_v8 }
 0x435   : > { %4948 = vmatpush.bf16.msra.mxu1 %v6631_v22  ;;  %v7812_v13 = vld [vmem:[#allocation14 + $0x314] sm:$0xf0]  ;;  %v7062_v16 = vld [vmem:[#allocation14 + $0x4e8] sm:$0xf]  ;;  %v6695_v21 = vor.u32 %v7780_v11, %v6694_v10 }
 0x436   : > { %4962 = vmatpush.bf16.msra.mxu2 %v6759_v23  ;;  %v7872_v17 = vld [vmem:[#allocation14 + $0x4f4] sm:$0xf0]  ;;  %v7190_v40 = vld [vmem:[#allocation14 + $0x5e8] sm:$0xf]  ;;  %v6823_v25 = vor.u32 %v7812_v13, %v6822_v12  ;;  %v9304_v12 = vld [vmem:[#allocation16] sm:$0xf] }
 0x437   : > { %4976 = vmatpush.bf16.msra.mxu3 %v6887_v32  ;;  %4935 = vmatpush.bf16.msra.mxu0 %v6487_v39  ;;  %v7904_v19 = vld [vmem:[#allocation14 + $0x5f4] sm:$0xf0]  ;;  %v7318_v37 = vld [vmem:[#allocation14 + $0x6e8] sm:$0xf]  ;;  %v7063_v26 = vor.u32 %v7872_v17, %v7062_v16 }
 0x438   : > { %v7936_v20 = vld [vmem:[#allocation14 + $0x6f4] sm:$0xf0]  ;;  %v7446_v22 = vld [vmem:[#allocation14 + $0x7e8] sm:$0xf]  ;;  %v7191_v27 = vor.u32 %v7904_v19, %v7190_v40 }
 0x439   : > { %4949 = vmatpush.bf16.msra.mxu1 %v6615_v41  ;;  %v7968_v23 = vld [vmem:[#allocation14 + $0x7f4] sm:$0xf0]  ;;  %v7319_v32 = vor.u32 %v7936_v20, %v7318_v37  ;;  %v7046_v15 = vld [vmem:[#allocation14 + $0x4c8] sm:$0xf]  ;;  %v3419_v20 = vperm.slane %v9304_v12, 0 }
 0x43a   : > { %4963 = vmatpush.bf16.msra.mxu2 %v6743_v14  ;;  %v7868_v34 = vld [vmem:[#allocation14 + $0x4d4] sm:$0xf0]  ;;  %v7174_v35 = vld [vmem:[#allocation14 + $0x5c8] sm:$0xf]  ;;  %v7447_v36 = vor.u32 %v7968_v23, %v7446_v22 }
 0x43b   : > { %4977 = vmatpush.bf16.msra.mxu3 %v6871_v48  ;;  %4936 = vmatpush.bf16.msra.mxu0 %v6471_v53  ;;  %v7900_v38 = vld [vmem:[#allocation14 + $0x5d4] sm:$0xf0]  ;;  %v7302_v39 = vld [vmem:[#allocation14 + $0x6c8] sm:$0xf]  ;;  %v7047_v46 = vor.u32 %v7868_v34, %v7046_v15 }
 0x43c   : > { %v7932_v41 = vld [vmem:[#allocation14 + $0x6d4] sm:$0xf0]  ;;  %v7430_v14 = vld [vmem:[#allocation14 + $0x7c8] sm:$0xf]  ;;  %v7175_v47 = vor.u32 %v7900_v38, %v7174_v35 }
 0x43d   : > { %4950 = vmatpush.bf16.msra.mxu1 %v6599_v2  ;;  %v7964_v45 = vld [vmem:[#allocation14 + $0x7d4] sm:$0xf0]  ;;  %v7303_v48 = vor.u32 %v7932_v41, %v7302_v39  ;;  %v7030_v5 = vld [vmem:[#allocation14 + $0x4a8] sm:$0xf] }
 0x43e   : > { %4964 = vmatpush.bf16.msra.mxu2 %v6727_v54  ;;  %v7864_v49 = vld [vmem:[#allocation14 + $0x4b4] sm:$0xf0]  ;;  %v7158_v50 = vld [vmem:[#allocation14 + $0x5a8] sm:$0xf]  ;;  %v7431_v51 = vor.u32 %v7964_v45, %v7430_v14 }
 0x43f   : > { %4978 = vmatpush.bf16.msra.mxu3 %v6855_v59  ;;  %4937 = vmatpush.bf16.msra.mxu0 %v6455_v3  ;;  %v7896_v52 = vld [vmem:[#allocation14 + $0x5b4] sm:$0xf0]  ;;  %v7286_v53 = vld [vmem:[#allocation14 + $0x6a8] sm:$0xf]  ;;  %v7031_v57 = vor.u32 %v7864_v49, %v7030_v5 }
 0x440   : > { %v7928_v2 = vld [vmem:[#allocation14 + $0x6b4] sm:$0xf0]  ;;  %v7414_v54 = vld [vmem:[#allocation14 + $0x7a8] sm:$0xf]  ;;  %v7159_v58 = vor.u32 %v7896_v52, %v7158_v50 }
 0x441   : > { %4951 = vmatpush.bf16.msra.mxu1 %v6583_v7  ;;  %v7960_v55 = vld [vmem:[#allocation14 + $0x7b4] sm:$0xf0]  ;;  %v7287_v59 = vor.u32 %v7928_v2, %v7286_v53  ;;  %v7014_v60 = vld [vmem:[#allocation14 + $0x488] sm:$0xf] }
 0x442   : > { %4965 = vmatpush.bf16.msra.mxu2 %v6711_v28  ;;  %v7860_v61 = vld [vmem:[#allocation14 + $0x494] sm:$0xf0]  ;;  %v7142_v62 = vld [vmem:[#allocation14 + $0x588] sm:$0xf]  ;;  %v7415_v63 = vor.u32 %v7960_v55, %v7414_v54 }
 0x443   : > { %4979 = vmatpush.bf16.msra.mxu3 %v6839_v30  ;;  %4938 = vmatpush.bf16.msra.mxu0 %v6439_v18  ;;  %v7892_v0 = vld [vmem:[#allocation14 + $0x594] sm:$0xf0]  ;;  %v7270_v3 = vld [vmem:[#allocation14 + $0x688] sm:$0xf]  ;;  %v7015_v28 = vor.u32 %v7860_v61, %v7014_v60 }
 0x444   : > { %v7924_v4 = vld [vmem:[#allocation14 + $0x694] sm:$0xf0]  ;;  %v7398_v6 = vld [vmem:[#allocation14 + $0x788] sm:$0xf]  ;;  %v7143_v9 = vor.u32 %v7892_v0, %v7142_v62 }
 0x445   : > { %4952 = vmatpush.bf16.msra.mxu1 %v6567_v42  ;;  %v7956_v7 = vld [vmem:[#allocation14 + $0x794] sm:$0xf0]  ;;  %v6998_v8 = vld [vmem:[#allocation14 + $0x468] sm:$0xf]  ;;  %v7271_v10 = vor.u32 %v7924_v4, %v7270_v3 }
 0x446   : > { %4966 = vmatpush.bf16.msra.mxu2 %v6695_v21  ;;  %4939 = vmatmul.bf16.vlgmr.msra.gmra.mxu0 %v9261_v43  ;;  %v7856_v30 = vld [vmem:[#allocation14 + $0x474] sm:$0xf0]  ;;  %v7126_v11 = vld [vmem:[#allocation14 + $0x568] sm:$0xf]  ;;  %v7399_v13 = vor.u32 %v7956_v7, %v7398_v6 }
 0x447   : > { %4980 = vmatpush.bf16.msra.mxu3 %v6823_v25  ;;  %4987 = vmatpush.bf16.msrb.mxu0 %v7063_v26  ;;  %v7888_v16 = vld [vmem:[#allocation14 + $0x574] sm:$0xf0]  ;;  %v7254_v17 = vld [vmem:[#allocation14 + $0x668] sm:$0xf]  ;;  %v6999_v37 = vor.u32 %v7856_v30, %v6998_v8  ;;  %v6552_v8 = vld [vmem:[#allocation14 + $0xf8] sm:$0xf0] }
 0x448   : > { %4953 = vmatmul.bf16.vlgmr.msra.gmra.mxu1 %v9266_v56  ;;  %v7920_v40 = vld [vmem:[#allocation14 + $0x674] sm:$0xf0]  ;;  %v7382_v18 = vld [vmem:[#allocation14 + $0x768] sm:$0xf]  ;;  %v7127_v42 = vor.u32 %v7888_v16, %v7126_v11  ;;  %v6680_v11 = vld [vmem:[#allocation14 + $0x1f8] sm:$0xf0] }
 0x449   : > { %5001 = vmatpush.bf16.msrb.mxu1 %v7191_v27  ;;  %4967 = vmatmul.bf16.vlgmr.msra.gmra.mxu2 %v9263_v44  ;;  %v7952_v19 = vld [vmem:[#allocation14 + $0x774] sm:$0xf0]  ;;  %v7255_v21 = vor.u32 %v7920_v40, %v7254_v17  ;;  %v6982_v22 = vld [vmem:[#allocation14 + $0x448] sm:$0xf]  ;;  %v6808_v16 = vld [vmem:[#allocation14 + $0x2f8] sm:$0xf0] }
 0x44a   : > { %5015 = vmatpush.bf16.msrb.mxu2 %v7319_v32  ;;  %4981 = vmatmul.bf16.vlgmr.msra.gmra.mxu3 %v9270_v1  ;;  %v7852_v23 = vld [vmem:[#allocation14 + $0x454] sm:$0xf0]  ;;  %v7110_v25 = vld [vmem:[#allocation14 + $0x548] sm:$0xf]  ;;  %v7383_v26 = vor.u32 %v7952_v19, %v7382_v18  ;;  %v7838_v19 = vld [vmem:[#allocation14 + $0x3ec] sm:$0xf] }
 0x44b   : > { %5029 = vmatpush.bf16.msrb.mxu3 %v7447_v36  ;;  %4988 = vmatpush.bf16.msrb.mxu0 %v7047_v46  ;;  %v7884_v27 = vld [vmem:[#allocation14 + $0x554] sm:$0xf0]  ;;  %v7238_v32 = vld [vmem:[#allocation14 + $0x648] sm:$0xf]  ;;  %v6983_v38 = vor.u32 %v7852_v23, %v6982_v22 }
 0x44c   : > { %v7916_v15 = vld [vmem:[#allocation14 + $0x654] sm:$0xf0]  ;;  %v7366_v34 = vld [vmem:[#allocation14 + $0x748] sm:$0xf]  ;;  %v7111_v14 = vor.u32 %v7884_v27, %v7110_v25 }
 0x44d   : > { %5002 = vmatpush.bf16.msrb.mxu1 %v7175_v47  ;;  %v7948_v35 = vld [vmem:[#allocation14 + $0x754] sm:$0xf0]  ;;  %v4716_v36 = vpop.f32.mrf.mxu0  ;;  %v7239_v45 = vor.u32 %v7916_v15, %v7238_v32  ;;  %v6966_v46 = vld [vmem:[#allocation14 + $0x428] sm:$0xf]  ;;  %v7738_v15 = vld [vmem:[#allocation14 + $0xcc] sm:$0xf] }
 0x44e   : > { %5016 = vmatpush.bf16.msrb.mxu2 %v7303_v48  ;;  %v4717_v39 = vadd.f32 %v4716_v36, %v3419_v20  ;;  %v7848_v47 = vld [vmem:[#allocation14 + $0x434] sm:$0xf0]  ;;  %v7094_v48 = vld [vmem:[#allocation14 + $0x528] sm:$0xf]  ;;  %v7367_v5 = vor.u32 %v7948_v35, %v7366_v34  ;;  %v6536_v34 = vld [vmem:[#allocation14 + $0xd8] sm:$0xf0] }
 0x44f   : > { %5030 = vmatpush.bf16.msrb.mxu3 %v7431_v51  ;;  %4989 = vmatpush.bf16.msrb.mxu0 %v7031_v57  ;;  %v7880_v49 = vld [vmem:[#allocation14 + $0x534] sm:$0xf0]  ;;  %v7222_v50 = vld [vmem:[#allocation14 + $0x628] sm:$0xf]  ;;  %v6967_v55 = vor.u32 %v7848_v47, %v6966_v46  ;;  %v7770_v35 = vld [vmem:[#allocation14 + $0x1cc] sm:$0xf]  ;;  %v6539_v47 = vor.u32 %v7738_v15, %v6536_v34 }
 0x450   : > { %v7912_v51 = vld [vmem:[#allocation14 + $0x634] sm:$0xf0]  ;;  %v7350_v53 = vld [vmem:[#allocation14 + $0x728] sm:$0xf]  ;;  %v7095_v60 = vor.u32 %v7880_v49, %v7094_v48  ;;  %v6920_v46 = vld [vmem:[#allocation14 + $0x3d8] sm:$0xf0] }
 0x451   : > { %5003 = vmatpush.bf16.msrb.mxu1 %v7159_v58  ;;  %v7944_v2 = vld [vmem:[#allocation14 + $0x734] sm:$0xf0]  ;;  %v6950_v57 = vld [vmem:[#allocation14 + $0x408] sm:$0xf]  ;;  %v7223_v61 = vor.u32 %v7912_v51, %v7222_v50  ;;  %v7734_v49 = vld [vmem:[#allocation14 + $0xac] sm:$0xf] }
 0x452   : > { %5017 = vmatpush.bf16.msrb.mxu2 %v7287_v59  ;;  %v4730_v41 = vpop.f32.mrf.mxu1  ;;  %v7844_v58 = vld [vmem:[#allocation14 + $0x414] sm:$0xf0]  ;;  %v7078_v62 = vld [vmem:[#allocation14 + $0x508] sm:$0xf]  ;;  %v7351_v3 = vor.u32 %v7944_v2, %v7350_v53  ;;  %v6520_v50 = vld [vmem:[#allocation14 + $0xb8] sm:$0xf0] }
 0x453   : > { %5031 = vmatpush.bf16.msrb.mxu3 %v7415_v63  ;;  %4990 = vmatpush.bf16.msrb.mxu0 %v7015_v28  ;;  %v4731_v52 = vadd.f32 %v4730_v41, %v4717_v39  ;;  %v7876_v63 = vld [vmem:[#allocation14 + $0x514] sm:$0xf0]  ;;  %v7206_v0 = vld [vmem:[#allocation14 + $0x608] sm:$0xf]  ;;  %v7742_v28 = vld [vmem:[#allocation14 + $0xec] sm:$0xf]  ;;  %v6951_v30 = vor.u32 %v7844_v58, %v6950_v57  ;;  %v6523_v58 = vor.u32 %v7734_v49, %v6520_v50 }
 0x454   : > { %v4744_v54 = vpop.f32.mrf.mxu2  ;;  %v7908_v4 = vld [vmem:[#allocation14 + $0x614] sm:$0xf0]  ;;  %v7334_v6 = vld [vmem:[#allocation14 + $0x708] sm:$0xf]  ;;  %v7079_v40 = vor.u32 %v7876_v63, %v7078_v62  ;;  %v6555_v22 = vor.u32 %v7742_v28, %v6552_v8  ;;  %v7802_v39 = vld [vmem:[#allocation14 + $0x2cc] sm:$0xf] }
 0x455   : > { %5004 = vmatpush.bf16.msrb.mxu1 %v7143_v9  ;;  %v4745_v59 = vadd.f32 %v4744_v54, %v4731_v52  ;;  %v7940_v7 = vld [vmem:[#allocation14 + $0x714] sm:$0xf0]  ;;  %v7774_v9 = vld [vmem:[#allocation14 + $0x1ec] sm:$0xf]  ;;  %v7207_v18 = vor.u32 %v7908_v4, %v7206_v0  ;;  %v6792_v41 = vld [vmem:[#allocation14 + $0x2d8] sm:$0xf0] }
 0x456   : > { %5018 = vmatpush.bf16.msrb.mxu2 %v7271_v10  ;;  %v4718_v10 = vpop.f32.mrf.mxu0  ;;  %v7766_v51 = vld [vmem:[#allocation14 + $0x1ac] sm:$0xf]  ;;  %v6648_v53 = vld [vmem:[#allocation14 + $0x1b8] sm:$0xf0] }
 0x457   : > { %5032 = vmatpush.bf16.msrb.mxu3 %v7399_v13  ;;  %4991 = vmatpush.bf16.msrb.mxu0 %v6999_v37  ;;  %v7806_v13 = vld [vmem:[#allocation14 + $0x2ec] sm:$0xf]  ;;  %v4719_v17 = vadd.f32 %v4718_v10, %v3419_v20  ;;  %v6936_v37 = vld [vmem:[#allocation14 + $0x3f8] sm:$0xf0] }
 0x458   : > { %v4758_v23 = vpop.f32.mrf.mxu3  ;;  %v6811_v27 = vor.u32 %v7806_v13, %v6808_v16  ;;  %v6939_v20 = vor.u32 %v7838_v19, %v6936_v37  ;;  %v7798_v2 = vld [vmem:[#allocation14 + $0x2ac] sm:$0xf]  ;;  %v6776_v54 = vld [vmem:[#allocation14 + $0x2b8] sm:$0xf0] }
 0x459   : > { %5005 = vmatpush.bf16.msrb.mxu1 %v7127_v42  ;;  %v4759_v32 = vadd.f32 %v4758_v23, %v4745_v59  ;;  %v6904_v57 = vld [vmem:[#allocation14 + $0x3b8] sm:$0xf0]  ;;  %v7730_v63 = vld [vmem:[#allocation14 + $0x8c] sm:$0xf] }
 0x45a   : > { %5019 = vmatpush.bf16.msrb.mxu2 %v7255_v21  ;;  %v4732_v42 = vpop.f32.mrf.mxu1  ;;  %v7335_v21 = vor.u32 %v7940_v7, %v7334_v6  ;;  %v6504_v0 = vld [vmem:[#allocation14 + $0x98] sm:$0xf0]  ;;  %v7794_v7 = vld [vmem:[#allocation14 + $0x28c] sm:$0xf] }
 0x45b   : > { %5033 = vmatpush.bf16.msrb.mxu3 %v7383_v26  ;;  %4992 = vmatpush.bf16.msrb.mxu0 %v6983_v38  ;;  %v4733_v25 = vadd.f32 %v4732_v42, %v4719_v17  ;;  %v6683_v26 = vor.u32 %v7774_v9, %v6680_v11  ;;  %v6664_v38 = vld [vmem:[#allocation14 + $0x1d8] sm:$0xf0]  ;;  %v7826_v9 = vld [vmem:[#allocation14 + $0x38c] sm:$0xf]  ;;  %v6507_v11 = vor.u32 %v7730_v63, %v6504_v0 }
 0x45c   : > { %v4746_v36 = vpop.f32.mrf.mxu2  ;;  %v6667_v48 = vor.u32 %v7770_v35, %v6664_v38  ;;  %v6632_v6 = vld [vmem:[#allocation14 + $0x198] sm:$0xf0]  ;;  %v7758_v19 = vld [vmem:[#allocation14 + $0x16c] sm:$0xf] }
 0x45d   : > { %5006 = vmatpush.bf16.msrb.mxu1 %v7111_v14  ;;  %v4747_v14 = vadd.f32 %v4746_v36, %v4733_v25  ;;  %v6760_v28 = vld [vmem:[#allocation14 + $0x298] sm:$0xf0]  ;;  %v7822_v25 = vld [vmem:[#allocation14 + $0x36c] sm:$0xf] }
 0x45e   : > { %5020 = vmatpush.bf16.msrb.mxu2 %v7239_v45  ;;  %v7834_v45 = vld [vmem:[#allocation14 + $0x3cc] sm:$0xf]  ;;  %v6888_v10 = vld [vmem:[#allocation14 + $0x398] sm:$0xf0]  ;;  %v6763_v17 = vor.u32 %v7794_v7, %v6760_v28 }
 0x45f   : > { %5034 = vmatpush.bf16.msrb.mxu3 %v7367_v5  ;;  %4993 = vmatpush.bf16.msrb.mxu0 %v6967_v55  ;;  %v6795_v5 = vor.u32 %v7802_v39, %v6792_v41  ;;  %v6923_v52 = vor.u32 %v7834_v45, %v6920_v46  ;;  %v7830_v55 = vld [vmem:[#allocation14 + $0x3ac] sm:$0xf]  ;;  %v6891_v37 = vor.u32 %v7826_v9, %v6888_v10  ;;  %v6744_v23 = vld [vmem:[#allocation14 + $0x278] sm:$0xf0] }
 0x460   : > { %v4760_v59 = vpop.f32.mrf.mxu3  ;;  %v6907_v4 = vor.u32 %v7830_v55, %v6904_v57  ;;  %v7722_v34 = vld [vmem:[#allocation14 + $0x4c] sm:$0xf]  ;;  %v6472_v35 = vld [vmem:[#allocation14 + $0x58] sm:$0xf0] }
 0x461   : > { %5007 = vmatpush.bf16.msrb.mxu1 %v7095_v60  ;;  %v6651_v60 = vor.u32 %v7766_v51, %v6648_v53  ;;  %v4761_v62 = vadd.f32 %v4760_v59, %v4747_v14  ;;  %v7754_v36 = vld [vmem:[#allocation14 + $0x14c] sm:$0xf]  ;;  %v6600_v39 = vld [vmem:[#allocation14 + $0x158] sm:$0xf0]  ;;  %v6475_v50 = vor.u32 %v7722_v34, %v6472_v35 }
 0x462   : > { %5021 = vmatpush.bf16.msrb.mxu2 %v7223_v61  ;;  %v6779_v61 = vor.u32 %v7798_v2, %v6776_v54  ;;  %v7786_v41 = vld [vmem:[#allocation14 + $0x24c] sm:$0xf]  ;;  %v6728_v14 = vld [vmem:[#allocation14 + $0x258] sm:$0xf0]  ;;  %v6603_v53 = vor.u32 %v7754_v36, %v6600_v39 }
 0x463   : > { %5035 = vmatpush.bf16.msrb.mxu3 %v7351_v3  ;;  %4994 = vmatpush.bf16.msrb.mxu0 %v6951_v30  ;;  %v7762_v3 = vld [vmem:[#allocation14 + $0x18c] sm:$0xf]  ;;  %v4772_v8 = vpop.f32.mrf.mxu0  ;;  %v6731_v2 = vor.u32 %v7786_v41, %v6728_v14  ;;  %v6456_v55 = vld [vmem:[#allocation14 + $0x38] sm:$0xf0] }
 0x464   : > { %v4773_v30 = vadd.f32 %v4772_v8, %v4759_v32  ;;  %v6635_v16 = vor.u32 %v7762_v3, %v6632_v6  ;;  %v7718_v54 = vld [vmem:[#allocation14 + $0x2c] sm:$0xf]  ;;  %v6712_v63 = vld [vmem:[#allocation14 + $0x238] sm:$0xf0] }
 0x465   : > { %5008 = vmatpush.bf16.msrb.mxu1 %v7079_v40  ;;  %v4786_v13 = vpop.f32.mrf.mxu1  ;;  %v7726_v40 = vld [vmem:[#allocation14 + $0x6c] sm:$0xf]  ;;  %v6840_v3 = vld [vmem:[#allocation14 + $0x338] sm:$0xf0] }
 0x466   : > { %5022 = vmatpush.bf16.msrb.mxu2 %v7207_v18  ;;  %4995 = vmatmul.bf16.vlgmr.msrb.gmra.mxu0 %v9280_v24  ;;  %v6488_v18 = vld [vmem:[#allocation14 + $0x78] sm:$0xf0]  ;;  %v4787_v42 = vadd.f32 %v4786_v13, %v4773_v30  ;;  %v7750_v57 = vld [vmem:[#allocation14 + $0x12c] sm:$0xf] }
 0x467   : > { %5036 = vmatpush.bf16.msrb.mxu3 %v7335_v21  ;;  %5043 = vmatpush.bf16.msra.mxu0 %v6555_v22  ;;  %v6616_v21 = vld [vmem:[#allocation14 + $0x178] sm:$0xf0]  ;;  %v7790_v22 = vld [vmem:[#allocation14 + $0x26c] sm:$0xf] }
 0x468   : > { %5009 = vmatmul.bf16.vlgmr.msrb.gmra.mxu1 %v9284_v31  ;;  %v6619_v32 = vor.u32 %v7758_v19, %v6616_v21  ;;  %v6747_v15 = vor.u32 %v7790_v22, %v6744_v23  ;;  %v7814_v0 = vld [vmem:[#allocation14 + $0x32c] sm:$0xf]  ;;  %v6440_v6 = vld [vmem:[#allocation14 + $0x18] sm:$0xf0] }
 0x469   : > { %5057 = vmatpush.bf16.msra.mxu1 %v6683_v26  ;;  %5023 = vmatmul.bf16.vlgmr.msrb.gmra.mxu2 %v9282_v29  ;;  %v6872_v26 = vld [vmem:[#allocation14 + $0x378] sm:$0xf0]  ;;  %v7746_v8 = vld [vmem:[#allocation14 + $0x10c] sm:$0xf]  ;;  %v6843_v30 = vor.u32 %v7814_v0, %v6840_v3  ;;  %v3420_v3 = vperm.slane %v9304_v12, 1 }
 0x46a   : > { %5071 = vmatpush.bf16.msra.mxu2 %v6811_v27  ;;  %5037 = vmatmul.bf16.vlgmr.msrb.gmra.mxu3 %v9286_v33  ;;  %v6491_v27 = vor.u32 %v7726_v40, %v6488_v18  ;;  %v6568_v9 = vld [vmem:[#allocation14 + $0x118] sm:$0xf0]  ;;  %v7778_v10 = vld [vmem:[#allocation14 + $0x20c] sm:$0xf] }
 0x46b   : > { %5085 = vmatpush.bf16.msra.mxu3 %v6939_v20  ;;  %5044 = vmatpush.bf16.msra.mxu0 %v6539_v47  ;;  %v6875_v20 = vor.u32 %v7822_v25, %v6872_v26  ;;  %v4774_v46 = vpop.f32.mrf.mxu0  ;;  %v6696_v13 = vld [vmem:[#allocation14 + $0x218] sm:$0xf0]  ;;  %v7870_v19 = vld [vmem:[#allocation14 + $0x4ec] sm:$0xf] }
 0x46c   : > { %v4800_v38 = vpop.f32.mrf.mxu2  ;;  %v4775_v49 = vadd.f32 %v4774_v46, %v4761_v62  ;;  %v6459_v62 = vor.u32 %v7718_v54, %v6456_v55  ;;  %v7192_v22 = vld [vmem:[#allocation14 + $0x5f8] sm:$0xf0]  ;;  %v7934_v23 = vld [vmem:[#allocation14 + $0x6ec] sm:$0xf] }
 0x46d   : > { %5058 = vmatpush.bf16.msra.mxu1 %v6667_v48  ;;  %v4801_v45 = vadd.f32 %v4800_v38, %v4787_v42  ;;  %v4814_v47 = vpop.f32.mrf.mxu3  ;;  %v7818_v48 = vld [vmem:[#allocation14 + $0x34c] sm:$0xf]  ;;  %v4788_v51 = vpop.f32.mrf.mxu1  ;;  %v7320_v25 = vld [vmem:[#allocation14 + $0x6f8] sm:$0xf0] }
 0x46e   : > { %5072 = vmatpush.bf16.msra.mxu2 %v6795_v5  ;;  %v6856_v5 = vld [vmem:[#allocation14 + $0x358] sm:$0xf0]  ;;  %v4789_v59 = vadd.f32 %v4788_v51, %v4775_v49  ;;  %v7902_v42 = vld [vmem:[#allocation14 + $0x5ec] sm:$0xf]  ;;  %v7323_v38 = vor.u32 %v7934_v23, %v7320_v25 }
 0x46f   : > { %5086 = vmatpush.bf16.msra.mxu3 %v6923_v52  ;;  %5045 = vmatpush.bf16.msra.mxu0 %v6523_v58  ;;  %v9311_v52 = vadd.f32 %v4814_v47, %v4801_v45  ;;  %v6859_v58 = vor.u32 %v7818_v48, %v6856_v5  ;;  %v7448_v34 = vld [vmem:[#allocation14 + $0x7f8] sm:$0xf0]  ;;  %v7866_v39 = vld [vmem:[#allocation14 + $0x4cc] sm:$0xf] }
 0x470   : > { %v7048_v41 = vld [vmem:[#allocation14 + $0x4d8] sm:$0xf0]  ;;  %v7898_v14 = vld [vmem:[#allocation14 + $0x5cc] sm:$0xf] }
 0x471   : > { %5059 = vmatpush.bf16.msra.mxu1 %v6651_v60  ;;  %v6584_v60 = vld [vmem:[#allocation14 + $0x138] sm:$0xf0]  ;;  %v7930_v47 = vld [vmem:[#allocation14 + $0x6cc] sm:$0xf] }
 0x472   : > { %5073 = vmatpush.bf16.msra.mxu2 %v6779_v61  ;;  %v7782_v61 = vld [vmem:[#allocation14 + $0x22c] sm:$0xf]  ;;  %v6587_v7 = vor.u32 %v7750_v57, %v6584_v60  ;;  %v7176_v46 = vld [vmem:[#allocation14 + $0x5d8] sm:$0xf0] }
 0x473   : > { %5087 = vmatpush.bf16.msra.mxu3 %v6907_v4  ;;  %5046 = vmatpush.bf16.msra.mxu0 %v6507_v11  ;;  %v7714_v4 = vld [vmem:[#allocation14 + $0xc] sm:$0xf]  ;;  %v6715_v28 = vor.u32 %v7782_v61, %v6712_v63  ;;  %v7304_v48 = vld [vmem:[#allocation14 + $0x6d8] sm:$0xf0]  ;;  %v7179_v51 = vor.u32 %v7898_v14, %v7176_v46 }
 0x474   : > { %v4802_v11 = vpop.f32.mrf.mxu2  ;;  %v6443_v21 = vor.u32 %v7714_v4, %v6440_v6  ;;  %v7962_v5 = vld [vmem:[#allocation14 + $0x7cc] sm:$0xf]  ;;  %v7432_v49 = vld [vmem:[#allocation14 + $0x7d8] sm:$0xf0] }
 0x475   : > { %5060 = vmatpush.bf16.msra.mxu1 %v6635_v16  ;;  %v7810_v16 = vld [vmem:[#allocation14 + $0x30c] sm:$0xf]  ;;  %v4803_v40 = vadd.f32 %v4802_v11, %v4789_v59  ;;  %v4816_v18 = vpop.f32.mrf.mxu3  ;;  %v7032_v54 = vld [vmem:[#allocation14 + $0x4b8] sm:$0xf0]  ;;  %v7435_v57 = vor.u32 %v7962_v5, %v7432_v49 }
 0x476   : > { %5074 = vmatpush.bf16.msra.mxu2 %v6763_v17  ;;  %v6824_v17 = vld [vmem:[#allocation14 + $0x318] sm:$0xf0]  ;;  %v7894_v55 = vld [vmem:[#allocation14 + $0x5ac] sm:$0xf] }
 0x477   : > { %5088 = vmatpush.bf16.msra.mxu3 %v6891_v37  ;;  %5047 = vmatpush.bf16.msra.mxu0 %v6491_v27  ;;  %v7064_v37 = vld [vmem:[#allocation14 + $0x4f8] sm:$0xf0]  ;;  %v9313_v26 = vadd.f32 %v4816_v18, %v4803_v40  ;;  %v6571_v27 = vor.u32 %v7746_v8, %v6568_v9  ;;  %v6827_v35 = vor.u32 %v7810_v16, %v6824_v17  ;;  %v7926_v59 = vld [vmem:[#allocation14 + $0x6ac] sm:$0xf] }
 0x478   : > { %v7067_v36 = vor.u32 %v7870_v19, %v7064_v37  ;;  %v7288_v60 = vld [vmem:[#allocation14 + $0x6b8] sm:$0xf0]  ;;  %v7958_v61 = vld [vmem:[#allocation14 + $0x7ac] sm:$0xf] }
 0x479   : > { %5061 = vmatpush.bf16.msra.mxu1 %v6619_v32  ;;  %v6699_v32 = vor.u32 %v7778_v10, %v6696_v13  ;;  %v7416_v63 = vld [vmem:[#allocation14 + $0x7b8] sm:$0xf0]  ;;  %v7291_v4 = vor.u32 %v7926_v59, %v7288_v60  ;;  %v7922_v9 = vld [vmem:[#allocation14 + $0x68c] sm:$0xf] }
 0x47a   : > { %5075 = vmatpush.bf16.msra.mxu2 %v6747_v15  ;;  %v7966_v15 = vld [vmem:[#allocation14 + $0x7ec] sm:$0xf]  ;;  %v7016_v6 = vld [vmem:[#allocation14 + $0x498] sm:$0xf0] }
 0x47b   : > { %5089 = vmatpush.bf16.msra.mxu3 %v6875_v20  ;;  %5048 = vmatpush.bf16.msra.mxu0 %v6475_v50  ;;  %v7195_v20 = vor.u32 %v7902_v42, %v7192_v22  ;;  %v7451_v45 = vor.u32 %v7966_v15, %v7448_v34  ;;  %v7051_v50 = vor.u32 %v7866_v39, %v7048_v41  ;;  %v7144_v8 = vld [vmem:[#allocation14 + $0x598] sm:$0xf0]  ;;  %v7954_v10 = vld [vmem:[#allocation14 + $0x78c] sm:$0xf] }
 0x47c   : > { %v7854_v40 = vld [vmem:[#allocation14 + $0x46c] sm:$0xf]  ;;  %v7000_v18 = vld [vmem:[#allocation14 + $0x478] sm:$0xf0] }
 0x47d   : > { %5062 = vmatpush.bf16.msra.mxu1 %v6603_v53  ;;  %v7307_v53 = vor.u32 %v7930_v47, %v7304_v48  ;;  %v7886_v19 = vld [vmem:[#allocation14 + $0x56c] sm:$0xf]  ;;  %v7128_v42 = vld [vmem:[#allocation14 + $0x578] sm:$0xf0] }
 0x47e   : > { %5076 = vmatpush.bf16.msra.mxu2 %v6731_v2  ;;  %v7862_v2 = vld [vmem:[#allocation14 + $0x4ac] sm:$0xf]  ;;  %v7256_v22 = vld [vmem:[#allocation14 + $0x678] sm:$0xf0]  ;;  %v7131_v15 = vor.u32 %v7886_v19, %v7128_v42 }
 0x47f   : > { %5090 = vmatpush.bf16.msra.mxu3 %v6859_v58  ;;  %5049 = vmatpush.bf16.msra.mxu0 %v6459_v62  ;;  %v7160_v58 = vld [vmem:[#allocation14 + $0x5b8] sm:$0xf0]  ;;  %v7035_v0 = vor.u32 %v7862_v2, %v7032_v54  ;;  %v7950_v25 = vld [vmem:[#allocation14 + $0x76c] sm:$0xf] }
 0x480   : > { %v7163_v62 = vor.u32 %v7894_v55, %v7160_v58  ;;  %v7112_v39 = vld [vmem:[#allocation14 + $0x558] sm:$0xf0]  ;;  %v7914_v41 = vld [vmem:[#allocation14 + $0x64c] sm:$0xf] }
 0x481   : > { %5063 = vmatpush.bf16.msra.mxu1 %v6587_v7  ;;  %v7890_v7 = vld [vmem:[#allocation14 + $0x58c] sm:$0xf]  ;;  %v7240_v14 = vld [vmem:[#allocation14 + $0x658] sm:$0xf0] }
 0x482   : > { %5077 = vmatpush.bf16.msra.mxu2 %v6715_v28  ;;  %v7419_v28 = vor.u32 %v7958_v61, %v7416_v63  ;;  %v7147_v16 = vor.u32 %v7890_v7, %v7144_v8  ;;  %v7946_v46 = vld [vmem:[#allocation14 + $0x74c] sm:$0xf]  ;;  %v7368_v47 = vld [vmem:[#allocation14 + $0x758] sm:$0xf0]  ;;  %v7243_v2 = vor.u32 %v7914_v41, %v7240_v14 }
 0x483   : > { %5091 = vmatpush.bf16.msra.mxu3 %v6843_v30  ;;  %5050 = vmatpush.bf16.msra.mxu0 %v6443_v21  ;;  %v4828_v30 = vpop.f32.mrf.mxu0  ;;  %v7918_v21 = vld [vmem:[#allocation14 + $0x66c] sm:$0xf]  ;;  %v6968_v55 = vld [vmem:[#allocation14 + $0x438] sm:$0xf0]  ;;  %v7371_v60 = vor.u32 %v7946_v46, %v7368_v47 }
 0x484   : > { %v7259_v34 = vor.u32 %v7918_v21, %v7256_v22  ;;  %v7846_v54 = vld [vmem:[#allocation14 + $0x42c] sm:$0xf]  ;;  %v7096_v61 = vld [vmem:[#allocation14 + $0x538] sm:$0xf0] }
 0x485   : > { %5064 = vmatpush.bf16.msra.mxu1 %v6571_v27  ;;  %v4842_v13 = vpop.f32.mrf.mxu1  ;;  %v7384_v27 = vld [vmem:[#allocation14 + $0x778] sm:$0xf0]  ;;  %v7910_v63 = vld [vmem:[#allocation14 + $0x62c] sm:$0xf] }
 0x486   : > { %5078 = vmatpush.bf16.msra.mxu2 %v6699_v32  ;;  %5051 = vmatmul.bf16.vlgmr.msra.gmra.mxu0 %v9261_v43  ;;  %v7272_v43 = vld [vmem:[#allocation14 + $0x698] sm:$0xf0]  ;;  %v7003_v32 = vor.u32 %v7854_v40, %v7000_v18 }
 0x487   : > { %5092 = vmatpush.bf16.msra.mxu3 %v6827_v35  ;;  %5099 = vmatpush.bf16.msrb.mxu0 %v7067_v36  ;;  %v7275_v17 = vor.u32 %v7922_v9, %v7272_v43  ;;  %v7850_v35 = vld [vmem:[#allocation14 + $0x44c] sm:$0xf]  ;;  %v6984_v36 = vld [vmem:[#allocation14 + $0x458] sm:$0xf0] }
 0x488   : > { %5065 = vmatmul.bf16.vlgmr.msra.gmra.mxu1 %v9266_v56  ;;  %v4829_v56 = vadd.f32 %v4828_v30, %v3420_v3  ;;  %v6952_v8 = vld [vmem:[#allocation14 + $0x418] sm:$0xf0]  ;;  %v7874_v9 = vld [vmem:[#allocation14 + $0x50c] sm:$0xf] }
 0x489   : > { %5113 = vmatpush.bf16.msrb.mxu1 %v7195_v20  ;;  %5079 = vmatmul.bf16.vlgmr.msra.gmra.mxu2 %v9263_v44  ;;  %v7858_v44 = vld [vmem:[#allocation14 + $0x48c] sm:$0xf]  ;;  %v7208_v30 = vld [vmem:[#allocation14 + $0x618] sm:$0xf0] }
 0x48a   : > { %5127 = vmatpush.bf16.msrb.mxu2 %v7323_v38  ;;  %5093 = vmatmul.bf16.vlgmr.msra.gmra.mxu3 %v9270_v1  ;;  %v7400_v1 = vld [vmem:[#allocation14 + $0x798] sm:$0xf0]  ;;  %v7019_v11 = vor.u32 %v7858_v44, %v7016_v6  ;;  %v4843_v23 = vadd.f32 %v4842_v13, %v4829_v56  ;;  %v7882_v20 = vld [vmem:[#allocation14 + $0x54c] sm:$0xf]  ;;  %v7387_v38 = vor.u32 %v7950_v25, %v7384_v27  ;;  %v9324_v27 = vld [vmem:[#allocation17] sm:$0xf] }
 0x48b   : > { %5141 = vmatpush.bf16.msrb.mxu3 %v7451_v45  ;;  %5100 = vmatpush.bf16.msrb.mxu0 %v7051_v50  ;;  %v7403_v37 = vor.u32 %v7954_v10, %v7400_v1  ;;  %v4830_v5 = vpop.f32.mrf.mxu0  ;;  %v6987_v50 = vor.u32 %v7850_v35, %v6984_v36  ;;  %v7352_v44 = vld [vmem:[#allocation14 + $0x738] sm:$0xf0]  ;;  %v6971_v6 = vor.u32 %v7846_v54, %v6968_v55  ;;  %v7906_v1 = vld [vmem:[#allocation14 + $0x60c] sm:$0xf]  ;;  %v5165_v36 = vperm.slane %v9324_v27, 0 }
 0x48c   : > { %v4856_v45 = vpop.f32.mrf.mxu2  ;;  %v7080_v10 = vld [vmem:[#allocation14 + $0x518] sm:$0xf0]  ;;  %v7938_v56 = vld [vmem:[#allocation14 + $0x70c] sm:$0xf]  ;;  %v7211_v19 = vor.u32 %v7906_v1, %v7208_v30  ;;  %v3422_v1 = vperm.slane %v9304_v12, 3 }
 0x48d   : > { %5114 = vmatpush.bf16.msrb.mxu1 %v7179_v51  ;;  %v4857_v48 = vadd.f32 %v4856_v45, %v4843_v23  ;;  %v4870_v49 = vpop.f32.mrf.mxu3  ;;  %v4831_v51 = vadd.f32 %v4830_v5, %v3420_v3  ;;  %v4844_v59 = vpop.f32.mrf.mxu1  ;;  %v7336_v13 = vld [vmem:[#allocation14 + $0x718] sm:$0xf0]  ;;  %v7083_v18 = vor.u32 %v7874_v9, %v7080_v10  ;;  %v5159_v5 = vmax.f32 %v9313_v26, 0.0 }
 0x48e   : > { %5128 = vmatpush.bf16.msrb.mxu2 %v7307_v53  ;;  %v7115_v53 = vor.u32 %v7882_v20, %v7112_v39  ;;  %v7339_v42 = vor.u32 %v7938_v56, %v7336_v13 }
 0x48f   : > { %5142 = vmatpush.bf16.msrb.mxu3 %v7435_v57  ;;  %5101 = vmatpush.bf16.msrb.mxu0 %v7035_v0  ;;  %v7878_v57 = vld [vmem:[#allocation14 + $0x52c] sm:$0xf]  ;;  %v4871_v58 = vadd.f32 %v4870_v49, %v4857_v48  ;;  %v7224_v0 = vld [vmem:[#allocation14 + $0x638] sm:$0xf0] }
 0x490   : > { %v7099_v3 = vor.u32 %v7878_v57, %v7096_v61  ;;  %v7227_v7 = vor.u32 %v7910_v63, %v7224_v0 }
 0x491   : > { %5115 = vmatpush.bf16.msrb.mxu1 %v7163_v62  ;;  %v4845_v62 = vadd.f32 %v4844_v59, %v4831_v51  ;;  %v5177_v51 = vmul.f32 %v5165_v36, %v5159_v5 }
 0x492   : > { %5129 = vmatpush.bf16.msrb.mxu2 %v7291_v4  ;;  %v7942_v4 = vld [vmem:[#allocation14 + $0x72c] sm:$0xf] }
 0x493   : > { %5143 = vmatpush.bf16.msrb.mxu3 %v7419_v28  ;;  %5102 = vmatpush.bf16.msrb.mxu0 %v7019_v11  ;;  %v7842_v28 = vld [vmem:[#allocation14 + $0x40c] sm:$0xf]  ;;  %v7355_v43 = vor.u32 %v7942_v4, %v7352_v44 }
 0x494   : > { %v4858_v11 = vpop.f32.mrf.mxu2 }
 0x495   : > { %5116 = vmatpush.bf16.msrb.mxu1 %v7147_v16  ;;  %v4859_v16 = vadd.f32 %v4858_v11, %v4845_v62  ;;  %v4872_v40 = vpop.f32.mrf.mxu3  ;;  %v3421_v62 = vperm.slane %v9304_v12, 2 }
 0x496   : > { %5130 = vmatpush.bf16.msrb.mxu2 %v7275_v17  ;;  %v6955_v17 = vor.u32 %v7842_v28, %v6952_v8 }
 0x497   : > { %5144 = vmatpush.bf16.msrb.mxu3 %v7403_v37  ;;  %5103 = vmatpush.bf16.msrb.mxu0 %v7003_v32  ;;  %v4873_v37 = vadd.f32 %v4872_v40, %v4859_v16 }
 0x499   : > { %5117 = vmatpush.bf16.msrb.mxu1 %v7131_v15 }
 0x49a   : > { %5131 = vmatpush.bf16.msrb.mxu2 %v7259_v34 }
 0x49b   : > { %5145 = vmatpush.bf16.msrb.mxu3 %v7387_v38  ;;  %5104 = vmatpush.bf16.msrb.mxu0 %v6987_v50 }
 0x49d   : > { %5118 = vmatpush.bf16.msrb.mxu1 %v7115_v53 }
 0x49e   : > { %5132 = vmatpush.bf16.msrb.mxu2 %v7243_v2 }
 0x49f   : > { %5146 = vmatpush.bf16.msrb.mxu3 %v7371_v60  ;;  %5105 = vmatpush.bf16.msrb.mxu0 %v6971_v6 }
 0x4a1   : > { %5119 = vmatpush.bf16.msrb.mxu1 %v7099_v3 }
 0x4a2   : > { %5133 = vmatpush.bf16.msrb.mxu2 %v7227_v7 }
 0x4a3   : > { %5147 = vmatpush.bf16.msrb.mxu3 %v7355_v43  ;;  %5106 = vmatpush.bf16.msrb.mxu0 %v6955_v17  ;;  %v4884_v21 = vpop.f32.mrf.mxu0 }
 0x4a4   : > { %v4885_v22 = vadd.f32 %v4884_v21, %v4871_v58 }
 0x4a5   : > { %5120 = vmatpush.bf16.msrb.mxu1 %v7083_v18  ;;  %v4898_v23 = vpop.f32.mrf.mxu1 }
 0x4a6   : > { %5134 = vmatpush.bf16.msrb.mxu2 %v7211_v19  ;;  %5107 = vmatmul.bf16.vlgmr.msrb.gmra.mxu0 %v9280_v24  ;;  %v4899_v25 = vadd.f32 %v4898_v23, %v4885_v22  ;;  %v5155_v24 = vmax.f32 %v9311_v52, 0.0 }
 0x4a7   : > { %5148 = vmatpush.bf16.msrb.mxu3 %v7339_v42 }
 0x4a8   : > { %5121 = vmatmul.bf16.vlgmr.msrb.gmra.mxu1 %v9284_v31  ;;  %v5173_v39 = vmul.f32 %v5165_v36, %v5155_v24 }
 0x4a9   : > { %5135 = vmatmul.bf16.vlgmr.msrb.gmra.mxu2 %v9282_v29  ;;  %v5166_v29 = vperm.slane %v9324_v27, 1 }
 0x4aa   : > { %5149 = vmatmul.bf16.vlgmr.msrb.gmra.mxu3 %v9286_v33 }
 0x4ab   : > { %v4886_v34 = vpop.f32.mrf.mxu0 }
 0x4ac   : > { %v4912_v32 = vpop.f32.mrf.mxu2  ;;  %v4887_v20 = vadd.f32 %v4886_v34, %v4873_v37 }
 0x4ad   : > { %v4913_v15 = vadd.f32 %v4912_v32, %v4899_v25  ;;  %v4926_v35 = vpop.f32.mrf.mxu3  ;;  %v4900_v38 = vpop.f32.mrf.mxu1 }
 0x4ae   : > { %v4901_v14 = vadd.f32 %v4900_v38, %v4887_v20 }
 0x4af   : > { %v4927_v31 = vadd.f32 %v4926_v35, %v4913_v15 }
 0x4b1   : > { %v5156_v33 = vmax.f32 %v4927_v31, 0.0 }
 0x4b3   : > { %v5174_v41 = vmul.f32 %v5166_v29, %v5156_v33 }
 0x4b4   : > { %v4914_v45 = vpop.f32.mrf.mxu2 }
 0x4b5   : > { %v4915_v46 = vadd.f32 %v4914_v45, %v4901_v14  ;;  %v4928_v47 = vpop.f32.mrf.mxu3  ;;  %v9329_v48 = vadd.f32 %v5174_v41, %v5173_v39  ;;  %v5167_v41 = vperm.slane %v9324_v27, 2 }
 0x4b7   : > { %v4929_v49 = vadd.f32 %v4928_v47, %v4915_v46 }
 0x4b9   : > { %v5160_v50 = vmax.f32 %v4929_v49, 0.0 }
 0x4bb   : > { %v5178_v52 = vmul.f32 %v5166_v29, %v5160_v50 }
 0x4bd   : > { %v9332_v53 = vadd.f32 %v5178_v52, %v5177_v51 }
 0x4c3   : > { %v4940_v2 = vpop.f32.mrf.mxu0 }
 0x4c4   : > { %v4941_v44 = vadd.f32 %v4940_v2, %v3421_v62 }
 0x4c5   : > { %v4954_v54 = vpop.f32.mrf.mxu1 }
 0x4c6   : > { %v4955_v3 = vadd.f32 %v4954_v54, %v4941_v44 }
 0x4cb   : > { %v4942_v58 = vpop.f32.mrf.mxu0 }
 0x4cc   : > { %v4968_v55 = vpop.f32.mrf.mxu2  ;;  %v4943_v10 = vadd.f32 %v4942_v58, %v3421_v62 }
 0x4cd   : > { %v4982_v57 = vpop.f32.mrf.mxu3  ;;  %v4956_v59 = vpop.f32.mrf.mxu1  ;;  %v4969_v28 = vadd.f32 %v4968_v55, %v4955_v3  ;;  %v5168_v55 = vperm.slane %v9324_v27, 3  ;;  %v8086_v27 = vld [vmem:[#allocation4] ss:$0 sm:$0xff] }
 0x4ce   : > { %v4957_v56 = vadd.f32 %v4956_v59, %v4943_v10 }
 0x4cf   : > { %v4983_v30 = vadd.f32 %v4982_v57, %v4969_v28 }
 0x4d4   : > { %v4970_v60 = vpop.f32.mrf.mxu2 }
 0x4d5   : > { %v4984_v61 = vpop.f32.mrf.mxu3  ;;  %v4971_v18 = vadd.f32 %v4970_v60, %v4957_v56 }
 0x4d7   : > { %v4985_v22 = vadd.f32 %v4984_v61, %v4971_v18 }
 0x4e3   : > { %v4996_v63 = vpop.f32.mrf.mxu0 }
 0x4e4   : > { %v4997_v16 = vadd.f32 %v4996_v63, %v4983_v30 }
 0x4e5   : > { %v5010_v0 = vpop.f32.mrf.mxu1 }
 0x4e6   : > { %v5011_v42 = vadd.f32 %v5010_v0, %v4997_v16 }
 0x4eb   : > { %v4998_v6 = vpop.f32.mrf.mxu0 }
 0x4ec   : > { %v5024_v4 = vpop.f32.mrf.mxu2  ;;  %v4999_v34 = vadd.f32 %v4998_v6, %v4985_v22 }
 0x4ed   : > { %v5038_v26 = vpop.f32.mrf.mxu3  ;;  %v5012_v7 = vpop.f32.mrf.mxu1  ;;  %v5025_v32 = vadd.f32 %v5024_v4, %v5011_v42 }
 0x4ee   : > { %v5013_v38 = vadd.f32 %v5012_v7, %v4999_v34 }
 0x4ef   : > { %v5039_v20 = vadd.f32 %v5038_v26, %v5025_v32 }
 0x4f1   : > { %v5157_v39 = vmax.f32 %v5039_v20, 0.0 }
 0x4f3   : > { %v5175_v51 = vmul.f32 %v5167_v41, %v5157_v39 }
 0x4f4   : > { %v5026_v8 = vpop.f32.mrf.mxu2 }
 0x4f5   : > { %v5040_v9 = vpop.f32.mrf.mxu3  ;;  %v5027_v14 = vadd.f32 %v5026_v8, %v5013_v38  ;;  %v5182_v63 = vadd.f32 %v9329_v48, %v5175_v51 }
 0x4f7   : > { %v5041_v52 = vadd.f32 %v5040_v9, %v5027_v14 }
 0x4f9   : > { %v5161_v59 = vmax.f32 %v5041_v52, 0.0 }
 0x4fb   : > { %v5179_v44 = vmul.f32 %v5167_v41, %v5161_v59 }
 0x4fd   : > { %v5187_v28 = vadd.f32 %v9332_v53, %v5179_v44 }
 0x503   : > { %v5052_v43 = vpop.f32.mrf.mxu0 }
 0x504   : > { %v5053_v13 = vadd.f32 %v5052_v43, %v3422_v1 }
 0x505   : > { %v5066_v11 = vpop.f32.mrf.mxu1 }
 0x506   : > { %v5067_v19 = vadd.f32 %v5066_v11, %v5053_v13 }
 0x50b   : > { %v5054_v37 = vpop.f32.mrf.mxu0 }
 0x50c   : > { %v5080_v17 = vpop.f32.mrf.mxu2  ;;  %v5055_v25 = vadd.f32 %v5054_v37, %v3422_v1 }
 0x50d   : > { %v5094_v40 = vpop.f32.mrf.mxu3  ;;  %v5068_v21 = vpop.f32.mrf.mxu1  ;;  %v5081_v23 = vadd.f32 %v5080_v17, %v5067_v19 }
 0x50e   : > { %v5069_v12 = vadd.f32 %v5068_v21, %v5055_v25 }
 0x50f   : > { %v5095_v35 = vadd.f32 %v5094_v40, %v5081_v23 }
 0x514   : > { %v5082_v15 = vpop.f32.mrf.mxu2 }
 0x515   : > { %v5096_v36 = vpop.f32.mrf.mxu3  ;;  %v5083_v33 = vadd.f32 %v5082_v15, %v5069_v12 }
 0x517   : > { %v5097_v47 = vadd.f32 %v5096_v36, %v5083_v33 }
 0x523   : > { %v5108_v24 = vpop.f32.mrf.mxu0 }
 0x524   : > { %v5109_v31 = vadd.f32 %v5108_v24, %v5095_v35 }
 0x525   : > { %v5122_v29 = vpop.f32.mrf.mxu1 }
 0x526   : > { %v5123_v45 = vadd.f32 %v5122_v29, %v5109_v31 }
 0x52b   : > { %v5110_v50 = vpop.f32.mrf.mxu0 }
 0x52c   : > { %v5136_v46 = vpop.f32.mrf.mxu2  ;;  %v5111_v54 = vadd.f32 %v5110_v50, %v5097_v47 }
 0x52d   : > { %v5137_v5 = vadd.f32 %v5136_v46, %v5123_v45  ;;  %v5150_v49 = vpop.f32.mrf.mxu3  ;;  %v5124_v58 = vpop.f32.mrf.mxu1 }
 0x52e   : > { %v5125_v60 = vadd.f32 %v5124_v58, %v5111_v54 }
 0x52f   : > { %v5151_v2 = vadd.f32 %v5150_v49, %v5137_v5 }
 0x531   : > { %v5158_v57 = vmax.f32 %v5151_v2, 0.0 }
 0x533   : > { %v5176_v61 = vmul.f32 %v5168_v55, %v5158_v57 }
 0x534   : > { %v5138_v0 = vpop.f32.mrf.mxu2 }
 0x535   : > { %v5139_v62 = vadd.f32 %v5138_v0, %v5125_v60  ;;  %v5183_v4 = vadd.f32 %v5182_v63, %v5176_v61  ;;  %v5152_v26 = vpop.f32.mrf.mxu3 }
 0x537   : > { %v5153_v6 = vadd.f32 %v5152_v26, %v5139_v62  ;;  %5184 = vadd.xlane.f32.xlu0 %v5183_v4 }
 0x539   : > { %v5162_v3 = vmax.f32 %v5153_v6, 0.0 }
 0x53b   : > { %v5180_v7 = vmul.f32 %v5168_v55, %v5162_v3 }
 0x53d   : > { %v5188_v8 = vadd.f32 %v5187_v28, %v5180_v7 }
 0x53f   : > { %5189 = vadd.xlane.f32.xlu0 %v5188_v8 }
 0x5aa   : > { %v5185_v9 = vpop.xlane.xlu0 %5184 }
 0x5ab   : > { %v5195_v43 = vadd.f32 %v8086_v27, %v5185_v9 }
 0x5ad   : > { %v5198_v10 = vsel %vm5197_vm2, %v5195_v43, -inf }
 0x5ae   : > { %v5199_v48 = vrot.slane %v5198_v10, 4 }
 0x5b0   : > { %v5200_v1 = vmax.f32 %v5198_v10, %v5199_v48 }
 0x5b2   : > { %v5201_v30 = vrot.slane %v5200_v1, 2  ;;  %v5190_v11 = vpop.xlane.xlu0 %5189 }
 0x5b3   : > { %v5196_v56 = vadd.f32 %v8086_v27, %v5190_v11 }
 0x5b4   : > { %v5202_v13 = vmax.f32 %v5200_v1, %v5201_v30 }
 0x5b5   : > { %v5220_v16 = vsel %vm5197_vm2, %v5196_v56, -inf }
 0x5b6   : > { %v5203_v17 = vrot.slane %v5202_v13, 1  ;;  %v5221_v40 = vrot.slane %v5220_v16, 4 }
 0x5b8   : > { %v5204_v18 = vmax.f32 %v5202_v13, %v5203_v17  ;;  %v5222_v53 = vmax.f32 %v5220_v16, %v5221_v40 }
 0x5ba   : > { %v5205_v19 = vsub.f32 %v5195_v43, %v5204_v18  ;;  %v5223_v37 = vrot.slane %v5222_v53, 2 }
 0x5bc   : > { %v5206_v42 = vmul.f32 1.442695, %v5205_v19  ;;  %v5224_v21 = vmax.f32 %v5222_v53, %v5223_v37 }
 0x5be   : > { %8087 = vpow2.f32 %v5206_v42  ;;  %v5225_v22 = vrot.slane %v5224_v21, 1 }
 0x5c0   : > { %v5226_v23 = vmax.f32 %v5224_v21, %v5225_v22 }
 0x5c2   : > { %v5227_v25 = vsub.f32 %v5196_v56, %v5226_v23 }
 0x5c4   : > { %v8088_v32 = vpop.eup %8087  ;;  %v5228_v15 = vmul.f32 1.442695, %v5227_v25 }
 0x5c5   : > { %v5208_v34 = vsel %vm5197_vm2, %v8088_v32, 0.0 }
 0x5c6   : > { %v5209_v35 = vrot.slane %v5208_v34, 4  ;;  %8089 = vpow2.f32 %v5228_v15 }
 0x5c8   : > { %v5210_v12 = vadd.f32 %v5209_v35, %v5208_v34 }
 0x5ca   : > { %v5211_v36 = vrot.slane %v5210_v12, 2 }
 0x5cc   : > { %v8090_v24 = vpop.eup %8089  ;;  %v5212_v20 = vadd.f32 %v5211_v36, %v5210_v12 }
 0x5cd   : > { %v5230_v31 = vsel %vm5197_vm2, %v8090_v24, 0.0 }
 0x5ce   : > { %v5213_v29 = vrot.slane %v5212_v20, 1  ;;  %v5231_v38 = vrot.slane %v5230_v31, 4 }
 0x5d0   : > { %v5214_v33 = vadd.f32 %v5213_v29, %v5212_v20  ;;  %v5232_v39 = vadd.f32 %v5231_v38, %v5230_v31 }
 0x5d2   : > { %8091 = vlog2.f32 %v5214_v33  ;;  %v5233_v41 = vrot.slane %v5232_v39, 2 }
 0x5d4   : > { %v5234_v14 = vadd.f32 %v5233_v41, %v5232_v39 }
 0x5d6   : > { %v5235_v45 = vrot.slane %v5234_v14, 1 }
 0x5d8   : > { %v8092_v46 = vpop.eup %8091  ;;  %v5236_v47 = vadd.f32 %v5235_v45, %v5234_v14 }
 0x5d9   : > { %v5216_v5 = vmul.f32 0.6931472, %v8092_v46 }
 0x5da   : > { %8093 = vlog2.f32 %v5236_v47 }
 0x5db   : > { %v5217_v49 = vadd.f32 %v5216_v5, %v5204_v18 }
 0x5dd   : > { %v5218_v50 = vsub.f32 %v5195_v43, %v5217_v49 }
 0x5df   : > { %5219 = vst.msk [vmem:[%s9394_s8] sm:$0xff] %vm5197_vm2, %v5218_v50 }
 0x5e0   : > { %v8094_v51 = vpop.eup %8093 }
 0x5e1   : > { %v5238_v52 = vmul.f32 0.6931472, %v8094_v51 }
 0x5e3   : > { %v5239_v2 = vadd.f32 %v5238_v52, %v5226_v23 }
 0x5e5   : > { %v5240_v54 = vsub.f32 %v5196_v56, %v5239_v2 }
 0x5e7   : > { %5241 = vst.msk [vmem:[%s9394_s8 + $0x8] sm:$0xff] %vm5197_vm2, %v5240_v54 }
 0x5e8 PF: > { %s9395_s26 = sld [smem:[#allocation25_spill]]  ;;  %s9397_s23 = smov %s8379_s24 }
 0x5e9   : > { %s9396_s29 = sld [smem:[#allocation26_spill]]  ;;  %s9398_s24 = smov %s8383_s25 }
 0x5ee   : > { %p28_p8 = scmp.ge.s32.totalorder %s9395_s26, 8  }
 0x5ef   : > { %s9399_s25 = smov %s9396_s29 }
 0x5f0   :  { %30 = sbr.rel (!%p28_p8) target bundleno = 12 (0xc), region = 175 }
 0x5f5   :  { %5253 = vsyncpa [#allocation7], 1 }
 0x5f6   :  { %5255 = vsyncpa [#allocation7 + $0x1], 1 }
 0x5f7   :  { %5256 = vsyncpa [#allocation9], 1 }
 0x5f8   :  { %5257 = vsyncpa [#allocation12], 1 }
 0x5f9   :  { %5259 = vsyncpa [#allocation12 + $0x1], 1 }
 0x5fa   :  { %5260 = vsyncpa [#allocation15], 1 }
 0x5fb   :  { %5261 = vsyncpa [#allocation18], 1 }

</bundles_post_ra>
